<compile_context>
chip_gen: v7x
topology: tpu7x:2x2x1
jax: 0.10.0
libtpu: 0.0.40
codegen_flags: <defaults>
</compile_context>

<pallas_src>
import math

import jax
import jax.numpy as jnp
from jax.experimental import pallas as pl
from jax.experimental.pallas import tpu as pltpu

_LN_EPS = 1e-5                    # torch.nn.LayerNorm default
_VMEM_LIMIT = 64 * 1024 * 1024    # safe on v5e/v6e (128 MiB) and v7x (64 MiB)


def _pick_tile(dim, target, quantum):
    """Largest tile <= target that divides `dim` and is a multiple of `quantum`.
    Falls back to the full dim (a full-extent block is always legal)."""
    if dim <= target:
        return dim
    t = (target // quantum) * quantum
    while t >= quantum:
        if dim % t == 0:
            return t
        t -= quantum
    return dim


# ----------------------------------------------------------------------------
# Kernels
# ----------------------------------------------------------------------------
def _proj_kernel(x_ref, w_ref, b_ref, o_ref):
    # x: [tm, K]  w: [K, N]  b: [1, N]  ->  o: [tm, N]
    o_ref[...] = (
        jnp.dot(x_ref[...], w_ref[...], preferred_element_type=jnp.float32)
        + b_ref[...]
    ).astype(o_ref.dtype)


def _make_attn_kernel(mask_mode):
    """Fused attention core + per-head output projection + residual + LayerNorm.

    Grid = (batch, head). Head is a reduction axis: each step accumulates
    `softmax(qk^T) v @ W_out[h]` into the VMEM accumulator; the final head
    applies bias + residual + LayerNorm and stores the [Sq, D] tile.
    mask_mode: "none" | "tensor" | "causal".
    """

    def kernel(*refs):
        if mask_mode == "tensor":
            (q_ref, k_ref, v_ref, mask_ref, wo_ref, bo_ref,
             res_ref, g_ref, beta_ref, o_ref, acc_ref) = refs
        else:
            (q_ref, k_ref, v_ref, wo_ref, bo_ref,
             res_ref, g_ref, beta_ref, o_ref, acc_ref) = refs
            mask_ref = None

        h = pl.program_id(1)

        @pl.when(h == 0)
        def _():
            acc_ref[...] = jnp.zeros_like(acc_ref)

        q = q_ref[0, 0].astype(jnp.float32)          # [Sq, dk]
        k = k_ref[0, 0].astype(jnp.float32)          # [Sk, dk]
        v = v_ref[0, 0].astype(jnp.float32)          # [Sk, dk]
        dk = q.shape[-1]

        # Fold the 1/sqrt(d_k) scale into q (the smaller tensor).
        q = q * (1.0 / math.sqrt(dk))
        # scores[s, t] = sum_d q[s, d] * k[t, d]
        scores = jax.lax.dot_general(
            q, k, (((1,), (1,)), ((), ())), preferred_element_type=jnp.float32)

        if mask_mode == "tensor":
            scores = jnp.where(mask_ref[0, 0] == 0,
                               jnp.finfo(jnp.float32).min, scores)
        elif mask_mode == "causal":
            sq, sk = scores.shape
            qi = jax.lax.broadcasted_iota(jnp.int32, (sq, sk), 0)
            ki = jax.lax.broadcasted_iota(jnp.int32, (sq, sk), 1)
            scores = jnp.where(ki > qi, jnp.finfo(jnp.float32).min, scores)

        scores = scores - jnp.max(scores, axis=-1, keepdims=True)
        w = jnp.exp(scores)
        w = w * pl.reciprocal(jnp.sum(w, axis=-1, keepdims=True), approx=True)
        # TODO(synk): attention-weight dropout (p=0.1) is identity in eval mode.

        ctx = jnp.dot(w, v, preferred_element_type=jnp.float32)       # [Sq, dk]
        # Per-head slice of the output projection; summing over heads is exactly
        # `context.transpose(1,2).flatten(2) @ W_out`.
        acc_ref[...] += jnp.dot(ctx, wo_ref[0].astype(jnp.float32),
                                preferred_element_type=jnp.float32)   # [Sq, D]

        @pl.when(h == pl.num_programs(1) - 1)
        def _():
            y = acc_ref[...] + bo_ref[...] + res_ref[0].astype(jnp.float32)
            mean = jnp.mean(y, axis=-1, keepdims=True)
            var = jnp.mean((y - mean) ** 2, axis=-1, keepdims=True)
            yn = (y - mean) * jax.lax.rsqrt(var + _LN_EPS)
            o_ref[0] = (yn * g_ref[...] + beta_ref[...]).astype(o_ref.dtype)

    return kernel


def _ffn_kernel(x_ref, w1_ref, b1_ref, w2_ref, b2_ref,
                res_ref, g_ref, beta_ref, o_ref, acc_ref):
    # Grid = (row-tile, mid-chunk). mid-chunk is a reduction axis.
    c = pl.program_id(1)

    @pl.when(c == 0)
    def _():
        acc_ref[...] = jnp.zeros_like(acc_ref)

    hidden = jnp.dot(x_ref[...].astype(jnp.float32), w1_ref[...],
                     preferred_element_type=jnp.float32) + b1_ref[...]
    hidden = jnp.maximum(hidden, 0.0)
    # TODO(synk): hidden-activation dropout (p=0.1) is identity in eval mode.
    acc_ref[...] += jnp.dot(hidden, w2_ref[...],
                            preferred_element_type=jnp.float32)

    @pl.when(c == pl.num_programs(1) - 1)
    def _():
        y = acc_ref[...] + b2_ref[...] + res_ref[...].astype(jnp.float32)
        mean = jnp.mean(y, axis=-1, keepdims=True)
        var = jnp.mean((y - mean) ** 2, axis=-1, keepdims=True)
        yn = (y - mean) * jax.lax.rsqrt(var + _LN_EPS)
        o_ref[...] = (yn * g_ref[...] + beta_ref[...]).astype(o_ref.dtype)


# ----------------------------------------------------------------------------
# pallas_call wrappers
# ----------------------------------------------------------------------------
def _proj(x2d, w, b):
    M, K = x2d.shape
    N = w.shape[1]
    tm = _pick_tile(M, 256, 8)
    return pl.pallas_call(
        _proj_kernel,
        out_shape=jax.ShapeDtypeStruct((M, N), x2d.dtype),
        grid_spec=pltpu.PrefetchScalarGridSpec(
            num_scalar_prefetch=0,
            grid=(M // tm,),
            in_specs=[
                pl.BlockSpec((tm, K), lambda i: (i, 0)),
                pl.BlockSpec((K, N), lambda i: (0, 0)),   # weight resident
                pl.BlockSpec((1, N), lambda i: (0, 0)),
            ],
            out_specs=pl.BlockSpec((tm, N), lambda i: (i, 0)),
        ),
        compiler_params=pltpu.CompilerParams(
            dimension_semantics=("parallel",),
            vmem_limit_bytes=_VMEM_LIMIT,
        ),
    )(x2d, w, b.reshape(1, N))


def _attn_out_ln(q, k, v, wo_r, bo, residual, gamma, beta, *, mask, causal):
    B, H, Sq, dk = q.shape
    Sk = k.shape[2]
    D = wo_r.shape[-1]

    if causal:
        mask_mode = "causal"
    elif mask is not None:
        mask_mode = "tensor"
    else:
        mask_mode = "none"

    in_specs = [
        pl.BlockSpec((1, 1, Sq, dk), lambda b, h: (b, h, 0, 0)),   # q
        pl.BlockSpec((1, 1, Sk, dk), lambda b, h: (b, h, 0, 0)),   # k
        pl.BlockSpec((1, 1, Sk, dk), lambda b, h: (b, h, 0, 0)),   # v
    ]
    inputs = [q, k, v]
    if mask_mode == "tensor":
        in_specs.append(pl.BlockSpec((1, 1, Sq, Sk), lambda b, h: (b, 0, 0, 0)))
        inputs.append(mask)
    in_specs += [
        pl.BlockSpec((1, dk, D), lambda b, h: (h, 0, 0)),          # W_out[h]
        pl.BlockSpec((1, D), lambda b, h: (0, 0)),                 # b_out
        pl.BlockSpec((1, Sq, D), lambda b, h: (b, 0, 0)),          # residual
        pl.BlockSpec((1, D), lambda b, h: (0, 0)),                 # ln gamma
        pl.BlockSpec((1, D), lambda b, h: (0, 0)),                 # ln beta
    ]
    inputs += [wo_r, bo, residual, gamma, beta]

    return pl.pallas_call(
        _make_attn_kernel(mask_mode),
        out_shape=jax.ShapeDtypeStruct((B, Sq, D), q.dtype),
        grid_spec=pltpu.PrefetchScalarGridSpec(
            num_scalar_prefetch=0,
            grid=(B, H),                     # head axis last = reduction
            in_specs=in_specs,
            out_specs=pl.BlockSpec((1, Sq, D), lambda b, h: (b, 0, 0)),
            scratch_shapes=[pltpu.VMEM((Sq, D), jnp.float32)],
        ),
        compiler_params=pltpu.CompilerParams(
            dimension_semantics=("parallel", "arbitrary"),
            vmem_limit_bytes=_VMEM_LIMIT,
        ),
    )(*inputs)


def _ffn_block(p, x, *, residual, gamma, beta):
    B, S, D = x.shape
    M = B * S
    mid = p["w1"].shape[1]
    x2d = x.reshape(M, D)
    res2d = residual.reshape(M, D)
    tm = _pick_tile(M, 256, 8)
    tc = _pick_tile(mid, 512, 128)
    out = pl.pallas_call(
        _ffn_kernel,
        out_shape=jax.ShapeDtypeStruct((M, D), x.dtype),
        grid_spec=pltpu.PrefetchScalarGridSpec(
            num_scalar_prefetch=0,
            grid=(M // tm, mid // tc),
            in_specs=[
                pl.BlockSpec((tm, D), lambda i, c: (i, 0)),   # x
                pl.BlockSpec((D, tc), lambda i, c: (0, c)),   # w1 chunk
                pl.BlockSpec((1, tc), lambda i, c: (0, c)),   # b1 chunk
                pl.BlockSpec((tc, D), lambda i, c: (c, 0)),   # w2 chunk
                pl.BlockSpec((1, D), lambda i, c: (0, 0)),    # b2
                pl.BlockSpec((tm, D), lambda i, c: (i, 0)),   # residual
                pl.BlockSpec((1, D), lambda i, c: (0, 0)),    # gamma
                pl.BlockSpec((1, D), lambda i, c: (0, 0)),    # beta
            ],
            out_specs=pl.BlockSpec((tm, D), lambda i, c: (i, 0)),
            scratch_shapes=[pltpu.VMEM((tm, D), jnp.float32)],
        ),
        compiler_params=pltpu.CompilerParams(
            dimension_semantics=("parallel", "arbitrary"),
            vmem_limit_bytes=_VMEM_LIMIT,
        ),
    )(x2d, p["w1"], p["b1"].reshape(1, mid), p["w2"], p["b2"].reshape(1, D),
      res2d, gamma, beta)
    return out.reshape(B, S, D)


def _mha_block(p, heads, query, key, value, *, residual, gamma, beta,
               mask=None, causal=False):
    B, Sq, D = query.shape
    Sk = key.shape[1]
    dk = D // heads

    q2d = query.reshape(B * Sq, D)
    if (query is key) and (key is value):
        # Self-attention: single fused [D, 3D] projection (1 launch, not 3).
        wqkv = jnp.concatenate([p["wq"], p["wk"], p["wv"]], axis=1)
        bqkv = jnp.concatenate([p["bq"], p["bk"], p["bv"]], axis=0)
        qkv = _proj(q2d, wqkv, bqkv)
        q2, k2, v2 = qkv[:, :D], qkv[:, D:2 * D], qkv[:, 2 * D:]
    else:
        q2 = _proj(q2d, p["wq"], p["bq"])
        if key is value:
            # Cross-attention: fused [D, 2D] K/V projection of `encoded`.
            wkv = jnp.concatenate([p["wk"], p["wv"]], axis=1)
            bkv = jnp.concatenate([p["bk"], p["bv"]], axis=0)
            kv = _proj(key.reshape(B * Sk, D), wkv, bkv)
            k2, v2 = kv[:, :D], kv[:, D:]
        else:
            k2 = _proj(key.reshape(B * Sk, D), p["wk"], p["bk"])
            v2 = _proj(value.reshape(B * Sk, D), p["wv"], p["bv"])

    # torch's quirky `.view(B, heads, -1, d_k)`: raw row-major reshape.
    q4 = q2.reshape(B, heads, Sq, dk)
    k4 = k2.reshape(B, heads, Sk, dk)
    v4 = v2.reshape(B, heads, Sk, dk)

    wo_r = p["wo"].reshape(heads, dk, D)    # W_out split per head for fused merge
    bo = p["bo"].reshape(1, D)

    if mask is not None:
        mask = jnp.broadcast_to(mask.astype(jnp.int32), (B, 1, Sq, Sk))

    return _attn_out_ln(q4, k4, v4, wo_r, bo, residual, gamma, beta,
                        mask=mask, causal=causal)


def decoder_layer(params, embeddings, encoded, target_mask, *, heads,
                  target_mask_is_causal=False):
    _, _, D = embeddings.shape
    gamma = params["ln_gamma"].reshape(1, D)
    beta = params["ln_beta"].reshape(1, D)

    # masked self-attention + residual + LayerNorm (fused epilogue)
    query = _mha_block(
        params["self_mha"], heads, embeddings, embeddings, embeddings,
        residual=embeddings, gamma=gamma, beta=beta,
        mask=None if target_mask_is_causal else target_mask,
        causal=target_mask_is_causal)

    # encoder-decoder cross-attention (no mask) + residual + LayerNorm
    interacted = _mha_block(
        params["src_mha"], heads, query, encoded, encoded,
        residual=query, gamma=gamma, beta=beta, mask=None, causal=False)

    # feed-forward + residual + LayerNorm (fully fused)
    return _ffn_block(params["ff"], interacted,
                      residual=interacted, gamma=gamma, beta=beta)


# ----------------------------------------------------------------------------
# Deterministic parameter initialization (mimics nn.Linear default init)
# ----------------------------------------------------------------------------
def _init_linear(key, fan_in, fan_out):
    kw, kb = jax.random.split(key)
    bound = 1.0 / math.sqrt(fan_in)
    w = jax.random.uniform(kw, (fan_in, fan_out), jnp.float32, -bound, bound)
    b = jax.random.uniform(kb, (fan_out,), jnp.float32, -bound, bound)
    return w, b


def _init_mha(key, d_model):
    ks = jax.random.split(key, 4)
    wq, bq = _init_linear(ks[0], d_model, d_model)
    wk, bk = _init_linear(ks[1], d_model, d_model)
    wv, bv = _init_linear(ks[2], d_model, d_model)
    wo, bo = _init_linear(ks[3], d_model, d_model)
    return dict(wq=wq, bq=bq, wk=wk, bk=bk, wv=wv, bv=bv, wo=wo, bo=bo)


def init_decoder_params(key, d_model, middle_dim=2048):
    k_self, k_src, k_f1, k_f2 = jax.random.split(key, 4)
    w1, b1 = _init_linear(k_f1, d_model, middle_dim)
    w2, b2 = _init_linear(k_f2, middle_dim, d_model)
    return dict(
        ln_gamma=jnp.ones((d_model,), jnp.float32),
        ln_beta=jnp.zeros((d_model,), jnp.float32),
        self_mha=_init_mha(k_self, d_model),
        src_mha=_init_mha(k_src, d_model),
        ff=dict(w1=w1, b1=b1, w2=w2, b2=b2),
    )


# ----------------------------------------------------------------------------
# Pure-JAX reference (mirrors the PyTorch module; eval-mode dropout)
# ----------------------------------------------------------------------------
def _reference_decoder_layer(params, embeddings, encoded, target_mask, heads):
    def layer_norm(x, g, b):
        mean = x.mean(-1, keepdims=True)
        var = ((x - mean) ** 2).mean(-1, keepdims=True)
        return (x - mean) / jnp.sqrt(var + _LN_EPS) * g + b

    def mha(p, q_in, k_in, v_in, mask):
        B, Sq, D = q_in.shape
        Sk = k_in.shape[1]
        dk = D // heads
        q = (q_in @ p["wq"] + p["bq"]).reshape(B, heads, Sq, dk)
        k = (k_in @ p["wk"] + p["bk"]).reshape(B, heads, Sk, dk)
        v = (v_in @ p["wv"] + p["bv"]).reshape(B, heads, Sk, dk)
        scores = jnp.einsum("bhqd,bhkd->bhqk", q, k) / math.sqrt(dk)
        if mask is not None:
            scores = jnp.where(mask == 0, jnp.finfo(scores.dtype).min, scores)
        w = jax.nn.softmax(scores, axis=-1)
        ctx = jnp.einsum("bhqk,bhkd->bhqd", w, v)
        ctx = jnp.transpose(ctx, (0, 2, 1, 3)).reshape(B, Sq, D)
        return ctx @ p["wo"] + p["bo"]

    g, b = params["ln_gamma"], params["ln_beta"]
    q = layer_norm(mha(params["self_mha"], embeddings, embeddings, embeddings,
                       target_mask) + embeddings, g, b)
    i = layer_norm(mha(params["src_mha"], q, encoded, encoded, None) + q, g, b)
    ff = params["ff"]
    hid = jnp.maximum(i @ ff["w1"] + ff["b1"], 0.0)
    out = hid @ ff["w2"] + ff["b2"]
    return layer_norm(out + i, g, b)


# ----------------------------------------------------------------------------
if __name__ == "__main__":
    B, S, D, H = 2, 8, 32, 4

    root = jax.random.PRNGKey(0)
    k_param, k_emb, k_enc = jax.random.split(root, 3)

    params = init_decoder_params(k_param, D)
    embeddings = jax.random.normal(k_emb, (B, S, D), jnp.float32)
    encoded = jax.random.normal(k_enc, (B, S, D), jnp.float32)
    # causal target mask, broadcast over heads: [B, 1, S, S]
    target_mask = jnp.broadcast_to(
        jnp.tril(jnp.ones((S, S), jnp.int32))[None, None], (B, 1, S, S))

    fwd = jax.jit(decoder_layer,
                  static_argnames=("heads", "target_mask_is_causal"))

    out = fwd(params, embeddings, encoded, target_mask, heads=H)
    out = jax.block_until_ready(out)
    assert out.shape == (B, S, D) and out.dtype == jnp.float32
    assert bool(jnp.all(jnp.isfinite(out)))

    # Fast path: causal mask generated in-kernel (no [B,1,S,S] DMA) must agree.
    out_causal = fwd(params, embeddings, encoded, target_mask, heads=H,
                     target_mask_is_causal=True)
    out_causal = jax.block_until_ready(out_causal)
    assert bool(jnp.allclose(out, out_causal, rtol=1e-5, atol=1e-5))

    # Loose check vs. a pure-JAX reference (approx reciprocal / MXU precision).
    ref = _reference_decoder_layer(params, embeddings, encoded, target_mask, H)
    assert bool(jnp.allclose(out, ref, rtol=0.1, atol=0.1))

    print("KERNEL_OK")
</pallas_src>

<mosaic_0001>
module attributes {stable_mosaic.version = 11 : i64} {
  func.func @_proj_kernel(%arg0: i32, %arg1: memref<16x32xf32, #tpu.memory_space<vmem>>, %arg2: memref<32x96xf32, #tpu.memory_space<vmem>>, %arg3: memref<1x96xf32, #tpu.memory_space<vmem>>, %arg4: memref<16x96xf32, #tpu.memory_space<vmem>>) attributes {dimension_semantics = [#tpu.dimension_semantics<parallel>], iteration_bounds = array<i64: 1>, scalar_prefetch = 0 : i64, scratch_operands = 0 : i64, tpu.core_type = #tpu.core_type<tc>, window_params = [{transform_indices = @transform_0, window_bounds = array<i64: 16, 32>}, {pipeline_mode = #tpu.pipeline_mode<synchronous>, transform_indices = @transform_1, window_bounds = array<i64: 32, 96>}, {pipeline_mode = #tpu.pipeline_mode<synchronous>, transform_indices = @transform_2, window_bounds = array<i64: 1, 96>}, {transform_indices = @transform_3, window_bounds = array<i64: 16, 96>}]} {
    %c0 = arith.constant 0 : index
    %c0_0 = arith.constant 0 : index
    %0 = vector.load %arg1[%c0, %c0_0] : memref<16x32xf32, #tpu.memory_space<vmem>>, vector<16x32xf32>
    %c0_1 = arith.constant 0 : index
    %c0_2 = arith.constant 0 : index
    %1 = vector.load %arg2[%c0_1, %c0_2] : memref<32x96xf32, #tpu.memory_space<vmem>>, vector<32x96xf32>
    %cst = arith.constant dense<0.000000e+00> : vector<16x96xf32>
    %2 = tpu.matmul %0, %1, %cst {dimension_numbers = #tpu.dot_dimension_numbers<[1], [0], [0], [1], [0, 0, 1, 1], [], []>} : vector<16x32xf32>, vector<32x96xf32>, vector<16x96xf32> -> vector<16x96xf32>
    %c0_3 = arith.constant 0 : index
    %c0_4 = arith.constant 0 : index
    %3 = vector.load %arg3[%c0_3, %c0_4] : memref<1x96xf32, #tpu.memory_space<vmem>>, vector<1x96xf32>
    %4 = vector.broadcast %3 : vector<1x96xf32> to vector<16x96xf32>
    %5 = arith.addf %2, %4 : vector<16x96xf32>
    %c0_5 = arith.constant 0 : index
    %c0_6 = arith.constant 0 : index
    %6 = vector.load %arg4[%c0_5, %c0_6] : memref<16x96xf32, #tpu.memory_space<vmem>>, vector<16x96xf32>
    tpu.vector_store %arg4[%c0_5, %c0_6], %5 {strides = array<i32>} : memref<16x96xf32, #tpu.memory_space<vmem>>, vector<16x96xf32>,
    return
  }
  func.func @transform_0(%arg0: i32) -> (i32, i32) {
    %c0_i32 = arith.constant 0 : i32
    %c0_i32_0 = arith.constant 0 : i32
    return %arg0, %c0_i32 : i32, i32
  }
  func.func @transform_1(%arg0: i32) -> (i32, i32) {
    %c0_i32 = arith.constant 0 : i32
    %c0_i32_0 = arith.constant 0 : i32
    %c0_i32_1 = arith.constant 0 : i32
    return %c0_i32, %c0_i32_0 : i32, i32
  }
  func.func @transform_2(%arg0: i32) -> (i32, i32) {
    %c0_i32 = arith.constant 0 : i32
    %c0_i32_0 = arith.constant 0 : i32
    %c0_i32_1 = arith.constant 0 : i32
    return %c0_i32, %c0_i32_0 : i32, i32
  }
  func.func @transform_3(%arg0: i32) -> (i32, i32) {
    %c0_i32 = arith.constant 0 : i32
    %c0_i32_0 = arith.constant 0 : i32
    return %arg0, %c0_i32 : i32, i32
  }
}

module attributes {stable_mosaic.version = 11 : i64} {
  func.func @_proj_kernel(%arg0: i32, %arg1: memref<16x32xf32, #tpu.memory_space<vmem>>, %arg2: memref<32x64xf32, #tpu.memory_space<vmem>>, %arg3: memref<1x64xf32, #tpu.memory_space<vmem>>, %arg4: memref<16x64xf32, #tpu.memory_space<vmem>>) attributes {dimension_semantics = [#tpu.dimension_semantics<parallel>], iteration_bounds = array<i64: 1>, scalar_prefetch = 0 : i64, scratch_operands = 0 : i64, tpu.core_type = #tpu.core_type<tc>, window_params = [{transform_indices = @transform_0, window_bounds = array<i64: 16, 32>}, {pipeline_mode = #tpu.pipeline_mode<synchronous>, transform_indices = @transform_1, window_bounds = array<i64: 32, 64>}, {pipeline_mode = #tpu.pipeline_mode<synchronous>, transform_indices = @transform_2, window_bounds = array<i64: 1, 64>}, {transform_indices = @transform_3, window_bounds = array<i64: 16, 64>}]} {
    %c0 = arith.constant 0 : index
    %c0_0 = arith.constant 0 : index
    %0 = vector.load %arg1[%c0, %c0_0] : memref<16x32xf32, #tpu.memory_space<vmem>>, vector<16x32xf32>
    %c0_1 = arith.constant 0 : index
    %c0_2 = arith.constant 0 : index
    %1 = vector.load %arg2[%c0_1, %c0_2] : memref<32x64xf32, #tpu.memory_space<vmem>>, vector<32x64xf32>
    %cst = arith.constant dense<0.000000e+00> : vector<16x64xf32>
    %2 = tpu.matmul %0, %1, %cst {dimension_numbers = #tpu.dot_dimension_numbers<[1], [0], [0], [1], [0, 0, 1, 1], [], []>} : vector<16x32xf32>, vector<32x64xf32>, vector<16x64xf32> -> vector<16x64xf32>
    %c0_3 = arith.constant 0 : index
    %c0_4 = arith.constant 0 : index
    %3 = vector.load %arg3[%c0_3, %c0_4] : memref<1x64xf32, #tpu.memory_space<vmem>>, vector<1x64xf32>
    %4 = vector.broadcast %3 : vector<1x64xf32> to vector<16x64xf32>
    %5 = arith.addf %2, %4 : vector<16x64xf32>
    %c0_5 = arith.constant 0 : index
    %c0_6 = arith.constant 0 : index
    %6 = vector.load %arg4[%c0_5, %c0_6] : memref<16x64xf32, #tpu.memory_space<vmem>>, vector<16x64xf32>
    tpu.vector_store %arg4[%c0_5, %c0_6], %5 {strides = array<i32>} : memref<16x64xf32, #tpu.memory_space<vmem>>, vector<16x64xf32>,
    return
  }
  func.func @transform_0(%arg0: i32) -> (i32, i32) {
    %c0_i32 = arith.constant 0 : i32
    %c0_i32_0 = arith.constant 0 : i32
    return %arg0, %c0_i32 : i32, i32
  }
  func.func @transform_1(%arg0: i32) -> (i32, i32) {
    %c0_i32 = arith.constant 0 : i32
    %c0_i32_0 = arith.constant 0 : i32
    %c0_i32_1 = arith.constant 0 : i32
    return %c0_i32, %c0_i32_0 : i32, i32
  }
  func.func @transform_2(%arg0: i32) -> (i32, i32) {
    %c0_i32 = arith.constant 0 : i32
    %c0_i32_0 = arith.constant 0 : i32
    %c0_i32_1 = arith.constant 0 : i32
    return %c0_i32, %c0_i32_0 : i32, i32
  }
  func.func @transform_3(%arg0: i32) -> (i32, i32) {
    %c0_i32 = arith.constant 0 : i32
    %c0_i32_0 = arith.constant 0 : i32
    return %arg0, %c0_i32 : i32, i32
  }
}

module attributes {stable_mosaic.version = 11 : i64} {
  func.func @_proj_kernel(%arg0: i32, %arg1: memref<16x32xf32, #tpu.memory_space<vmem>>, %arg2: memref<32x32xf32, #tpu.memory_space<vmem>>, %arg3: memref<1x32xf32, #tpu.memory_space<vmem>>, %arg4: memref<16x32xf32, #tpu.memory_space<vmem>>) attributes {dimension_semantics = [#tpu.dimension_semantics<parallel>], iteration_bounds = array<i64: 1>, scalar_prefetch = 0 : i64, scratch_operands = 0 : i64, tpu.core_type = #tpu.core_type<tc>, window_params = [{transform_indices = @transform_0, window_bounds = array<i64: 16, 32>}, {pipeline_mode = #tpu.pipeline_mode<synchronous>, transform_indices = @transform_1, window_bounds = array<i64: 32, 32>}, {pipeline_mode = #tpu.pipeline_mode<synchronous>, transform_indices = @transform_2, window_bounds = array<i64: 1, 32>}, {transform_indices = @transform_3, window_bounds = array<i64: 16, 32>}]} {
    %c0 = arith.constant 0 : index
    %c0_0 = arith.constant 0 : index
    %0 = vector.load %arg1[%c0, %c0_0] : memref<16x32xf32, #tpu.memory_space<vmem>>, vector<16x32xf32>
    %c0_1 = arith.constant 0 : index
    %c0_2 = arith.constant 0 : index
    %1 = vector.load %arg2[%c0_1, %c0_2] : memref<32x32xf32, #tpu.memory_space<vmem>>, vector<32x32xf32>
    %cst = arith.constant dense<0.000000e+00> : vector<16x32xf32>
    %2 = tpu.matmul %0, %1, %cst {dimension_numbers = #tpu.dot_dimension_numbers<[1], [0], [0], [1], [0, 0, 1, 1], [], []>} : vector<16x32xf32>, vector<32x32xf32>, vector<16x32xf32> -> vector<16x32xf32>
    %c0_3 = arith.constant 0 : index
    %c0_4 = arith.constant 0 : index
    %3 = vector.load %arg3[%c0_3, %c0_4] : memref<1x32xf32, #tpu.memory_space<vmem>>, vector<1x32xf32>
    %4 = vector.broadcast %3 : vector<1x32xf32> to vector<16x32xf32>
    %5 = arith.addf %2, %4 : vector<16x32xf32>
    %c0_5 = arith.constant 0 : index
    %c0_6 = arith.constant 0 : index
    %6 = vector.load %arg4[%c0_5, %c0_6] : memref<16x32xf32, #tpu.memory_space<vmem>>, vector<16x32xf32>
    tpu.vector_store %arg4[%c0_5, %c0_6], %5 {strides = array<i32>} : memref<16x32xf32, #tpu.memory_space<vmem>>, vector<16x32xf32>,
    return
  }
  func.func @transform_0(%arg0: i32) -> (i32, i32) {
    %c0_i32 = arith.constant 0 : i32
    %c0_i32_0 = arith.constant 0 : i32
    return %arg0, %c0_i32 : i32, i32
  }
  func.func @transform_1(%arg0: i32) -> (i32, i32) {
    %c0_i32 = arith.constant 0 : i32
    %c0_i32_0 = arith.constant 0 : i32
    %c0_i32_1 = arith.constant 0 : i32
    return %c0_i32, %c0_i32_0 : i32, i32
  }
  func.func @transform_2(%arg0: i32) -> (i32, i32) {
    %c0_i32 = arith.constant 0 : i32
    %c0_i32_0 = arith.constant 0 : i32
    %c0_i32_1 = arith.constant 0 : i32
    return %c0_i32, %c0_i32_0 : i32, i32
  }
  func.func @transform_3(%arg0: i32) -> (i32, i32) {
    %c0_i32 = arith.constant 0 : i32
    %c0_i32_0 = arith.constant 0 : i32
    return %arg0, %c0_i32 : i32, i32
  }
}

module attributes {stable_mosaic.version = 11 : i64} {
  func.func @kernel(%arg0: i32, %arg1: i32, %arg2: memref<1x1x8x8xf32, #tpu.memory_space<vmem>>, %arg3: memref<1x1x8x8xf32, #tpu.memory_space<vmem>>, %arg4: memref<1x1x8x8xf32, #tpu.memory_space<vmem>>, %arg5: memref<1x1x8x8xi32, #tpu.memory_space<vmem>>, %arg6: memref<1x8x32xf32, #tpu.memory_space<vmem>>, %arg7: memref<1x32xf32, #tpu.memory_space<vmem>>, %arg8: memref<1x8x32xf32, #tpu.memory_space<vmem>>, %arg9: memref<1x32xf32, #tpu.memory_space<vmem>>, %arg10: memref<1x32xf32, #tpu.memory_space<vmem>>, %arg11: memref<1x8x32xf32, #tpu.memory_space<vmem>>, %arg12: memref<8x32xf32, #tpu.memory_space<vmem>>) attributes {dimension_semantics = [#tpu.dimension_semantics<parallel>, #tpu.dimension_semantics<arbitrary>], iteration_bounds = array<i64: 2, 4>, scalar_prefetch = 0 : i64, scratch_operands = 1 : i64, tpu.core_type = #tpu.core_type<tc>, window_params = [{transform_indices = @transform_0, window_bounds = array<i64: 1, 1, 8, 8>}, {transform_indices = @transform_1, window_bounds = array<i64: 1, 1, 8, 8>}, {transform_indices = @transform_2, window_bounds = array<i64: 1, 1, 8, 8>}, {transform_indices = @transform_3, window_bounds = array<i64: 1, 1, 8, 8>}, {transform_indices = @transform_4, window_bounds = array<i64: 1, 8, 32>}, {pipeline_mode = #tpu.pipeline_mode<synchronous>, transform_indices = @transform_5, window_bounds = array<i64: 1, 32>}, {transform_indices = @transform_6, window_bounds = array<i64: 1, 8, 32>}, {pipeline_mode = #tpu.pipeline_mode<synchronous>, transform_indices = @transform_7, window_bounds = array<i64: 1, 32>}, {pipeline_mode = #tpu.pipeline_mode<synchronous>, transform_indices = @transform_8, window_bounds = array<i64: 1, 32>}, {transform_indices = @transform_9, window_bounds = array<i64: 1, 8, 32>}]} {
    %c0_i32 = arith.constant 0 : i32
    %0 = arith.cmpi eq, %arg1, %c0_i32 : i32
    %1 = arith.extui %0 : i1 to i32
    %c0_i32_0 = arith.constant 0 : i32
    %2 = arith.cmpi ne, %1, %c0_i32_0 : i32
    scf.if %2 {
      %cst_31 = arith.constant 0.000000e+00 : f32
      %38 = vector.broadcast %cst_31 : f32 to vector<8x32xf32>
      %c0_32 = arith.constant 0 : index
      %c0_33 = arith.constant 0 : index
      %39 = vector.load %arg12[%c0_32, %c0_33] : memref<8x32xf32, #tpu.memory_space<vmem>>, vector<8x32xf32>
      tpu.vector_store %arg12[%c0_32, %c0_33], %38 {strides = array<i32>} : memref<8x32xf32, #tpu.memory_space<vmem>>, vector<8x32xf32>,
    } else {
    }
    %c0 = arith.constant 0 : index
    %c0_1 = arith.constant 0 : index
    %c0_2 = arith.constant 0 : index
    %c0_3 = arith.constant 0 : index
    %3 = vector.load %arg2[%c0, %c0_1, %c0_2, %c0_3] : memref<1x1x8x8xf32, #tpu.memory_space<vmem>>, vector<1x1x8x8xf32>
    %4 = vector.shape_cast %3 : vector<1x1x8x8xf32> to vector<8x8xf32>
    %c0_4 = arith.constant 0 : index
    %c0_5 = arith.constant 0 : index
    %c0_6 = arith.constant 0 : index
    %c0_7 = arith.constant 0 : index
    %5 = vector.load %arg3[%c0_4, %c0_5, %c0_6, %c0_7] : memref<1x1x8x8xf32, #tpu.memory_space<vmem>>, vector<1x1x8x8xf32>
    %6 = vector.shape_cast %5 : vector<1x1x8x8xf32> to vector<8x8xf32>
    %c0_8 = arith.constant 0 : index
    %c0_9 = arith.constant 0 : index
    %c0_10 = arith.constant 0 : index
    %c0_11 = arith.constant 0 : index
    %7 = vector.load %arg4[%c0_8, %c0_9, %c0_10, %c0_11] : memref<1x1x8x8xf32, #tpu.memory_space<vmem>>, vector<1x1x8x8xf32>
    %8 = vector.shape_cast %7 : vector<1x1x8x8xf32> to vector<8x8xf32>
    %cst = arith.constant 0.353553385 : f32
    %9 = vector.broadcast %cst : f32 to vector<8x8xf32>
    %10 = arith.mulf %4, %9 : vector<8x8xf32>
    %cst_12 = arith.constant dense<0.000000e+00> : vector<8x8xf32>
    %11 = tpu.matmul %10, %6, %cst_12 {dimension_numbers = #tpu.dot_dimension_numbers<[1], [1], [0], [0], [0, 0, 1, 0], [], []>} : vector<8x8xf32>, vector<8x8xf32>, vector<8x8xf32> -> vector<8x8xf32>
    %c0_13 = arith.constant 0 : index
    %c0_14 = arith.constant 0 : index
    %c0_15 = arith.constant 0 : index
    %c0_16 = arith.constant 0 : index
    %12 = vector.load %arg5[%c0_13, %c0_14, %c0_15, %c0_16] : memref<1x1x8x8xi32, #tpu.memory_space<vmem>>, vector<1x1x8x8xi32>
    %13 = vector.shape_cast %12 : vector<1x1x8x8xi32> to vector<8x8xi32>
    %c0_i32_17 = arith.constant 0 : i32
    %14 = vector.broadcast %c0_i32_17 : i32 to vector<8x8xi32>
    %15 = arith.cmpi eq, %13, %14 : vector<8x8xi32>
    %cst_18 = arith.constant -3.40282347E+38 : f32
    %16 = vector.broadcast %cst_18 : f32 to vector<8x8xf32>
    %17 = arith.select %15, %16, %11 : vector<8x8xi1>, vector<8x8xf32>
    %cst_19 = arith.constant dense<0xFF800000> : vector<8xf32>
    %18 = vector.multi_reduction <maximumf>, %17, %cst_19 [1] : vector<8x8xf32> to vector<8xf32>
    %19 = vector.shape_cast %18 : vector<8xf32> to vector<8x1xf32>
    %20 = vector.broadcast %19 : vector<8x1xf32> to vector<8x8xf32>
    %21 = arith.subf %17, %20 : vector<8x8xf32>
    %22 = math.exp %21 : vector<8x8xf32>
    %cst_20 = arith.constant dense<0.000000e+00> : vector<8xf32>
    %23 = vector.multi_reduction <add>, %22, %cst_20 [1] : vector<8x8xf32> to vector<8xf32>
    %24 = vector.shape_cast %23 : vector<8xf32> to vector<8x1xf32>
    %25 = tpu.reciprocal %24 {approx = true} : vector<8x1xf32> -> vector<8x1xf32>
    %26 = vector.broadcast %25 : vector<8x1xf32> to vector<8x8xf32>
    %27 = arith.mulf %22, %26 : vector<8x8xf32>
    %cst_21 = arith.constant dense<0.000000e+00> : vector<8x8xf32>
    %28 = tpu.matmul %27, %8, %cst_21 {dimension_numbers = #tpu.dot_dimension_numbers<[1], [0], [0], [1], [0, 0, 1, 1], [], []>} : vector<8x8xf32>, vector<8x8xf32>, vector<8x8xf32> -> vector<8x8xf32>
    %c0_22 = arith.constant 0 : index
    %c0_23 = arith.constant 0 : index
    %29 = vector.load %arg12[%c0_22, %c0_23] : memref<8x32xf32, #tpu.memory_space<vmem>>, vector<8x32xf32>
    %c0_24 = arith.constant 0 : index
    %c0_25 = arith.constant 0 : index
    %c0_26 = arith.constant 0 : index
    %30 = vector.load %arg6[%c0_24, %c0_25, %c0_26] : memref<1x8x32xf32, #tpu.memory_space<vmem>>, vector<1x8x32xf32>
    %31 = vector.shape_cast %30 : vector<1x8x32xf32> to vector<8x32xf32>
    %cst_27 = arith.constant dense<0.000000e+00> : vector<8x32xf32>
    %32 = tpu.matmul %28, %31, %cst_27 {dimension_numbers = #tpu.dot_dimension_numbers<[1], [0], [0], [1], [0, 0, 1, 1], [], []>} : vector<8x8xf32>, vector<8x32xf32>, vector<8x32xf32> -> vector<8x32xf32>
    %33 = arith.addf %29, %32 : vector<8x32xf32>
    %c0_28 = arith.constant 0 : index
    %c0_29 = arith.constant 0 : index
    %34 = vector.load %arg12[%c0_28, %c0_29] : memref<8x32xf32, #tpu.memory_space<vmem>>, vector<8x32xf32>
    tpu.vector_store %arg12[%c0_28, %c0_29], %33 {strides = array<i32>} : memref<8x32xf32, #tpu.memory_space<vmem>>, vector<8x32xf32>,
    %c3_i32 = arith.constant 3 : i32
    %35 = arith.cmpi eq, %arg1, %c3_i32 : i32
    %36 = arith.extui %35 : i1 to i32
    %c0_i32_30 = arith.constant 0 : i32
    %37 = arith.cmpi ne, %36, %c0_i32_30 : i32
    scf.if %37 {
      %c0_31 = arith.constant 0 : index
      %c0_32 = arith.constant 0 : index
      %38 = vector.load %arg12[%c0_31, %c0_32] : memref<8x32xf32, #tpu.memory_space<vmem>>, vector<8x32xf32>
      %c0_33 = arith.constant 0 : index
      %c0_34 = arith.constant 0 : index
      %39 = vector.load %arg7[%c0_33, %c0_34] : memref<1x32xf32, #tpu.memory_space<vmem>>, vector<1x32xf32>
      %40 = vector.broadcast %39 : vector<1x32xf32> to vector<8x32xf32>
      %41 = arith.addf %38, %40 : vector<8x32xf32>
      %c0_35 = arith.constant 0 : index
      %c0_36 = arith.constant 0 : index
      %c0_37 = arith.constant 0 : index
      %42 = vector.load %arg8[%c0_35, %c0_36, %c0_37] : memref<1x8x32xf32, #tpu.memory_space<vmem>>, vector<1x8x32xf32>
      %43 = vector.shape_cast %42 : vector<1x8x32xf32> to vector<8x32xf32>
      %44 = arith.addf %41, %43 : vector<8x32xf32>
      %cst_38 = arith.constant dense<0.000000e+00> : vector<8xf32>
      %45 = vector.multi_reduction <add>, %44, %cst_38 [1] : vector<8x32xf32> to vector<8xf32>
      %46 = vector.shape_cast %45 : vector<8xf32> to vector<8x1xf32>
      %cst_39 = arith.constant 3.200000e+01 : f32
      %47 = vector.broadcast %cst_39 : f32 to vector<8x1xf32>
      %48 = arith.divf %46, %47 : vector<8x1xf32>
      %49 = vector.broadcast %48 : vector<8x1xf32> to vector<8x32xf32>
      %50 = arith.subf %44, %49 : vector<8x32xf32>
      %51 = arith.mulf %50, %50 : vector<8x32xf32>
      %cst_40 = arith.constant dense<0.000000e+00> : vector<8xf32>
      %52 = vector.multi_reduction <add>, %51, %cst_40 [1] : vector<8x32xf32> to vector<8xf32>
      %53 = vector.shape_cast %52 : vector<8xf32> to vector<8x1xf32>
      %cst_41 = arith.constant 3.200000e+01 : f32
      %54 = vector.broadcast %cst_41 : f32 to vector<8x1xf32>
      %55 = arith.divf %53, %54 : vector<8x1xf32>
      %56 = vector.broadcast %48 : vector<8x1xf32> to vector<8x32xf32>
      %57 = arith.subf %44, %56 : vector<8x32xf32>
      %cst_42 = arith.constant 9.99999974E-6 : f32
      %58 = vector.broadcast %cst_42 : f32 to vector<8x1xf32>
      %59 = arith.addf %55, %58 : vector<8x1xf32>
      %60 = math.rsqrt %59 : vector<8x1xf32>
      %61 = vector.broadcast %60 : vector<8x1xf32> to vector<8x32xf32>
      %62 = arith.mulf %57, %61 : vector<8x32xf32>
      %c0_43 = arith.constant 0 : index
      %c0_44 = arith.constant 0 : index
      %63 = vector.load %arg9[%c0_43, %c0_44] : memref<1x32xf32, #tpu.memory_space<vmem>>, vector<1x32xf32>
      %64 = vector.broadcast %63 : vector<1x32xf32> to vector<8x32xf32>
      %65 = arith.mulf %62, %64 : vector<8x32xf32>
      %c0_45 = arith.constant 0 : index
      %c0_46 = arith.constant 0 : index
      %66 = vector.load %arg10[%c0_45, %c0_46] : memref<1x32xf32, #tpu.memory_space<vmem>>, vector<1x32xf32>
      %67 = vector.broadcast %66 : vector<1x32xf32> to vector<8x32xf32>
      %68 = arith.addf %65, %67 : vector<8x32xf32>
      %c0_47 = arith.constant 0 : index
      %c0_48 = arith.constant 0 : index
      %c0_49 = arith.constant 0 : index
      %69 = vector.load %arg11[%c0_47, %c0_48, %c0_49] : memref<1x8x32xf32, #tpu.memory_space<vmem>>, vector<1x8x32xf32>
      %70 = vector.shape_cast %69 : vector<1x8x32xf32> to vector<8x32xf32>
      %71 = vector.shape_cast %68 : vector<8x32xf32> to vector<1x8x32xf32>
      tpu.vector_store %arg11[%c0_47, %c0_48, %c0_49], %71 {strides = array<i32>} : memref<1x8x32xf32, #tpu.memory_space<vmem>>, vector<1x8x32xf32>,
    } else {
    }
    return
  }
  func.func @transform_0(%arg0: i32, %arg1: i32) -> (i32, i32, i32, i32) {
    %c0_i32 = arith.constant 0 : i32
    %c0_i32_0 = arith.constant 0 : i32
    %c0_i32_1 = arith.constant 0 : i32
    return %arg0, %arg1, %c0_i32, %c0_i32_0 : i32, i32, i32, i32
  }
  func.func @transform_1(%arg0: i32, %arg1: i32) -> (i32, i32, i32, i32) {
    %c0_i32 = arith.constant 0 : i32
    %c0_i32_0 = arith.constant 0 : i32
    %c0_i32_1 = arith.constant 0 : i32
    return %arg0, %arg1, %c0_i32, %c0_i32_0 : i32, i32, i32, i32
  }
  func.func @transform_2(%arg0: i32, %arg1: i32) -> (i32, i32, i32, i32) {
    %c0_i32 = arith.constant 0 : i32
    %c0_i32_0 = arith.constant 0 : i32
    %c0_i32_1 = arith.constant 0 : i32
    return %arg0, %arg1, %c0_i32, %c0_i32_0 : i32, i32, i32, i32
  }
  func.func @transform_3(%arg0: i32, %arg1: i32) -> (i32, i32, i32, i32) {
    %c0_i32 = arith.constant 0 : i32
    %c0_i32_0 = arith.constant 0 : i32
    %c0_i32_1 = arith.constant 0 : i32
    %c0_i32_2 = arith.constant 0 : i32
    return %arg0, %c0_i32, %c0_i32_0, %c0_i32_1 : i32, i32, i32, i32
  }
  func.func @transform_4(%arg0: i32, %arg1: i32) -> (i32, i32, i32) {
    %c0_i32 = arith.constant 0 : i32
    %c0_i32_0 = arith.constant 0 : i32
    %c0_i32_1 = arith.constant 0 : i32
    return %arg1, %c0_i32, %c0_i32_0 : i32, i32, i32
  }
  func.func @transform_5(%arg0: i32, %arg1: i32) -> (i32, i32) {
    %c0_i32 = arith.constant 0 : i32
    %c0_i32_0 = arith.constant 0 : i32
    %c0_i32_1 = arith.constant 0 : i32
    return %c0_i32, %c0_i32_0 : i32, i32
  }
  func.func @transform_6(%arg0: i32, %arg1: i32) -> (i32, i32, i32) {
    %c0_i32 = arith.constant 0 : i32
    %c0_i32_0 = arith.constant 0 : i32
    %c0_i32_1 = arith.constant 0 : i32
    return %arg0, %c0_i32, %c0_i32_0 : i32, i32, i32
  }
  func.func @transform_7(%arg0: i32, %arg1: i32) -> (i32, i32) {
    %c0_i32 = arith.constant 0 : i32
    %c0_i32_0 = arith.constant 0 : i32
    %c0_i32_1 = arith.constant 0 : i32
    return %c0_i32, %c0_i32_0 : i32, i32
  }
  func.func @transform_8(%arg0: i32, %arg1: i32) -> (i32, i32) {
    %c0_i32 = arith.constant 0 : i32
    %c0_i32_0 = arith.constant 0 : i32
    %c0_i32_1 = arith.constant 0 : i32
    return %c0_i32, %c0_i32_0 : i32, i32
  }
  func.func @transform_9(%arg0: i32, %arg1: i32) -> (i32, i32, i32) {
    %c0_i32 = arith.constant 0 : i32
    %c0_i32_0 = arith.constant 0 : i32
    %c0_i32_1 = arith.constant 0 : i32
    return %arg0, %c0_i32, %c0_i32_0 : i32, i32, i32
  }
}

module attributes {stable_mosaic.version = 11 : i64} {
  func.func @kernel(%arg0: i32, %arg1: i32, %arg2: memref<1x1x8x8xf32, #tpu.memory_space<vmem>>, %arg3: memref<1x1x8x8xf32, #tpu.memory_space<vmem>>, %arg4: memref<1x1x8x8xf32, #tpu.memory_space<vmem>>, %arg5: memref<1x8x32xf32, #tpu.memory_space<vmem>>, %arg6: memref<1x32xf32, #tpu.memory_space<vmem>>, %arg7: memref<1x8x32xf32, #tpu.memory_space<vmem>>, %arg8: memref<1x32xf32, #tpu.memory_space<vmem>>, %arg9: memref<1x32xf32, #tpu.memory_space<vmem>>, %arg10: memref<1x8x32xf32, #tpu.memory_space<vmem>>, %arg11: memref<8x32xf32, #tpu.memory_space<vmem>>) attributes {dimension_semantics = [#tpu.dimension_semantics<parallel>, #tpu.dimension_semantics<arbitrary>], iteration_bounds = array<i64: 2, 4>, scalar_prefetch = 0 : i64, scratch_operands = 1 : i64, tpu.core_type = #tpu.core_type<tc>, window_params = [{transform_indices = @transform_0, window_bounds = array<i64: 1, 1, 8, 8>}, {transform_indices = @transform_1, window_bounds = array<i64: 1, 1, 8, 8>}, {transform_indices = @transform_2, window_bounds = array<i64: 1, 1, 8, 8>}, {transform_indices = @transform_3, window_bounds = array<i64: 1, 8, 32>}, {pipeline_mode = #tpu.pipeline_mode<synchronous>, transform_indices = @transform_4, window_bounds = array<i64: 1, 32>}, {transform_indices = @transform_5, window_bounds = array<i64: 1, 8, 32>}, {pipeline_mode = #tpu.pipeline_mode<synchronous>, transform_indices = @transform_6, window_bounds = array<i64: 1, 32>}, {pipeline_mode = #tpu.pipeline_mode<synchronous>, transform_indices = @transform_7, window_bounds = array<i64: 1, 32>}, {transform_indices = @transform_8, window_bounds = array<i64: 1, 8, 32>}]} {
    %c0_i32 = arith.constant 0 : i32
    %0 = arith.cmpi eq, %arg1, %c0_i32 : i32
    %1 = arith.extui %0 : i1 to i32
    %c0_i32_0 = arith.constant 0 : i32
    %2 = arith.cmpi ne, %1, %c0_i32_0 : i32
    scf.if %2 {
      %cst_25 = arith.constant 0.000000e+00 : f32
      %32 = vector.broadcast %cst_25 : f32 to vector<8x32xf32>
      %c0_26 = arith.constant 0 : index
      %c0_27 = arith.constant 0 : index
      %33 = vector.load %arg11[%c0_26, %c0_27] : memref<8x32xf32, #tpu.memory_space<vmem>>, vector<8x32xf32>
      tpu.vector_store %arg11[%c0_26, %c0_27], %32 {strides = array<i32>} : memref<8x32xf32, #tpu.memory_space<vmem>>, vector<8x32xf32>,
    } else {
    }
    %c0 = arith.constant 0 : index
    %c0_1 = arith.constant 0 : index
    %c0_2 = arith.constant 0 : index
    %c0_3 = arith.constant 0 : index
    %3 = vector.load %arg2[%c0, %c0_1, %c0_2, %c0_3] : memref<1x1x8x8xf32, #tpu.memory_space<vmem>>, vector<1x1x8x8xf32>
    %4 = vector.shape_cast %3 : vector<1x1x8x8xf32> to vector<8x8xf32>
    %c0_4 = arith.constant 0 : index
    %c0_5 = arith.constant 0 : index
    %c0_6 = arith.constant 0 : index
    %c0_7 = arith.constant 0 : index
    %5 = vector.load %arg3[%c0_4, %c0_5, %c0_6, %c0_7] : memref<1x1x8x8xf32, #tpu.memory_space<vmem>>, vector<1x1x8x8xf32>
    %6 = vector.shape_cast %5 : vector<1x1x8x8xf32> to vector<8x8xf32>
    %c0_8 = arith.constant 0 : index
    %c0_9 = arith.constant 0 : index
    %c0_10 = arith.constant 0 : index
    %c0_11 = arith.constant 0 : index
    %7 = vector.load %arg4[%c0_8, %c0_9, %c0_10, %c0_11] : memref<1x1x8x8xf32, #tpu.memory_space<vmem>>, vector<1x1x8x8xf32>
    %8 = vector.shape_cast %7 : vector<1x1x8x8xf32> to vector<8x8xf32>
    %cst = arith.constant 0.353553385 : f32
    %9 = vector.broadcast %cst : f32 to vector<8x8xf32>
    %10 = arith.mulf %4, %9 : vector<8x8xf32>
    %cst_12 = arith.constant dense<0.000000e+00> : vector<8x8xf32>
    %11 = tpu.matmul %10, %6, %cst_12 {dimension_numbers = #tpu.dot_dimension_numbers<[1], [1], [0], [0], [0, 0, 1, 0], [], []>} : vector<8x8xf32>, vector<8x8xf32>, vector<8x8xf32> -> vector<8x8xf32>
    %cst_13 = arith.constant dense<0xFF800000> : vector<8xf32>
    %12 = vector.multi_reduction <maximumf>, %11, %cst_13 [1] : vector<8x8xf32> to vector<8xf32>
    %13 = vector.shape_cast %12 : vector<8xf32> to vector<8x1xf32>
    %14 = vector.broadcast %13 : vector<8x1xf32> to vector<8x8xf32>
    %15 = arith.subf %11, %14 : vector<8x8xf32>
    %16 = math.exp %15 : vector<8x8xf32>
    %cst_14 = arith.constant dense<0.000000e+00> : vector<8xf32>
    %17 = vector.multi_reduction <add>, %16, %cst_14 [1] : vector<8x8xf32> to vector<8xf32>
    %18 = vector.shape_cast %17 : vector<8xf32> to vector<8x1xf32>
    %19 = tpu.reciprocal %18 {approx = true} : vector<8x1xf32> -> vector<8x1xf32>
    %20 = vector.broadcast %19 : vector<8x1xf32> to vector<8x8xf32>
    %21 = arith.mulf %16, %20 : vector<8x8xf32>
    %cst_15 = arith.constant dense<0.000000e+00> : vector<8x8xf32>
    %22 = tpu.matmul %21, %8, %cst_15 {dimension_numbers = #tpu.dot_dimension_numbers<[1], [0], [0], [1], [0, 0, 1, 1], [], []>} : vector<8x8xf32>, vector<8x8xf32>, vector<8x8xf32> -> vector<8x8xf32>
    %c0_16 = arith.constant 0 : index
    %c0_17 = arith.constant 0 : index
    %23 = vector.load %arg11[%c0_16, %c0_17] : memref<8x32xf32, #tpu.memory_space<vmem>>, vector<8x32xf32>
    %c0_18 = arith.constant 0 : index
    %c0_19 = arith.constant 0 : index
    %c0_20 = arith.constant 0 : index
    %24 = vector.load %arg5[%c0_18, %c0_19, %c0_20] : memref<1x8x32xf32, #tpu.memory_space<vmem>>, vector<1x8x32xf32>
    %25 = vector.shape_cast %24 : vector<1x8x32xf32> to vector<8x32xf32>
    %cst_21 = arith.constant dense<0.000000e+00> : vector<8x32xf32>
    %26 = tpu.matmul %22, %25, %cst_21 {dimension_numbers = #tpu.dot_dimension_numbers<[1], [0], [0], [1], [0, 0, 1, 1], [], []>} : vector<8x8xf32>, vector<8x32xf32>, vector<8x32xf32> -> vector<8x32xf32>
    %27 = arith.addf %23, %26 : vector<8x32xf32>
    %c0_22 = arith.constant 0 : index
    %c0_23 = arith.constant 0 : index
    %28 = vector.load %arg11[%c0_22, %c0_23] : memref<8x32xf32, #tpu.memory_space<vmem>>, vector<8x32xf32>
    tpu.vector_store %arg11[%c0_22, %c0_23], %27 {strides = array<i32>} : memref<8x32xf32, #tpu.memory_space<vmem>>, vector<8x32xf32>,
    %c3_i32 = arith.constant 3 : i32
    %29 = arith.cmpi eq, %arg1, %c3_i32 : i32
    %30 = arith.extui %29 : i1 to i32
    %c0_i32_24 = arith.constant 0 : i32
    %31 = arith.cmpi ne, %30, %c0_i32_24 : i32
    scf.if %31 {
      %c0_25 = arith.constant 0 : index
      %c0_26 = arith.constant 0 : index
      %32 = vector.load %arg11[%c0_25, %c0_26] : memref<8x32xf32, #tpu.memory_space<vmem>>, vector<8x32xf32>
      %c0_27 = arith.constant 0 : index
      %c0_28 = arith.constant 0 : index
      %33 = vector.load %arg6[%c0_27, %c0_28] : memref<1x32xf32, #tpu.memory_space<vmem>>, vector<1x32xf32>
      %34 = vector.broadcast %33 : vector<1x32xf32> to vector<8x32xf32>
      %35 = arith.addf %32, %34 : vector<8x32xf32>
      %c0_29 = arith.constant 0 : index
      %c0_30 = arith.constant 0 : index
      %c0_31 = arith.constant 0 : index
      %36 = vector.load %arg7[%c0_29, %c0_30, %c0_31] : memref<1x8x32xf32, #tpu.memory_space<vmem>>, vector<1x8x32xf32>
      %37 = vector.shape_cast %36 : vector<1x8x32xf32> to vector<8x32xf32>
      %38 = arith.addf %35, %37 : vector<8x32xf32>
      %cst_32 = arith.constant dense<0.000000e+00> : vector<8xf32>
      %39 = vector.multi_reduction <add>, %38, %cst_32 [1] : vector<8x32xf32> to vector<8xf32>
      %40 = vector.shape_cast %39 : vector<8xf32> to vector<8x1xf32>
      %cst_33 = arith.constant 3.200000e+01 : f32
      %41 = vector.broadcast %cst_33 : f32 to vector<8x1xf32>
      %42 = arith.divf %40, %41 : vector<8x1xf32>
      %43 = vector.broadcast %42 : vector<8x1xf32> to vector<8x32xf32>
      %44 = arith.subf %38, %43 : vector<8x32xf32>
      %45 = arith.mulf %44, %44 : vector<8x32xf32>
      %cst_34 = arith.constant dense<0.000000e+00> : vector<8xf32>
      %46 = vector.multi_reduction <add>, %45, %cst_34 [1] : vector<8x32xf32> to vector<8xf32>
      %47 = vector.shape_cast %46 : vector<8xf32> to vector<8x1xf32>
      %cst_35 = arith.constant 3.200000e+01 : f32
      %48 = vector.broadcast %cst_35 : f32 to vector<8x1xf32>
      %49 = arith.divf %47, %48 : vector<8x1xf32>
      %50 = vector.broadcast %42 : vector<8x1xf32> to vector<8x32xf32>
      %51 = arith.subf %38, %50 : vector<8x32xf32>
      %cst_36 = arith.constant 9.99999974E-6 : f32
      %52 = vector.broadcast %cst_36 : f32 to vector<8x1xf32>
      %53 = arith.addf %49, %52 : vector<8x1xf32>
      %54 = math.rsqrt %53 : vector<8x1xf32>
      %55 = vector.broadcast %54 : vector<8x1xf32> to vector<8x32xf32>
      %56 = arith.mulf %51, %55 : vector<8x32xf32>
      %c0_37 = arith.constant 0 : index
      %c0_38 = arith.constant 0 : index
      %57 = vector.load %arg8[%c0_37, %c0_38] : memref<1x32xf32, #tpu.memory_space<vmem>>, vector<1x32xf32>
      %58 = vector.broadcast %57 : vector<1x32xf32> to vector<8x32xf32>
      %59 = arith.mulf %56, %58 : vector<8x32xf32>
      %c0_39 = arith.constant 0 : index
      %c0_40 = arith.constant 0 : index
      %60 = vector.load %arg9[%c0_39, %c0_40] : memref<1x32xf32, #tpu.memory_space<vmem>>, vector<1x32xf32>
      %61 = vector.broadcast %60 : vector<1x32xf32> to vector<8x32xf32>
      %62 = arith.addf %59, %61 : vector<8x32xf32>
      %c0_41 = arith.constant 0 : index
      %c0_42 = arith.constant 0 : index
      %c0_43 = arith.constant 0 : index
      %63 = vector.load %arg10[%c0_41, %c0_42, %c0_43] : memref<1x8x32xf32, #tpu.memory_space<vmem>>, vector<1x8x32xf32>
      %64 = vector.shape_cast %63 : vector<1x8x32xf32> to vector<8x32xf32>
      %65 = vector.shape_cast %62 : vector<8x32xf32> to vector<1x8x32xf32>
      tpu.vector_store %arg10[%c0_41, %c0_42, %c0_43], %65 {strides = array<i32>} : memref<1x8x32xf32, #tpu.memory_space<vmem>>, vector<1x8x32xf32>,
    } else {
    }
    return
  }
  func.func @transform_0(%arg0: i32, %arg1: i32) -> (i32, i32, i32, i32) {
    %c0_i32 = arith.constant 0 : i32
    %c0_i32_0 = arith.constant 0 : i32
    %c0_i32_1 = arith.constant 0 : i32
    return %arg0, %arg1, %c0_i32, %c0_i32_0 : i32, i32, i32, i32
  }
  func.func @transform_1(%arg0: i32, %arg1: i32) -> (i32, i32, i32, i32) {
    %c0_i32 = arith.constant 0 : i32
    %c0_i32_0 = arith.constant 0 : i32
    %c0_i32_1 = arith.constant 0 : i32
    return %arg0, %arg1, %c0_i32, %c0_i32_0 : i32, i32, i32, i32
  }
  func.func @transform_2(%arg0: i32, %arg1: i32) -> (i32, i32, i32, i32) {
    %c0_i32 = arith.constant 0 : i32
    %c0_i32_0 = arith.constant 0 : i32
    %c0_i32_1 = arith.constant 0 : i32
    return %arg0, %arg1, %c0_i32, %c0_i32_0 : i32, i32, i32, i32
  }
  func.func @transform_3(%arg0: i32, %arg1: i32) -> (i32, i32, i32) {
    %c0_i32 = arith.constant 0 : i32
    %c0_i32_0 = arith.constant 0 : i32
    %c0_i32_1 = arith.constant 0 : i32
    return %arg1, %c0_i32, %c0_i32_0 : i32, i32, i32
  }
  func.func @transform_4(%arg0: i32, %arg1: i32) -> (i32, i32) {
    %c0_i32 = arith.constant 0 : i32
    %c0_i32_0 = arith.constant 0 : i32
    %c0_i32_1 = arith.constant 0 : i32
    return %c0_i32, %c0_i32_0 : i32, i32
  }
  func.func @transform_5(%arg0: i32, %arg1: i32) -> (i32, i32, i32) {
    %c0_i32 = arith.constant 0 : i32
    %c0_i32_0 = arith.constant 0 : i32
    %c0_i32_1 = arith.constant 0 : i32
    return %arg0, %c0_i32, %c0_i32_0 : i32, i32, i32
  }
  func.func @transform_6(%arg0: i32, %arg1: i32) -> (i32, i32) {
    %c0_i32 = arith.constant 0 : i32
    %c0_i32_0 = arith.constant 0 : i32
    %c0_i32_1 = arith.constant 0 : i32
    return %c0_i32, %c0_i32_0 : i32, i32
  }
  func.func @transform_7(%arg0: i32, %arg1: i32) -> (i32, i32) {
    %c0_i32 = arith.constant 0 : i32
    %c0_i32_0 = arith.constant 0 : i32
    %c0_i32_1 = arith.constant 0 : i32
    return %c0_i32, %c0_i32_0 : i32, i32
  }
  func.func @transform_8(%arg0: i32, %arg1: i32) -> (i32, i32, i32) {
    %c0_i32 = arith.constant 0 : i32
    %c0_i32_0 = arith.constant 0 : i32
    %c0_i32_1 = arith.constant 0 : i32
    return %arg0, %c0_i32, %c0_i32_0 : i32, i32, i32
  }
}

module attributes {stable_mosaic.version = 11 : i64} {
  func.func @_ffn_kernel(%arg0: i32, %arg1: i32, %arg2: memref<16x32xf32, #tpu.memory_space<vmem>>, %arg3: memref<32x512xf32, #tpu.memory_space<vmem>>, %arg4: memref<1x512xf32, #tpu.memory_space<vmem>>, %arg5: memref<512x32xf32, #tpu.memory_space<vmem>>, %arg6: memref<1x32xf32, #tpu.memory_space<vmem>>, %arg7: memref<16x32xf32, #tpu.memory_space<vmem>>, %arg8: memref<1x32xf32, #tpu.memory_space<vmem>>, %arg9: memref<1x32xf32, #tpu.memory_space<vmem>>, %arg10: memref<16x32xf32, #tpu.memory_space<vmem>>, %arg11: memref<16x32xf32, #tpu.memory_space<vmem>>) attributes {dimension_semantics = [#tpu.dimension_semantics<parallel>, #tpu.dimension_semantics<arbitrary>], iteration_bounds = array<i64: 1, 4>, scalar_prefetch = 0 : i64, scratch_operands = 1 : i64, tpu.core_type = #tpu.core_type<tc>, window_params = [{transform_indices = @transform_0, window_bounds = array<i64: 16, 32>}, {transform_indices = @transform_1, window_bounds = array<i64: 32, 512>}, {transform_indices = @transform_2, window_bounds = array<i64: 1, 512>}, {transform_indices = @transform_3, window_bounds = array<i64: 512, 32>}, {pipeline_mode = #tpu.pipeline_mode<synchronous>, transform_indices = @transform_4, window_bounds = array<i64: 1, 32>}, {transform_indices = @transform_5, window_bounds = array<i64: 16, 32>}, {pipeline_mode = #tpu.pipeline_mode<synchronous>, transform_indices = @transform_6, window_bounds = array<i64: 1, 32>}, {pipeline_mode = #tpu.pipeline_mode<synchronous>, transform_indices = @transform_7, window_bounds = array<i64: 1, 32>}, {transform_indices = @transform_8, window_bounds = array<i64: 16, 32>}]} {
    %c0_i32 = arith.constant 0 : i32
    %0 = arith.cmpi eq, %arg1, %c0_i32 : i32
    %1 = arith.extui %0 : i1 to i32
    %c0_i32_0 = arith.constant 0 : i32
    %2 = arith.cmpi ne, %1, %c0_i32_0 : i32
    scf.if %2 {
      %cst_15 = arith.constant 0.000000e+00 : f32
      %19 = vector.broadcast %cst_15 : f32 to vector<16x32xf32>
      %c0_16 = arith.constant 0 : index
      %c0_17 = arith.constant 0 : index
      %20 = vector.load %arg11[%c0_16, %c0_17] : memref<16x32xf32, #tpu.memory_space<vmem>>, vector<16x32xf32>
      tpu.vector_store %arg11[%c0_16, %c0_17], %19 {strides = array<i32>} : memref<16x32xf32, #tpu.memory_space<vmem>>, vector<16x32xf32>,
    } else {
    }
    %c0 = arith.constant 0 : index
    %c0_1 = arith.constant 0 : index
    %3 = vector.load %arg2[%c0, %c0_1] : memref<16x32xf32, #tpu.memory_space<vmem>>, vector<16x32xf32>
    %c0_2 = arith.constant 0 : index
    %c0_3 = arith.constant 0 : index
    %4 = vector.load %arg3[%c0_2, %c0_3] : memref<32x512xf32, #tpu.memory_space<vmem>>, vector<32x512xf32>
    %cst = arith.constant dense<0.000000e+00> : vector<16x512xf32>
    %5 = tpu.matmul %3, %4, %cst {dimension_numbers = #tpu.dot_dimension_numbers<[1], [0], [0], [1], [0, 0, 1, 1], [], []>} : vector<16x32xf32>, vector<32x512xf32>, vector<16x512xf32> -> vector<16x512xf32>
    %c0_4 = arith.constant 0 : index
    %c0_5 = arith.constant 0 : index
    %6 = vector.load %arg4[%c0_4, %c0_5] : memref<1x512xf32, #tpu.memory_space<vmem>>, vector<1x512xf32>
    %7 = vector.broadcast %6 : vector<1x512xf32> to vector<16x512xf32>
    %8 = arith.addf %5, %7 : vector<16x512xf32>
    %cst_6 = arith.constant 0.000000e+00 : f32
    %9 = vector.broadcast %cst_6 : f32 to vector<16x512xf32>
    %10 = arith.maximumf %8, %9 : vector<16x512xf32>
    %c0_7 = arith.constant 0 : index
    %c0_8 = arith.constant 0 : index
    %11 = vector.load %arg11[%c0_7, %c0_8] : memref<16x32xf32, #tpu.memory_space<vmem>>, vector<16x32xf32>
    %c0_9 = arith.constant 0 : index
    %c0_10 = arith.constant 0 : index
    %12 = vector.load %arg5[%c0_9, %c0_10] : memref<512x32xf32, #tpu.memory_space<vmem>>, vector<512x32xf32>
    %cst_11 = arith.constant dense<0.000000e+00> : vector<16x32xf32>
    %13 = tpu.matmul %10, %12, %cst_11 {dimension_numbers = #tpu.dot_dimension_numbers<[1], [0], [0], [1], [0, 0, 1, 1], [], []>} : vector<16x512xf32>, vector<512x32xf32>, vector<16x32xf32> -> vector<16x32xf32>
    %14 = arith.addf %11, %13 : vector<16x32xf32>
    %c0_12 = arith.constant 0 : index
    %c0_13 = arith.constant 0 : index
    %15 = vector.load %arg11[%c0_12, %c0_13] : memref<16x32xf32, #tpu.memory_space<vmem>>, vector<16x32xf32>
    tpu.vector_store %arg11[%c0_12, %c0_13], %14 {strides = array<i32>} : memref<16x32xf32, #tpu.memory_space<vmem>>, vector<16x32xf32>,
    %c3_i32 = arith.constant 3 : i32
    %16 = arith.cmpi eq, %arg1, %c3_i32 : i32
    %17 = arith.extui %16 : i1 to i32
    %c0_i32_14 = arith.constant 0 : i32
    %18 = arith.cmpi ne, %17, %c0_i32_14 : i32
    scf.if %18 {
      %c0_15 = arith.constant 0 : index
      %c0_16 = arith.constant 0 : index
      %19 = vector.load %arg11[%c0_15, %c0_16] : memref<16x32xf32, #tpu.memory_space<vmem>>, vector<16x32xf32>
      %c0_17 = arith.constant 0 : index
      %c0_18 = arith.constant 0 : index
      %20 = vector.load %arg6[%c0_17, %c0_18] : memref<1x32xf32, #tpu.memory_space<vmem>>, vector<1x32xf32>
      %21 = vector.broadcast %20 : vector<1x32xf32> to vector<16x32xf32>
      %22 = arith.addf %19, %21 : vector<16x32xf32>
      %c0_19 = arith.constant 0 : index
      %c0_20 = arith.constant 0 : index
      %23 = vector.load %arg7[%c0_19, %c0_20] : memref<16x32xf32, #tpu.memory_space<vmem>>, vector<16x32xf32>
      %24 = arith.addf %22, %23 : vector<16x32xf32>
      %cst_21 = arith.constant dense<0.000000e+00> : vector<16xf32>
      %25 = vector.multi_reduction <add>, %24, %cst_21 [1] : vector<16x32xf32> to vector<16xf32>
      %26 = vector.shape_cast %25 : vector<16xf32> to vector<16x1xf32>
      %cst_22 = arith.constant 3.200000e+01 : f32
      %27 = vector.broadcast %cst_22 : f32 to vector<16x1xf32>
      %28 = arith.divf %26, %27 : vector<16x1xf32>
      %29 = vector.broadcast %28 : vector<16x1xf32> to vector<16x32xf32>
      %30 = arith.subf %24, %29 : vector<16x32xf32>
      %31 = arith.mulf %30, %30 : vector<16x32xf32>
      %cst_23 = arith.constant dense<0.000000e+00> : vector<16xf32>
      %32 = vector.multi_reduction <add>, %31, %cst_23 [1] : vector<16x32xf32> to vector<16xf32>
      %33 = vector.shape_cast %32 : vector<16xf32> to vector<16x1xf32>
      %cst_24 = arith.constant 3.200000e+01 : f32
      %34 = vector.broadcast %cst_24 : f32 to vector<16x1xf32>
      %35 = arith.divf %33, %34 : vector<16x1xf32>
      %36 = vector.broadcast %28 : vector<16x1xf32> to vector<16x32xf32>
      %37 = arith.subf %24, %36 : vector<16x32xf32>
      %cst_25 = arith.constant 9.99999974E-6 : f32
      %38 = vector.broadcast %cst_25 : f32 to vector<16x1xf32>
      %39 = arith.addf %35, %38 : vector<16x1xf32>
      %40 = math.rsqrt %39 : vector<16x1xf32>
      %41 = vector.broadcast %40 : vector<16x1xf32> to vector<16x32xf32>
      %42 = arith.mulf %37, %41 : vector<16x32xf32>
      %c0_26 = arith.constant 0 : index
      %c0_27 = arith.constant 0 : index
      %43 = vector.load %arg8[%c0_26, %c0_27] : memref<1x32xf32, #tpu.memory_space<vmem>>, vector<1x32xf32>
      %44 = vector.broadcast %43 : vector<1x32xf32> to vector<16x32xf32>
      %45 = arith.mulf %42, %44 : vector<16x32xf32>
      %c0_28 = arith.constant 0 : index
      %c0_29 = arith.constant 0 : index
      %46 = vector.load %arg9[%c0_28, %c0_29] : memref<1x32xf32, #tpu.memory_space<vmem>>, vector<1x32xf32>
      %47 = vector.broadcast %46 : vector<1x32xf32> to vector<16x32xf32>
      %48 = arith.addf %45, %47 : vector<16x32xf32>
      %c0_30 = arith.constant 0 : index
      %c0_31 = arith.constant 0 : index
      %49 = vector.load %arg10[%c0_30, %c0_31] : memref<16x32xf32, #tpu.memory_space<vmem>>, vector<16x32xf32>
      tpu.vector_store %arg10[%c0_30, %c0_31], %48 {strides = array<i32>} : memref<16x32xf32, #tpu.memory_space<vmem>>, vector<16x32xf32>,
    } else {
    }
    return
  }
  func.func @transform_0(%arg0: i32, %arg1: i32) -> (i32, i32) {
    %c0_i32 = arith.constant 0 : i32
    %c0_i32_0 = arith.constant 0 : i32
    return %arg0, %c0_i32 : i32, i32
  }
  func.func @transform_1(%arg0: i32, %arg1: i32) -> (i32, i32) {
    %c0_i32 = arith.constant 0 : i32
    %c0_i32_0 = arith.constant 0 : i32
    return %c0_i32, %arg1 : i32, i32
  }
  func.func @transform_2(%arg0: i32, %arg1: i32) -> (i32, i32) {
    %c0_i32 = arith.constant 0 : i32
    %c0_i32_0 = arith.constant 0 : i32
    return %c0_i32, %arg1 : i32, i32
  }
  func.func @transform_3(%arg0: i32, %arg1: i32) -> (i32, i32) {
    %c0_i32 = arith.constant 0 : i32
    %c0_i32_0 = arith.constant 0 : i32
    return %arg1, %c0_i32 : i32, i32
  }
  func.func @transform_4(%arg0: i32, %arg1: i32) -> (i32, i32) {
    %c0_i32 = arith.constant 0 : i32
    %c0_i32_0 = arith.constant 0 : i32
    %c0_i32_1 = arith.constant 0 : i32
    return %c0_i32, %c0_i32_0 : i32, i32
  }
  func.func @transform_5(%arg0: i32, %arg1: i32) -> (i32, i32) {
    %c0_i32 = arith.constant 0 : i32
    %c0_i32_0 = arith.constant 0 : i32
    return %arg0, %c0_i32 : i32, i32
  }
  func.func @transform_6(%arg0: i32, %arg1: i32) -> (i32, i32) {
    %c0_i32 = arith.constant 0 : i32
    %c0_i32_0 = arith.constant 0 : i32
    %c0_i32_1 = arith.constant 0 : i32
    return %c0_i32, %c0_i32_0 : i32, i32
  }
  func.func @transform_7(%arg0: i32, %arg1: i32) -> (i32, i32) {
    %c0_i32 = arith.constant 0 : i32
    %c0_i32_0 = arith.constant 0 : i32
    %c0_i32_1 = arith.constant 0 : i32
    return %c0_i32, %c0_i32_0 : i32, i32
  }
  func.func @transform_8(%arg0: i32, %arg1: i32) -> (i32, i32) {
    %c0_i32 = arith.constant 0 : i32
    %c0_i32_0 = arith.constant 0 : i32
    return %arg0, %c0_i32 : i32, i32
  }
}

</mosaic_0001>

<bundles_post_ra>
// kernel: decoder_layer.6
= control target key start
LH: loop header
LB: loop body
LE: loop exit
PB: predicated region body
PF: predicated region fallthrough
CT: control target
= control target key end

     0   :  { %8 = vsyncpa [#allocation3], 0  ;;  %s388_s0 = inlined_call_operand.hbm [shape: f32[16,32], index: 0, kind: input, shape index: {}]   ;;  %s389_s1 = inlined_call_operand.hbm [shape: f32[32,96], index: 1, kind: input, shape index: {}]   ;;  %s390_s2 = inlined_call_operand.hbm [shape: f32[1,96], index: 2, kind: input, shape index: {}]   ;;  %s391_s3 = inlined_call_operand.hbm [shape: f32[16,96], index: 3, kind: output, shape index: {}]  }
   0x1   :  { %9 = vsyncpa [#allocation6], 0 }
   0x2   :  { %10 = vsyncpa [#allocation4], 0  ;;  %s298_s12 = smov [#allocation5]   ;;  %s299_s14 = smov [#allocation2]  }
   0x3   :  { %s28_s13 = sshll.u32 %s298_s12, 4  ;;  %s16_s15 = sshll.u32 %s299_s14, 4  ;;  %s29_s13 = int_to_ptr.vmem [resolvable:$true] %s28_s13  ;;  %s324_s15 = int_to_ptr.vmem [resolvable:$true] %s16_s15 }
   0x4   :  { %s204_s18 = scalar_lea.hbm %s389_s1, 512 }
   0x5   :  { %p205_p0 = scmp.ne.s32.totalorder %s389_s1, %s204_s18  ;;  %p208_p1 = scmp.lt.u32.totalorder %s204_s18, %s389_s1 }
   0x7   :  { %p210_p2 = pnand %p208_p1, %p205_p0 }
   0x9   :  { %213 = shalt.err (!%p210_p2)
}
   0xa   :  { %s214_s23 = scalar_lea.vmem %s29_s13, 512  ;;  %p219_p4 = scmp.lt.s32.totalorder %s29_s13, %s29_s13 }
   0xb   :  { %p215_p3 = scmp.ne.s32.totalorder %s29_s13, %s214_s23  ;;  %p220_p5 = scmp.lt.s32.totalorder %s214_s23, %s214_s23 }
   0xd   :  { %p221_p6 = por %p220_p5, %p219_p4 }
   0xf   :  { %p222_p7 = pnand %p221_p6, %p215_p3 }
  0x11   :  { %225 = shalt.err (!%p222_p7)
}
  0x12   :  { %s300_s24 = smov 128   ;;  %s301_s25 = smov 8  }
  0x13   :  { %34 = dma.hbm_to_vmem [thread:$0]  %s389_s1, 512, %s29_s13, [#allocation6], %s300_s24, %s300_s24, %s301_s25  }
  0x14   :  { %s226_s30 = scalar_lea.hbm %s388_s0, 256 }
  0x15   :  { %p227_p8 = scmp.ne.s32.totalorder %s388_s0, %s226_s30  ;;  %p230_p9 = scmp.lt.u32.totalorder %s226_s30, %s388_s0 }
  0x17   :  { %p232_p10 = pnand %p230_p9, %p227_p8 }
  0x19   :  { %235 = shalt.err (!%p232_p10)
}
  0x1a   :  { %s236_s8 = scalar_lea.vmem %s324_s15, 256  ;;  %p241_p12 = scmp.lt.s32.totalorder %s324_s15, %s324_s15 }
  0x1b   :  { %p237_p11 = scmp.ne.s32.totalorder %s324_s15, %s236_s8  ;;  %p242_p13 = scmp.lt.s32.totalorder %s236_s8, %s236_s8 }
  0x1d   :  { %p243_p0 = por %p242_p13, %p241_p12 }
  0x1f   :  { %p244_p1 = pnand %p243_p0, %p237_p11 }
  0x21   :  { %247 = shalt.err (!%p244_p1)
}
  0x22   :  { %22 = dma.hbm_to_vmem [thread:$0]  %s388_s0, 256, %s324_s15, [#allocation3], %s300_s24, %s300_s24, %s301_s25  }
  0x23   :  { %s302_s10 = smov [#allocation7]   ;;  %s248_s14 = scalar_lea.hbm %s390_s2, 16 }
  0x24   :  { %s41_s11 = sshll.u32 %s302_s10, 4  ;;  %p249_p2 = scmp.ne.s32.totalorder %s390_s2, %s248_s14  ;;  %s42_s11 = int_to_ptr.vmem [resolvable:$true] %s41_s11 }
  0x25   :  { %p252_p3 = scmp.lt.u32.totalorder %s248_s14, %s390_s2 }
  0x27   :  { %p254_p4 = pnand %p252_p3, %p249_p2 }
  0x29   :  { %257 = shalt.err (!%p254_p4)
}
  0x2a   :  { %s258_s20 = scalar_lea.vmem %s42_s11, 16  ;;  %s262_s0 = scalar_lea.vmem %s42_s11, 32 }
  0x2b   :  { %p259_p5 = scmp.ne.s32.totalorder %s42_s11, %s258_s20  ;;  %p263_p6 = scmp.lt.s32.totalorder %s42_s11, %s42_s11 }
  0x2c   :  { %p264_p7 = scmp.lt.s32.totalorder %s262_s0, %s258_s20 }
  0x2e   :  { %p265_p8 = por %p264_p7, %p263_p6 }
  0x30   :  { %p266_p9 = pnand %p265_p8, %p259_p5 }
  0x32   :  { %269 = shalt.err (!%p266_p9)
}
  0x33   :  { %44 = dma.hbm_to_vmem [thread:$0]  %s390_s2, 16, %s42_s11, [#allocation6]  }
  0x34   :  { %292 = dma.done.wait [#allocation3], 256  }
  0x35   :  { %293 = vsyncadd [#allocation3], 4294967040 }
  0x36   :  { %294 = dma.done.wait [#allocation6], 528  }
  0x37   :  { %295 = vsyncadd [#allocation6], 4294966768  ;;  %vm67_vm0 = vcmask 261120   ;;  %v56_v0 = vld [vmem:[#allocation5] sm:$0xff]  ;;  %v57_v1 = vld [vmem:[#allocation5 + $0x8] sm:$0xff]  ;;  %s303_s2 = smov [#allocation8]  }
  0x38   :  { %v58_v2 = vld [vmem:[#allocation5 + $0x10] sm:$0xff]  ;;  %v190_v3 = vpack.c.bf16 %v57_v1, %v56_v0  ;;  %v59_v4 = vld [vmem:[#allocation5 + $0x18] sm:$0xff]  ;;  %v170_v8 = vld [vmem:[#allocation7] ss:$0 sm:$0xff]  ;;  %s157_s22 = sshll.u32 %s303_s2, 4  ;;  %vm149_vm1 = vcmask 785408   ;;  %s158_s22 = int_to_ptr.vmem [resolvable:$true] %s157_s22 }
  0x39   :  { %v54_v5 = vld [vmem:[#allocation2] sm:$0xff]  ;;  %v194_v6 = vpack.c.bf16 %v59_v4, %v58_v2  ;;  %v55_v7 = vld [vmem:[#allocation2 + $0x8] sm:$0xff]  ;;  %s270_s23 = scalar_lea.vmem %s158_s22, 256  ;;  %p275_p11 = scmp.lt.s32.totalorder %s158_s22, %s158_s22 }
  0x3a   :  { %187 = vmatprep.mubr.msk.f32.mxu0 %vm67_vm0, %v54_v5  ;;  %191 = vmatprep.subr.bf16.mxu0 %v190_v3  ;;  %p271_p10 = scmp.ne.s32.totalorder %s158_s22, %s270_s23  ;;  %p276_p12 = scmp.lt.s32.totalorder %s270_s23, %s270_s23 }
  0x3b   :  { %193 = vmatpush3.bf16.msra.mxu0 %v190_v3 }
  0x3c   :  { %195 = vmatprep.subr.bf16.mxu0 %v194_v6  ;;  %p277_p13 = por %p276_p12, %p275_p11 }
  0x3e   :  { %p278_p0 = pnand %p277_p13, %p271_p10 }
  0x3f   :  { %197 = vmatpush3.bf16.msra.mxu0 %v194_v6 }
  0x42   :  { %188 = vmatmul.mubr.msk.f32.vlgmr.msra.gmra.mrb[0].mxu0 %vm67_vm0, %v55_v7 }
 0x115   :  { %v189_v9 = vpop.f32.mrb[0].mxu0 }
 0x116   :  { %v146_v10 = vadd.f32 %v189_v9, %v170_v8  ;;  %v140_v11 = vpop.f32.mrb[1].mxu0 }
 0x117   :  { %v141_v12 = vadd.f32 %v170_v8, %v140_v11 }
 0x118   :  { %151 = vst.msk [vmem:[#allocation8 + $0x8] sm:$0xff] %vm149_vm1, %v146_v10 }
 0x119   :  { %150 = vst.msk [vmem:[#allocation8] sm:$0xff] %vm149_vm1, %v141_v12 }
 0x11a   :  { %281 = shalt.err (!%p278_p0)
}
 0x11b   :  { %s282_s28 = scalar_lea.hbm %s391_s3, 256 }
 0x11c   :  { %p283_p1 = scmp.ne.s32.totalorder %s391_s3, %s282_s28  ;;  %p286_p2 = scmp.lt.u32.totalorder %s282_s28, %s391_s3 }
 0x11e   :  { %p288_p3 = pnand %p286_p2, %p283_p1 }
 0x120   :  { %291 = shalt.err (!%p288_p3)
}
 0x121   :  { %163 = dma.vmem_to_hbm [thread:$0]  %s158_s22, 256, %s391_s3, [#allocation4], %s300_s24, %s300_s24, %s301_s25  }
 0x122   :  { %296 = dma.done.wait [#allocation4], 256  }
 0x123   :  { %297 = vsyncadd [#allocation4], 4294967040 }
 0x124   :  { %167 = vsyncpa [#allocation3], 1 }
 0x125   :  { %168 = vsyncpa [#allocation6], 1 }
 0x126   :  { %169 = vsyncpa [#allocation4], 1 }

// kernel: decoder_layer.9
= control target key start
LH: loop header
LB: loop body
LE: loop exit
PB: predicated region body
PF: predicated region fallthrough
CT: control target
= control target key end

     0   :  { %8 = vsyncpa [#allocation3], 0  ;;  %s388_s0 = inlined_call_operand.hbm [shape: f32[16,32], index: 0, kind: input, shape index: {}]   ;;  %s389_s1 = inlined_call_operand.hbm [shape: f32[32,64], index: 1, kind: input, shape index: {}]   ;;  %s390_s2 = inlined_call_operand.hbm [shape: f32[1,64], index: 2, kind: input, shape index: {}]   ;;  %s391_s3 = inlined_call_operand.hbm [shape: f32[16,64], index: 3, kind: output, shape index: {}]  }
   0x1   :  { %9 = vsyncpa [#allocation6], 0 }
   0x2   :  { %10 = vsyncpa [#allocation4], 0  ;;  %s298_s12 = smov [#allocation5]   ;;  %s299_s14 = smov [#allocation2]  }
   0x3   :  { %s28_s13 = sshll.u32 %s298_s12, 4  ;;  %s16_s15 = sshll.u32 %s299_s14, 4  ;;  %s29_s13 = int_to_ptr.vmem [resolvable:$true] %s28_s13  ;;  %s324_s15 = int_to_ptr.vmem [resolvable:$true] %s16_s15 }
   0x4   :  { %s204_s18 = scalar_lea.hbm %s389_s1, 512 }
   0x5   :  { %p205_p0 = scmp.ne.s32.totalorder %s389_s1, %s204_s18  ;;  %p208_p1 = scmp.lt.u32.totalorder %s204_s18, %s389_s1 }
   0x7   :  { %p210_p2 = pnand %p208_p1, %p205_p0 }
   0x9   :  { %213 = shalt.err (!%p210_p2)
}
   0xa   :  { %s214_s23 = scalar_lea.vmem %s29_s13, 512  ;;  %p219_p4 = scmp.lt.s32.totalorder %s29_s13, %s29_s13 }
   0xb   :  { %p215_p3 = scmp.ne.s32.totalorder %s29_s13, %s214_s23  ;;  %p220_p5 = scmp.lt.s32.totalorder %s214_s23, %s214_s23 }
   0xd   :  { %p221_p6 = por %p220_p5, %p219_p4 }
   0xf   :  { %p222_p7 = pnand %p221_p6, %p215_p3 }
  0x11   :  { %225 = shalt.err (!%p222_p7)
}
  0x12   :  { %s300_s24 = smov 128   ;;  %s301_s25 = smov 8  }
  0x13   :  { %34 = dma.hbm_to_vmem [thread:$0]  %s389_s1, 512, %s29_s13, [#allocation6], %s300_s24, %s300_s24, %s301_s25  }
  0x14   :  { %s226_s30 = scalar_lea.hbm %s388_s0, 256 }
  0x15   :  { %p227_p8 = scmp.ne.s32.totalorder %s388_s0, %s226_s30  ;;  %p230_p9 = scmp.lt.u32.totalorder %s226_s30, %s388_s0 }
  0x17   :  { %p232_p10 = pnand %p230_p9, %p227_p8 }
  0x19   :  { %235 = shalt.err (!%p232_p10)
}
  0x1a   :  { %s236_s8 = scalar_lea.vmem %s324_s15, 256  ;;  %p241_p12 = scmp.lt.s32.totalorder %s324_s15, %s324_s15 }
  0x1b   :  { %p237_p11 = scmp.ne.s32.totalorder %s324_s15, %s236_s8  ;;  %p242_p13 = scmp.lt.s32.totalorder %s236_s8, %s236_s8 }
  0x1d   :  { %p243_p0 = por %p242_p13, %p241_p12 }
  0x1f   :  { %p244_p1 = pnand %p243_p0, %p237_p11 }
  0x21   :  { %247 = shalt.err (!%p244_p1)
}
  0x22   :  { %22 = dma.hbm_to_vmem [thread:$0]  %s388_s0, 256, %s324_s15, [#allocation3], %s300_s24, %s300_s24, %s301_s25  }
  0x23   :  { %s302_s10 = smov [#allocation7]   ;;  %s248_s14 = scalar_lea.hbm %s390_s2, 16 }
  0x24   :  { %s41_s11 = sshll.u32 %s302_s10, 4  ;;  %p249_p2 = scmp.ne.s32.totalorder %s390_s2, %s248_s14  ;;  %s42_s11 = int_to_ptr.vmem [resolvable:$true] %s41_s11 }
  0x25   :  { %p252_p3 = scmp.lt.u32.totalorder %s248_s14, %s390_s2 }
  0x27   :  { %p254_p4 = pnand %p252_p3, %p249_p2 }
  0x29   :  { %257 = shalt.err (!%p254_p4)
}
  0x2a   :  { %s258_s20 = scalar_lea.vmem %s42_s11, 16  ;;  %s262_s0 = scalar_lea.vmem %s42_s11, 32 }
  0x2b   :  { %p259_p5 = scmp.ne.s32.totalorder %s42_s11, %s258_s20  ;;  %p263_p6 = scmp.lt.s32.totalorder %s42_s11, %s42_s11 }
  0x2c   :  { %p264_p7 = scmp.lt.s32.totalorder %s262_s0, %s258_s20 }
  0x2e   :  { %p265_p8 = por %p264_p7, %p263_p6 }
  0x30   :  { %p266_p9 = pnand %p265_p8, %p259_p5 }
  0x32   :  { %269 = shalt.err (!%p266_p9)
}
  0x33   :  { %44 = dma.hbm_to_vmem [thread:$0]  %s390_s2, 16, %s42_s11, [#allocation6]  }
  0x34   :  { %292 = dma.done.wait [#allocation3], 256  }
  0x35   :  { %293 = vsyncadd [#allocation3], 4294967040 }
  0x36   :  { %294 = dma.done.wait [#allocation6], 528  }
  0x37   :  { %295 = vsyncadd [#allocation6], 4294966768  ;;  %vm67_vm0 = vcmask 261120   ;;  %v56_v0 = vld [vmem:[#allocation5] sm:$0xff]  ;;  %v57_v1 = vld [vmem:[#allocation5 + $0x8] sm:$0xff]  ;;  %s303_s2 = smov [#allocation8]  }
  0x38   :  { %v58_v2 = vld [vmem:[#allocation5 + $0x10] sm:$0xff]  ;;  %v190_v3 = vpack.c.bf16 %v57_v1, %v56_v0  ;;  %v59_v4 = vld [vmem:[#allocation5 + $0x18] sm:$0xff]  ;;  %v170_v8 = vld [vmem:[#allocation7] ss:$0 sm:$0xff]  ;;  %s157_s22 = sshll.u32 %s303_s2, 4  ;;  %vm149_vm1 = vcmask 523264   ;;  %s158_s22 = int_to_ptr.vmem [resolvable:$true] %s157_s22 }
  0x39   :  { %v54_v5 = vld [vmem:[#allocation2] sm:$0xff]  ;;  %v194_v6 = vpack.c.bf16 %v59_v4, %v58_v2  ;;  %v55_v7 = vld [vmem:[#allocation2 + $0x8] sm:$0xff]  ;;  %s270_s23 = scalar_lea.vmem %s158_s22, 256  ;;  %p275_p11 = scmp.lt.s32.totalorder %s158_s22, %s158_s22 }
  0x3a   :  { %187 = vmatprep.mubr.msk.f32.mxu0 %vm67_vm0, %v54_v5  ;;  %191 = vmatprep.subr.bf16.mxu0 %v190_v3  ;;  %p271_p10 = scmp.ne.s32.totalorder %s158_s22, %s270_s23  ;;  %p276_p12 = scmp.lt.s32.totalorder %s270_s23, %s270_s23 }
  0x3b   :  { %193 = vmatpush3.bf16.msra.mxu0 %v190_v3 }
  0x3c   :  { %195 = vmatprep.subr.bf16.mxu0 %v194_v6  ;;  %p277_p13 = por %p276_p12, %p275_p11 }
  0x3e   :  { %p278_p0 = pnand %p277_p13, %p271_p10 }
  0x3f   :  { %197 = vmatpush3.bf16.msra.mxu0 %v194_v6 }
  0x42   :  { %188 = vmatmul.mubr.msk.f32.vlgmr.msra.gmra.mrb[0].mxu0 %vm67_vm0, %v55_v7 }
 0x115   :  { %v189_v9 = vpop.f32.mrb[0].mxu0 }
 0x116   :  { %v146_v10 = vadd.f32 %v189_v9, %v170_v8  ;;  %v140_v11 = vpop.f32.mrb[1].mxu0 }
 0x117   :  { %v141_v12 = vadd.f32 %v170_v8, %v140_v11 }
 0x118   :  { %151 = vst.msk [vmem:[#allocation8 + $0x8] sm:$0xff] %vm149_vm1, %v146_v10 }
 0x119   :  { %150 = vst.msk [vmem:[#allocation8] sm:$0xff] %vm149_vm1, %v141_v12 }
 0x11a   :  { %281 = shalt.err (!%p278_p0)
}
 0x11b   :  { %s282_s28 = scalar_lea.hbm %s391_s3, 256 }
 0x11c   :  { %p283_p1 = scmp.ne.s32.totalorder %s391_s3, %s282_s28  ;;  %p286_p2 = scmp.lt.u32.totalorder %s282_s28, %s391_s3 }
 0x11e   :  { %p288_p3 = pnand %p286_p2, %p283_p1 }
 0x120   :  { %291 = shalt.err (!%p288_p3)
}
 0x121   :  { %163 = dma.vmem_to_hbm [thread:$0]  %s158_s22, 256, %s391_s3, [#allocation4], %s300_s24, %s300_s24, %s301_s25  }
 0x122   :  { %296 = dma.done.wait [#allocation4], 256  }
 0x123   :  { %297 = vsyncadd [#allocation4], 4294967040 }
 0x124   :  { %167 = vsyncpa [#allocation3], 1 }
 0x125   :  { %168 = vsyncpa [#allocation6], 1 }
 0x126   :  { %169 = vsyncpa [#allocation4], 1 }

// kernel: decoder_layer.8
= control target key start
LH: loop header
LB: loop body
LE: loop exit
PB: predicated region body
PF: predicated region fallthrough
CT: control target
= control target key end

     0   :  { %8 = vsyncpa [#allocation3], 0  ;;  %s391_s0 = inlined_call_operand.hbm [shape: f32[16,32], index: 0, kind: input, shape index: {}]   ;;  %s392_s1 = inlined_call_operand.hbm [shape: f32[32,32], index: 1, kind: input, shape index: {}]   ;;  %s393_s2 = inlined_call_operand.hbm [shape: f32[1,32], index: 2, kind: input, shape index: {}]   ;;  %s394_s3 = inlined_call_operand.hbm [shape: f32[16,32], index: 3, kind: output, shape index: {}]  }
   0x1   :  { %9 = vsyncpa [#allocation6], 0 }
   0x2   :  { %10 = vsyncpa [#allocation4], 0  ;;  %s297_s12 = smov [#allocation5]   ;;  %s298_s14 = smov [#allocation2]  }
   0x3   :  { %s28_s13 = sshll.u32 %s297_s12, 4  ;;  %s16_s15 = sshll.u32 %s298_s14, 4  ;;  %s29_s13 = int_to_ptr.vmem [resolvable:$true] %s28_s13  ;;  %s323_s15 = int_to_ptr.vmem [resolvable:$true] %s16_s15 }
   0x4   :  { %s203_s18 = scalar_lea.hbm %s392_s1, 512 }
   0x5   :  { %p204_p0 = scmp.ne.s32.totalorder %s392_s1, %s203_s18  ;;  %p207_p1 = scmp.lt.u32.totalorder %s203_s18, %s392_s1 }
   0x7   :  { %p209_p2 = pnand %p207_p1, %p204_p0 }
   0x9   :  { %212 = shalt.err (!%p209_p2)
}
   0xa   :  { %s213_s23 = scalar_lea.vmem %s29_s13, 512  ;;  %p218_p4 = scmp.lt.s32.totalorder %s29_s13, %s29_s13 }
   0xb   :  { %p214_p3 = scmp.ne.s32.totalorder %s29_s13, %s213_s23  ;;  %p219_p5 = scmp.lt.s32.totalorder %s213_s23, %s213_s23 }
   0xd   :  { %p220_p6 = por %p219_p5, %p218_p4 }
   0xf   :  { %p221_p7 = pnand %p220_p6, %p214_p3 }
  0x11   :  { %224 = shalt.err (!%p221_p7)
}
  0x12   :  { %s299_s24 = smov 128   ;;  %s300_s25 = smov 8  }
  0x13   :  { %34 = dma.hbm_to_vmem [thread:$0]  %s392_s1, 512, %s29_s13, [#allocation6], %s299_s24, %s299_s24, %s300_s25  }
  0x14   :  { %s225_s30 = scalar_lea.hbm %s391_s0, 256 }
  0x15   :  { %p226_p8 = scmp.ne.s32.totalorder %s391_s0, %s225_s30  ;;  %p229_p9 = scmp.lt.u32.totalorder %s225_s30, %s391_s0 }
  0x17   :  { %p231_p10 = pnand %p229_p9, %p226_p8 }
  0x19   :  { %234 = shalt.err (!%p231_p10)
}
  0x1a   :  { %s235_s8 = scalar_lea.vmem %s323_s15, 256  ;;  %p240_p12 = scmp.lt.s32.totalorder %s323_s15, %s323_s15 }
  0x1b   :  { %p236_p11 = scmp.ne.s32.totalorder %s323_s15, %s235_s8  ;;  %p241_p13 = scmp.lt.s32.totalorder %s235_s8, %s235_s8 }
  0x1d   :  { %p242_p0 = por %p241_p13, %p240_p12 }
  0x1f   :  { %p243_p1 = pnand %p242_p0, %p236_p11 }
  0x21   :  { %246 = shalt.err (!%p243_p1)
}
  0x22   :  { %22 = dma.hbm_to_vmem [thread:$0]  %s391_s0, 256, %s323_s15, [#allocation3], %s299_s24, %s299_s24, %s300_s25  }
  0x23   :  { %s301_s10 = smov [#allocation7]   ;;  %s247_s14 = scalar_lea.hbm %s393_s2, 16 }
  0x24   :  { %s41_s11 = sshll.u32 %s301_s10, 4  ;;  %p248_p2 = scmp.ne.s32.totalorder %s393_s2, %s247_s14  ;;  %s42_s11 = int_to_ptr.vmem [resolvable:$true] %s41_s11 }
  0x25   :  { %p251_p3 = scmp.lt.u32.totalorder %s247_s14, %s393_s2 }
  0x27   :  { %p253_p4 = pnand %p251_p3, %p248_p2 }
  0x29   :  { %256 = shalt.err (!%p253_p4)
}
  0x2a   :  { %s257_s20 = scalar_lea.vmem %s42_s11, 16  ;;  %s261_s0 = scalar_lea.vmem %s42_s11, 32 }
  0x2b   :  { %p258_p5 = scmp.ne.s32.totalorder %s42_s11, %s257_s20  ;;  %p262_p6 = scmp.lt.s32.totalorder %s42_s11, %s42_s11 }
  0x2c   :  { %p263_p7 = scmp.lt.s32.totalorder %s261_s0, %s257_s20 }
  0x2e   :  { %p264_p8 = por %p263_p7, %p262_p6 }
  0x30   :  { %p265_p9 = pnand %p264_p8, %p258_p5 }
  0x32   :  { %268 = shalt.err (!%p265_p9)
}
  0x33   :  { %44 = dma.hbm_to_vmem [thread:$0]  %s393_s2, 16, %s42_s11, [#allocation6]  }
  0x34   :  { %291 = dma.done.wait [#allocation3], 256  }
  0x35   :  { %292 = vsyncadd [#allocation3], 4294967040 }
  0x36   :  { %293 = dma.done.wait [#allocation6], 528  }
  0x37   :  { %294 = vsyncadd [#allocation6], 4294966768  ;;  %vm67_vm0 = vcmask 261120   ;;  %v56_v0 = vld [vmem:[#allocation5] sm:$0xff]  ;;  %v57_v1 = vld [vmem:[#allocation5 + $0x8] sm:$0xff]  ;;  %s302_s2 = smov [#allocation8]  }
  0x38   :  { %v58_v2 = vld [vmem:[#allocation5 + $0x10] sm:$0xff]  ;;  %v189_v3 = vpack.c.bf16 %v57_v1, %v56_v0  ;;  %v59_v4 = vld [vmem:[#allocation5 + $0x18] sm:$0xff]  ;;  %v169_v8 = vld [vmem:[#allocation7] ss:$0 sm:$0xff]  ;;  %s156_s22 = sshll.u32 %s302_s2, 4  ;;  %s157_s22 = int_to_ptr.vmem [resolvable:$true] %s156_s22 }
  0x39   :  { %v54_v5 = vld [vmem:[#allocation2] sm:$0xff]  ;;  %v193_v6 = vpack.c.bf16 %v59_v4, %v58_v2  ;;  %v55_v7 = vld [vmem:[#allocation2 + $0x8] sm:$0xff]  ;;  %s269_s23 = scalar_lea.vmem %s157_s22, 256  ;;  %p274_p11 = scmp.lt.s32.totalorder %s157_s22, %s157_s22 }
  0x3a   :  { %186 = vmatprep.mubr.msk.f32.mxu0 %vm67_vm0, %v54_v5  ;;  %190 = vmatprep.subr.bf16.mxu0 %v189_v3  ;;  %p270_p10 = scmp.ne.s32.totalorder %s157_s22, %s269_s23  ;;  %p275_p12 = scmp.lt.s32.totalorder %s269_s23, %s269_s23 }
  0x3b   :  { %192 = vmatpush3.bf16.msra.mxu0 %v189_v3 }
  0x3c   :  { %194 = vmatprep.subr.bf16.mxu0 %v193_v6  ;;  %p276_p13 = por %p275_p12, %p274_p11 }
  0x3e   :  { %p277_p0 = pnand %p276_p13, %p270_p10 }
  0x3f   :  { %196 = vmatpush3.bf16.msra.mxu0 %v193_v6 }
  0x42   :  { %187 = vmatmul.mubr.msk.f32.vlgmr.msra.gmra.mrb[0].mxu0 %vm67_vm0, %v55_v7 }
 0x115   :  { %v188_v9 = vpop.f32.mrb[0].mxu0 }
 0x116   :  { %v146_v10 = vadd.f32 %v188_v9, %v169_v8  ;;  %v140_v11 = vpop.f32.mrb[1].mxu0 }
 0x117   :  { %v141_v12 = vadd.f32 %v169_v8, %v140_v11 }
 0x118   :  { %150 = vst.msk [vmem:[#allocation8 + $0x8] sm:$0xff] %vm67_vm0, %v146_v10 }
 0x119   :  { %149 = vst.msk [vmem:[#allocation8] sm:$0xff] %vm67_vm0, %v141_v12 }
 0x11a   :  { %280 = shalt.err (!%p277_p0)
}
 0x11b   :  { %s281_s28 = scalar_lea.hbm %s394_s3, 256 }
 0x11c   :  { %p282_p1 = scmp.ne.s32.totalorder %s394_s3, %s281_s28  ;;  %p285_p2 = scmp.lt.u32.totalorder %s281_s28, %s394_s3 }
 0x11e   :  { %p287_p3 = pnand %p285_p2, %p282_p1 }
 0x120   :  { %290 = shalt.err (!%p287_p3)
}
 0x121   :  { %162 = dma.vmem_to_hbm [thread:$0]  %s157_s22, 256, %s394_s3, [#allocation4], %s299_s24, %s299_s24, %s300_s25  }
 0x122   :  { %295 = dma.done.wait [#allocation4], 256  }
 0x123   :  { %296 = vsyncadd [#allocation4], 4294967040 }
 0x124   :  { %166 = vsyncpa [#allocation3], 1 }
 0x125   :  { %167 = vsyncpa [#allocation6], 1 }
 0x126   :  { %168 = vsyncpa [#allocation4], 1 }

// kernel: decoder_layer.7
= control target key start
LH: loop header
LB: loop body
LE: loop exit
PB: predicated region body
PF: predicated region fallthrough
CT: control target
= control target key end

     0   :  { %s2515_s0 = inlined_call_operand.hbm [shape: f32[2,4,8,8], index: 0, kind: input, shape index: {}]   ;;  %s2516_s1 = inlined_call_operand.hbm [shape: f32[2,4,8,8], index: 1, kind: input, shape index: {}]   ;;  %s2517_s2 = inlined_call_operand.hbm [shape: f32[2,4,8,8], index: 2, kind: input, shape index: {}]   ;;  %s2518_s3 = inlined_call_operand.hbm [shape: s32[2,1,8,8], index: 3, kind: input, shape index: {}]   ;;  %s2519_s4 = inlined_call_operand.hbm [shape: f32[4,8,32], index: 4, kind: input, shape index: {}]   ;;  %s2520_s5 = inlined_call_operand.hbm [shape: f32[1,32], index: 5, kind: input, shape index: {}]   ;;  %s2521_s6 = inlined_call_operand.hbm [shape: f32[2,8,32], index: 6, kind: input, shape index: {}]   ;;  %s2522_s7 = inlined_call_operand.hbm [shape: f32[1,32], index: 7, kind: input, shape index: {}]   ;;  %s2523_s8 = inlined_call_operand.hbm [shape: f32[1,32], index: 8, kind: input, shape index: {}]   ;;  %s2524_s9 = inlined_call_operand.hbm [shape: f32[2,8,32], index: 9, kind: output, shape index: {}]  }
   0x1   :  { %2560 = sst [smem:[#allocation44_spill]] %s2515_s0 }
   0x2   :  { %2561 = sst [smem:[#allocation45_spill]] %s2516_s1 }
   0x3   :  { %2562 = sst [smem:[#allocation46_spill]] %s2518_s3 }
   0x4   :  { %2563 = sst [smem:[#allocation47_spill]] %s2519_s4 }
   0x5   :  { %2564 = sst [smem:[#allocation48_spill]] %s2521_s6 }
   0x6   :  { %2565 = sst [smem:[#allocation49_spill]] %s2522_s7 }
   0x7   :  { %2566 = sst [smem:[#allocation50_spill]] %s2523_s8 }
   0x8   :  { %2567 = sst [smem:[#allocation51_spill]] %s2524_s9 }
   0x9   :  { %14 = vsyncpa [#allocation4], 0 }
   0xa   :  { %16 = vsyncpa [#allocation4 + $0x1], 0 }
   0xb   :  { %17 = vsyncpa [#allocation7], 0 }
   0xc   :  { %19 = vsyncpa [#allocation7 + $0x1], 0 }
   0xd   :  { %20 = vsyncpa [#allocation10], 0 }
   0xe   :  { %22 = vsyncpa [#allocation10 + $0x1], 0 }
   0xf   :  { %23 = vsyncpa [#allocation13], 0 }
  0x10   :  { %24 = vsyncpa [#allocation5], 0 }
  0x11   :  { %26 = vsyncpa [#allocation5 + $0x1], 0  ;;  %s1879_s30 = smov 0   ;;  %s1881_s10 = smov 0  }
  0x12   :  { %s1883_s11 = smov 0   ;;  %s1885_s12 = smov 0  }
  0x13   :  { %s1887_s13 = smov 0   ;;  %s1889_s14 = smov 0  }
  0x14   :  { %s1891_s15 = smov 0   ;;  %s1893_s16 = smov 0  }
  0x15   :  { %s1895_s17 = smov 0   ;;  %s1897_s18 = smov 0  }
  0x16   :  { %s1899_s19 = smov 0   ;;  %s1901_s20 = smov 0  }
  0x17   :  { %s1903_s21 = smov 0   ;;  %s1905_s22 = smov 0  }
  0x18 LB: > { %2568 = sst [smem:[#allocation27_spill]] %s1762_s30  ;;  %s1816_s23 = smov [#allocation15]   ;;  %s1814_s22 = sphi %s1905_s22, %s32_s22   ;;  %s1810_s21 = sphi %s1903_s21, %s2668_s21   ;;  %s1806_s20 = sphi %s1901_s20, %s2660_s20   ;;  %s1802_s19 = sphi %s1899_s19, %s2667_s19   ;;  %s1798_s18 = sphi %s1897_s18, %s2666_s18   ;;  %s1794_s17 = sphi %s1895_s17, %s2658_s17   ;;  %s1790_s16 = sphi %s1893_s16, %s2657_s16   ;;  %s1786_s15 = sphi %s1891_s15, %s2656_s15   ;;  %s1782_s14 = sphi %s1889_s14, %s2655_s14   ;;  %s1778_s13 = sphi %s1887_s13, %s2665_s13   ;;  %s1774_s12 = sphi %s1885_s12, %s2664_s12   ;;  %s1770_s11 = sphi %s1883_s11, %s2663_s11   ;;  %s1766_s10 = sphi %s1881_s10, %s2653_s10   ;;  %s1762_s30 = sphi %s1879_s30, %s2652_s30  }
  0x19   : > { %2569 = sst [smem:[#allocation28_spill]] %s1766_s10  ;;  %s324_s24 = sshll.u32 %s1816_s23, 4  ;;  %s325_s24 = int_to_ptr.vmem [resolvable:$true] %s324_s24 }
  0x1a   : > { %2570 = sst [smem:[#allocation29_spill]] %s1770_s11  ;;  %s1950_s25 = sadd.s32 4294967295, %s1814_s22  }
  0x1b   : > { %2571 = sst [smem:[#allocation30_spill]] %s1782_s14  ;;  %p1120_p0 = scmp.ge.s32.totalorder %s1814_s22, 1 }
  0x1c   : > { %2572 = sst [smem:[#allocation31_spill]] %s1790_s16  ;;  %p2529_p1 = scmp.eq.s32.totalorder %s1950_s25, 0 }
  0x1d   : > { %2573 = sst [smem:[#allocation32_spill]] %s1794_s17  ;;  %p300_p2 = scmp.lt.s32.totalorder %s1814_s22, 9 }
  0x1e   : > { %2574 = sst [smem:[#allocation33_spill]] %s1798_s18  ;;  %s1817_s27 = smov [#allocation16]  }
  0x1f   : > { %2575 = sst [smem:[#allocation34_spill]] %s1802_s19  ;;  %p1955_p3 = pnand %p1120_p0, %p300_p2 }
  0x20   : > { %2576 = sst [smem:[#allocation35_spill]] %s1806_s20  ;;  %s335_s28 = sshll.u32 %s1817_s27, 4  ;;  %s1961_s28 = int_to_ptr.vmem [resolvable:$true] %s335_s28 }
  0x21   : > { %s2577_s26 = scalar_select %p1955_p3, 1, 0 }
  0x22   : > { %p1211_p4 = pneg %p1955_p3  ;;  %s2580_s7 = sld [smem:[#allocation49_spill]] }
  0x23   : > { %2578 = sst [smem:[#allocation36_spill]] %s2577_s26 }
  0x24   : > { %p1965_p5 = pnand %p1211_p4, %p2529_p1 }
  0x26   : > { %s2579_s29 = scalar_select %p1965_p5, 1, 0 }
  0x27   : > { %p1977_p7 = pneg %p1965_p5 }
  0x28   : > { %s1376_s19 = scalar_lea.hbm %s2580_s7, 16 }
  0x29   : > { %p1377_p6 = scmp.ne.s32.totalorder %s2580_s7, %s1376_s19  ;;  %p1383_p10 = scmp.lt.u32.totalorder %s1376_s19, %s2580_s7 }
  0x2a   : > { %s2581_s26 = scalar_select %p1977_p7, 1, 0 }
  0x2b   : > { %p1379_p8 = pnand %p1977_p7, %p1377_p6 }
  0x2d   : > { %p1380_p9 = pneg %p1379_p8 }
  0x2f   : > { %p1385_p11 = pnand %p1383_p10, %p1380_p9 }
  0x31   : > { %1388 = shalt.err (!%p1385_p11)
}
  0x32   : > { %s1389_s9 = scalar_lea.vmem %s325_s24, 16  ;;  %s1396_s6 = scalar_lea.vmem %s325_s24, 32 }
  0x33   : > { %p1390_p12 = scmp.ne.s32.totalorder %s325_s24, %s1389_s9  ;;  %p1397_p2 = scmp.lt.s32.totalorder %s325_s24, %s325_s24 }
  0x34   : > { %p1398_p4 = scmp.lt.s32.totalorder %s1396_s6, %s1389_s9 }
  0x35   : > { %p1392_p13 = pnand %p1390_p12, %p1977_p7 }
  0x36   : > { %p1399_p1 = por %p1398_p4, %p1397_p2 }
  0x37   : > { %p1393_p0 = pneg %p1392_p13 }
  0x39   : > { %p1400_p3 = pnand %p1399_p1, %p1393_p0 }
  0x3b   : > { %1403 = shalt.err (!%p1400_p3)
}
  0x3c   : > { %1217 = dma.hbm_to_vmem [thread:$0]  (!%p1965_p5), %s2580_s7, 16, %s325_s24, [#allocation7]  }
  0x3d   : > { %s2582_s8 = sld [smem:[#allocation50_spill]] }
  0x43   : > { %s1404_s27 = scalar_lea.hbm %s2582_s8, 16 }
  0x44   : > { %p1405_p6 = scmp.ne.s32.totalorder %s2582_s8, %s1404_s27  ;;  %p1411_p1 = scmp.lt.u32.totalorder %s1404_s27, %s2582_s8 }
  0x46   : > { %p1407_p8 = pnand %p1405_p6, %p1977_p7 }
  0x48   : > { %p1408_p9 = pneg %p1407_p8 }
  0x4a   : > { %p1413_p3 = pnand %p1411_p1, %p1408_p9 }
  0x4c   : > { %1416 = shalt.err (!%p1413_p3)
}
  0x4d   : > { %s1417_s24 = scalar_lea.vmem %s1961_s28, 16  ;;  %s1424_s30 = scalar_lea.vmem %s1961_s28, 32 }
  0x4e   : > { %p1418_p10 = scmp.ne.s32.totalorder %s1961_s28, %s1417_s24  ;;  %p1425_p13 = scmp.lt.s32.totalorder %s1961_s28, %s1961_s28 }
  0x4f   : > { %p1426_p0 = scmp.lt.s32.totalorder %s1424_s30, %s1417_s24 }
  0x50   : > { %p1420_p11 = pnand %p1418_p10, %p1977_p7 }
  0x51   : > { %p1427_p2 = por %p1426_p0, %p1425_p13 }
  0x52   : > { %p1421_p12 = pneg %p1420_p11 }
  0x54   : > { %p1428_p4 = pnand %p1427_p2, %p1421_p12 }
  0x56   : > { %1431 = shalt.err (!%p1428_p4)
}
  0x57   : > { %1220 = dma.hbm_to_vmem [thread:$0]  (!%p1965_p5), %s2582_s8, 16, %s1961_s28, [#allocation10]  }
  0x58   : > { %s41_s23 = sadd.s32 1, %s1806_s20  ;;  %s44_s4 = sadd.s32 1, %s1810_s21 }
  0x59   : > { %p42_p6 = scmp.ge.s32.totalorder %s41_s23, 4  ;;  %s53_s19 = sadd.s32 1, %s1794_s17 }
  0x5a   : > { %p60_p8 = scmp.ne.s32.totalorder %s1794_s17, %s1790_s16  ;;  %p2542_p9 = scmp.eq.s32.totalorder %s1814_s22, 0 }
  0x5b   : > { %s2670_s23 = smov (%p42_p6, %s41_s23), 0  ;;  %s2672_s4 = smov (!%p42_p6, %s44_s4), %s1810_s21 }
  0x5c   : > { %2583 = sst [smem:[#allocation37_spill]] %s2670_s23  ;;  %s2028_s27 = ssub.s32 %s1806_s20, %s2670_s23 }
  0x5d   : > { %2584 = sst [smem:[#allocation38_spill]] %s2028_s27  ;;  %p2032_p1 = por %p2542_p9, %p60_p8 }
  0x5e   : > { %p46_p3 = scmp.ge.s32.totalorder %s2672_s4, 2  ;;  %p66_p10 = scmp.ne.s32.totalorder %s1790_s16, %s1786_s15 }
  0x5f   : > { %p2541_p12 = scmp.lt.s32.totalorder %s1814_s22, 8  ;;  %p2587_p13 = scmp.eq.s32.totalorder %s1950_s25, 0 }
  0x60   : > { %s2674_s4 = smov (%p46_p3, %s2672_s4), 0  ;;  %s2049_s6 = sand.u32 1, %s1814_s22  }
  0x61   : > { %2586 = sst [smem:[#allocation39_spill]] %s2674_s4  ;;  %p2044_p0 = por %p2587_p13, %p66_p10 }
  0x62   : > { %s2053_s24 = ssub.s32 %s1810_s21, %s2674_s4  ;;  %s348_s15 = sand.u32 1, %s1794_s17  }
  0x63   : > { %s2588_s9 = scalar_select %p2044_p0, 1, 0 }
  0x64   : > { %s50_s30 = sor.u32 %s2028_s27, %s2053_s24  ;;  %s2059_s10 = sshll.u32 %s348_s15, 3 }
  0x65   : > { %2589 = sst [smem:[#allocation40_spill]] %s2588_s9  ;;  %p51_p4 = scmp.eq.s32.totalorder %s50_s30, 0 }
  0x66   : > { %s1126_s18 = sshll.u32 %s1810_s21, 2  ;;  %s350_s4 = scalar_lea.vmem [#allocation3], %s2059_s10 }
  0x67   : > { %s2063_s7 = scalar_select %p51_p4, %s1794_s17, %s53_s19  }
  0x68   : > { %s355_s8 = sadd.s32 %s1806_s20, %s1126_s18  ;;  %s359_s9 = sshll.u32 %s350_s4, 4  ;;  %s2075_s9 = int_to_ptr.vmem [resolvable:$true] %s359_s9 }
  0x69   : > { %2590 = sst [smem:[#allocation41_spill]] %s2063_s7  ;;  %s2066_s23 = sshll.u32 %s355_s8, 7 }
  0x6a   : > { %s2591_s0 = sld [smem:[#allocation44_spill]]  ;;  %p2081_p6 = pnand %p2541_p12, %p2032_p1 }
  0x6b   : > { %s2593_s1 = sld [smem:[#allocation45_spill]]  ;;  %s370_s16 = scalar_lea.vmem [#allocation6], %s2059_s10 }
  0x6c   : > { %s2592_s8 = scalar_select %p2081_p6, 1, 0 }
  0x6d   : > { %s2092_s27 = sshll.u32 %s370_s16, 4  ;;  %s2547_s15 = scalar_lea.sflag [#allocation4], %s2049_s6  ;;  %s380_s27 = int_to_ptr.vmem [resolvable:$true] %s2092_s27 }
  0x6e   : > { %p2099_p3 = pneg %p2081_p6 }
  0x70   : > { %s2073_s11 = scalar_lea.hbm %s2591_s0, %s2066_s23  ;;  %s1437_s30 = scalar_lea.hbm %s2591_s0, 1024 }
  0x71   : > { %s2089_s4 = scalar_lea.hbm %s2593_s1, %s2066_s23  ;;  %s1432_s18 = scalar_lea.hbm %s2073_s11, 128 }
  0x72   : > { %p1433_p8 = scmp.ne.s32.totalorder %s2073_s11, %s1432_s18  ;;  %p1438_p13 = scmp.lt.u32.totalorder %s2073_s11, %s2591_s0 }
  0x73   : > { %p1439_p4 = scmp.lt.u32.totalorder %s1437_s30, %s1432_s18  ;;  %p1441_p12 = scmp.lt.u32.totalorder %s1432_s18, %s2073_s11 }
  0x74   : > { %p1435_p1 = pnand %p2099_p3, %p1433_p8 }
  0x75   : > { %p1440_p11 = por %p1439_p4, %p1438_p13 }
  0x76   : > { %p1436_p10 = pneg %p1435_p1 }
  0x77   : > { %p1442_p9 = por %p1441_p12, %p1440_p11 }
  0x79   : > { %p1443_p2 = pnand %p1442_p9, %p1436_p10 }
  0x7b   : > { %1446 = shalt.err (!%p1443_p2)
}
  0x7c   : > { %s1447_s16 = scalar_lea.vmem %s2075_s9, 128  ;;  %s1818_s7 = smov [#allocation3]  }
  0x7d   : > { %p1448_p8 = scmp.ne.s32.totalorder %s2075_s9, %s1447_s16  ;;  %s1452_s19 = sshll.u32 %s1818_s7, 4  ;;  %s1453_s19 = int_to_ptr.vmem [resolvable:$false] %s1452_s19 }
  0x7e   : > { %s1454_s17 = scalar_lea.vmem %s1453_s19, 256  ;;  %p1455_p5 = scmp.lt.s32.totalorder %s2075_s9, %s1453_s19 }
  0x7f   : > { %p1450_p1 = pnand %p1448_p8, %p2099_p3  ;;  %p1456_p7 = scmp.lt.s32.totalorder %s1454_s17, %s1447_s16 }
  0x81   : > { %p1451_p0 = pneg %p1450_p1  ;;  %p1457_p13 = por %p1456_p7, %p1455_p5 }
  0x83   : > { %p1458_p4 = pnand %p1457_p13, %p1451_p0 }
  0x85   : > { %1461 = shalt.err (!%p1458_p4)
}
  0x86   : > { %1224 = dma.hbm_to_vmem [thread:$0]  (!%p2081_p6), %s2073_s11, 128, %s2075_s9, %s2547_s15  }
  0x87   : > { %s2550_s20 = scalar_lea.sflag [#allocation7], %s2049_s6  ;;  %s1462_s18 = scalar_lea.hbm %s2089_s4, 128 }
  0x88   : > { %p1463_p5 = scmp.ne.s32.totalorder %s2089_s4, %s1462_s18  ;;  %s1467_s7 = scalar_lea.hbm %s2593_s1, 1024 }
  0x89   : > { %p1468_p11 = scmp.lt.u32.totalorder %s2089_s4, %s2593_s1  ;;  %p1469_p12 = scmp.lt.u32.totalorder %s1467_s7, %s1462_s18 }
  0x8a   : > { %p1465_p7 = pnand %p1463_p5, %p2099_p3  ;;  %p1471_p2 = scmp.lt.u32.totalorder %s1462_s18, %s2089_s4 }
  0x8b   : > { %p1470_p0 = por %p1469_p12, %p1468_p11 }
  0x8c   : > { %p1466_p9 = pneg %p1465_p7 }
  0x8d   : > { %p1472_p10 = por %p1471_p2, %p1470_p0 }
  0x8f   : > { %p1473_p8 = pnand %p1472_p10, %p1466_p9 }
  0x91   : > { %1476 = shalt.err (!%p1473_p8)
}
  0x92   : > { %s1477_s11 = scalar_lea.vmem %s380_s27, 128  ;;  %s1819_s9 = smov [#allocation6]  }
  0x93   : > { %p1478_p1 = scmp.ne.s32.totalorder %s380_s27, %s1477_s11  ;;  %s1482_s15 = sshll.u32 %s1819_s9, 4  ;;  %s1483_s15 = int_to_ptr.vmem [resolvable:$false] %s1482_s15 }
  0x94   : > { %s1484_s30 = scalar_lea.vmem %s1483_s15, 256  ;;  %p1485_p5 = scmp.lt.s32.totalorder %s380_s27, %s1483_s15 }
  0x95   : > { %p1480_p13 = pnand %p1478_p1, %p2099_p3  ;;  %p1486_p7 = scmp.lt.s32.totalorder %s1484_s30, %s1477_s11 }
  0x97   : > { %p1481_p4 = pneg %p1480_p13  ;;  %p1487_p6 = por %p1486_p7, %p1485_p5 }
  0x99   : > { %p1488_p11 = pnand %p1487_p6, %p1481_p4 }
  0x9b   : > { %1491 = shalt.err (!%p1488_p11)
}
  0x9c   : > { %p2595_p12 = scmp.ne.s32.totalorder %s2592_s8, 0  ;;  %s1119_s15 = sadd.s32 4294967294, %s1814_s22  }
  0x9d   : > { %s135_s18 = sadd.s32 1, %s1782_s14  ;;  %p142_p6 = scmp.ne.s32.totalorder %s1782_s14, %s1778_s13 }
  0x9e   : > { %1227 = dma.hbm_to_vmem [thread:$0]  (!%p2595_p12), %s2089_s4, 128, %s380_s27, %s2550_s20  }
  0x9f   : > { %p2596_p9 = scmp.eq.s32.totalorder %s2053_s24, 0  ;;  %p2598_p0 = scmp.eq.s32.totalorder %s1814_s22, 0 }
  0xa0   : > { %p148_p10 = scmp.ne.s32.totalorder %s1778_s13, %s1774_s12  ;;  %p287_p8 = scmp.eq.s32.totalorder %s1950_s25, 7 }
  0xa1   : > { %s2152_s16 = scalar_select %p2596_p9, %s1782_s14, %s135_s18  }
  0xa2   : > { %p144_p2 = por %p142_p6, %p2598_p0  ;;  %p293_p1 = scmp.eq.s32.totalorder %s1119_s15, 7 }
  0xa3   : > { %2597 = sst [smem:[#allocation42_spill]] %s2152_s16  ;;  %p2599_p13 = scmp.eq.s32.totalorder %s1950_s25, 0 }
  0xa4   : > { %p2165_p5 = por %p287_p8, %p142_p6  ;;  %p2169_p7 = por %p293_p1, %p148_p10 }
  0xa5   : > { %p2161_p4 = por %p148_p10, %p2599_p13  ;;  %s408_s24 = sand.u32 1, %s1782_s14  }
  0xa6   : > { %s2601_s4 = scalar_select %p2165_p5, 1, 0 }
  0xa7   : > { %s2600_s7 = scalar_select %p2161_p4, 1, 0 }
  0xa8   : > { %s2602_s27 = scalar_select %p2169_p7, 1, 0 }
  0xa9   : > { %s2551_s19 = sshll.u32 %s1810_s21, 7  ;;  %s2175_s17 = sshll.u32 %s408_s24, 3 }
  0xaa   : > { %2603 = sst [smem:[#allocation43_spill]] %s2602_s27  ;;  %s2604_s3 = sld [smem:[#allocation46_spill]] }
  0xab   : > { %p2605_p11 = scmp.lt.s32.totalorder %s1814_s22, 8  ;;  %s410_s18 = scalar_lea.vmem [#allocation9], %s2175_s17 }
  0xac   : > { %s417_s24 = sshll.u32 %s410_s18, 4  ;;  %s407_s20 = scalar_lea.sflag [#allocation10], %s2049_s6  ;;  %s2191_s24 = int_to_ptr.vmem [resolvable:$true] %s417_s24 }
  0xad   : > { %p2186_p6 = pnand %p2605_p11, %p144_p2 }
  0xaf   : > { %s2606_s15 = scalar_select %p2186_p6, 1, 0 }
  0xb0   : > { %s2182_s30 = scalar_lea.hbm %s2604_s3, %s2551_s19  ;;  %p2556_p0 = pneg %p2186_p6 }
  0xb1   : > { %s1492_s11 = scalar_lea.hbm %s2182_s30, 128  ;;  %s1497_s0 = scalar_lea.hbm %s2604_s3, 256 }
  0xb2   : > { %p1493_p9 = scmp.ne.s32.totalorder %s2182_s30, %s1492_s11  ;;  %p1498_p2 = scmp.lt.u32.totalorder %s2182_s30, %s2604_s3 }
  0xb3   : > { %p1499_p1 = scmp.lt.u32.totalorder %s1497_s0, %s1492_s11  ;;  %p1501_p11 = scmp.lt.u32.totalorder %s1492_s11, %s2182_s30 }
  0xb4   : > { %p1495_p10 = pnand %p2556_p0, %p1493_p9 }
  0xb5   : > { %p1500_p13 = por %p1499_p1, %p1498_p2 }
  0xb6   : > { %p1496_p8 = pneg %p1495_p10 }
  0xb7   : > { %p1502_p7 = por %p1501_p11, %p1500_p13 }
  0xb9   : > { %p1503_p5 = pnand %p1502_p7, %p1496_p8 }
  0xbb   : > { %1506 = shalt.err (!%p1503_p5)
}
  0xbc   : > { %s1507_s18 = scalar_lea.vmem %s2191_s24, 128  ;;  %s1820_s19 = smov [#allocation9]  }
  0xbd   : > { %p1508_p9 = scmp.ne.s32.totalorder %s2191_s24, %s1507_s18  ;;  %s1512_s9 = sshll.u32 %s1820_s19, 4  ;;  %s1513_s9 = int_to_ptr.vmem [resolvable:$false] %s1512_s9 }
  0xbe   : > { %s1514_s1 = scalar_lea.vmem %s1513_s9, 256  ;;  %p1515_p12 = scmp.lt.s32.totalorder %s2191_s24, %s1513_s9 }
  0xbf   : > { %p1510_p10 = pnand %p1508_p9, %p2556_p0  ;;  %p1516_p2 = scmp.lt.s32.totalorder %s1514_s1, %s1507_s18 }
  0xc1   : > { %p1511_p4 = pneg %p1510_p10  ;;  %p1517_p1 = por %p1516_p2, %p1515_p12 }
  0xc3   : > { %p1518_p13 = pnand %p1517_p1, %p1511_p4 }
  0xc5   : > { %1521 = shalt.err (!%p1518_p13)
}
  0xc6   : > { %1233 = dma.hbm_to_vmem [thread:$0]  (!%p2186_p6), %s2182_s30, 128, %s2191_s24, %s407_s20  }
  0xc7   : > { %s1821_s0 = smov [#allocation12]   ;;  %s2225_s9 = scalar_lea.hbm %s2517_s2, %s2066_s23 }
  0xc8   : > { %s313_s16 = sshll.u32 %s1821_s0, 4  ;;  %s1522_s3 = scalar_lea.hbm %s2520_s5, 16  ;;  %s314_s16 = int_to_ptr.vmem [resolvable:$true] %s313_s16 }
  0xc9   : > { %p1523_p12 = scmp.ne.s32.totalorder %s2520_s5, %s1522_s3  ;;  %p2607_p4 = scmp.ne.s32.totalorder %s2581_s26, 0 }
  0xca   : > { %p1529_p8 = scmp.lt.u32.totalorder %s1522_s3, %s2520_s5 }
  0xcb   : > { %p1525_p5 = pnand %p1523_p12, %p2607_p4 }
  0xcd   : > { %p1526_p7 = pneg %p1525_p5 }
  0xcf   : > { %p1531_p11 = pnand %p1529_p8, %p1526_p7 }
  0xd1   : > { %1534 = shalt.err (!%p1531_p11)
}
  0xd2   : > { %s1535_s0 = scalar_lea.vmem %s314_s16, 16  ;;  %s1542_s23 = scalar_lea.vmem %s314_s16, 32 }
  0xd3   : > { %p1536_p9 = scmp.ne.s32.totalorder %s314_s16, %s1535_s0  ;;  %p1543_p1 = scmp.lt.s32.totalorder %s314_s16, %s314_s16 }
  0xd4   : > { %p1544_p13 = scmp.lt.s32.totalorder %s1542_s23, %s1535_s0 }
  0xd5   : > { %p1538_p10 = pnand %p1536_p9, %p2607_p4 }
  0xd6   : > { %p1545_p0 = por %p1544_p13, %p1543_p1 }
  0xd7   : > { %p1539_p2 = pneg %p1538_p10 }
  0xd9   : > { %p1546_p6 = pnand %p1545_p0, %p1539_p2 }
  0xdb   : > { %1549 = shalt.err (!%p1546_p6)
}
  0xdc   : > { %p2608_p12 = scmp.ne.s32.totalorder %s2579_s29, 0  ;;  %s390_s3 = scalar_lea.vmem [#allocation8], %s2059_s10 }
  0xdd   : > { %s399_s26 = sshll.u32 %s390_s3, 4  ;;  %s1550_s11 = scalar_lea.hbm %s2225_s9, 128  ;;  %s400_s26 = int_to_ptr.vmem [resolvable:$true] %s399_s26 }
  0xde   : > { %1214 = dma.hbm_to_vmem [thread:$0]  (!%p2608_p12), %s2520_s5, 16, %s314_s16, [#allocation13]  }
  0xdf   : > { %p1551_p4 = scmp.ne.s32.totalorder %s2225_s9, %s1550_s11  ;;  %s1555_s18 = scalar_lea.hbm %s2517_s2, 1024 }
  0xe0   : > { %p1556_p5 = scmp.lt.u32.totalorder %s2225_s9, %s2517_s2  ;;  %p1557_p7 = scmp.lt.u32.totalorder %s1555_s18, %s1550_s11 }
  0xe1   : > { %p1553_p0 = pnand %p1551_p4, %p2099_p3  ;;  %p1559_p11 = scmp.lt.u32.totalorder %s1550_s11, %s2225_s9 }
  0xe2   : > { %p1558_p8 = por %p1557_p7, %p1556_p5 }
  0xe3   : > { %p1554_p6 = pneg %p1553_p0 }
  0xe4   : > { %p1560_p9 = por %p1559_p11, %p1558_p8 }
  0xe6   : > { %p1561_p10 = pnand %p1560_p9, %p1554_p6 }
  0xe8   : > { %1564 = shalt.err (!%p1561_p10)
}
  0xe9   : > { %s1565_s10 = scalar_lea.vmem %s400_s26, 128  ;;  %s1822_s16 = smov [#allocation8]  }
  0xea   : > { %p1566_p2 = scmp.ne.s32.totalorder %s400_s26, %s1565_s10  ;;  %s1570_s24 = sshll.u32 %s1822_s16, 4  ;;  %s1571_s24 = int_to_ptr.vmem [resolvable:$false] %s1570_s24 }
  0xeb   : > { %s1572_s0 = scalar_lea.vmem %s1571_s24, 256  ;;  %p1573_p12 = scmp.lt.s32.totalorder %s400_s26, %s1571_s24 }
  0xec   : > { %p1568_p1 = pnand %p1566_p2, %p2099_p3  ;;  %p1574_p4 = scmp.lt.s32.totalorder %s1572_s0, %s1565_s10 }
  0xee   : > { %p1569_p13 = pneg %p1568_p1  ;;  %p1575_p0 = por %p1574_p4, %p1573_p12 }
  0xf0   : > { %p1576_p5 = pnand %p1575_p0, %p1569_p13 }
  0xf2   : > { %1579 = shalt.err (!%p1576_p5)
}
  0xf3   : > { %p2609_p7 = scmp.ne.s32.totalorder %s2592_s8, 0  ;;  %s2610_s23 = scalar_lea.sflag [#allocation7], %s2049_s6 }
  0xf4   : > { %s2611_s14 = sld [smem:[#allocation29_spill]]  ;;  %s2612_s27 = sld [smem:[#allocation28_spill]] }
  0xf5   : > { %s2613_s28 = sld [smem:[#allocation38_spill]]  ;;  %s2614_s3 = sld [smem:[#allocation27_spill]] }
  0xf6   : > { %s2615_s11 = sld [smem:[#allocation35_spill]]  ;;  %p2617_p8 = scmp.eq.s32.totalorder %s1814_s22, 0 }
  0xf7   : > { %1230 = dma.hbm_to_vmem [thread:$0]  (!%p2609_p7), %s2225_s9, 128, %s400_s26, %s2610_s23  }
  0xf8   : > { %p2618_p10 = scmp.eq.s32.totalorder %s1950_s25, 0  ;;  %s2620_s24 = sld [smem:[#allocation47_spill]] }
  0xf9   : > { %p2621_p1 = scmp.lt.s32.totalorder %s1814_s22, 8 }
  0xfa   : > { %s161_s19 = sadd.s32 1, %s2611_s14  ;;  %p168_p3 = scmp.ne.s32.totalorder %s2611_s14, %s2612_s27 }
  0xfb   : > { %p2616_p6 = scmp.eq.s32.totalorder %s2613_s28, 0  ;;  %p174_p9 = scmp.ne.s32.totalorder %s2612_s27, %s2614_s3 }
  0xfc   : > { %p170_p11 = por %p168_p3, %p2617_p8  ;;  %s426_s29 = sand.u32 1, %s2611_s14  }
  0xfd   : > { %s2271_s8 = scalar_select %p2616_p6, %s2611_s14, %s161_s19  }
  0xfe   : > { %s1137_s18 = sshll.u32 %s2615_s11, 7  ;;  %p2281_p2 = por %p174_p9, %p2618_p10 }
  0xff   : > { %s1136_s30 = sshll.u32 %s426_s29, 3  ;;  %s2288_s9 = scalar_lea.hbm %s2620_s24, %s1137_s18 }
 0x100   : > { %s2619_s1 = scalar_select %p2281_p2, 1, 0 }
 0x101   : > { %s428_s26 = scalar_lea.vmem [#allocation11], %s1136_s30  ;;  %p2292_p13 = pnand %p2621_p1, %p170_p11 }
 0x102   : > { %s435_s0 = sshll.u32 %s428_s26, 4  ;;  %s2623_s14 = sshll.u32 %s1810_s21, 7  ;;  %s2296_s0 = int_to_ptr.vmem [resolvable:$true] %s435_s0 }
 0x103   : > { %s2624_s3 = sld [smem:[#allocation48_spill]]  ;;  %s1580_s19 = scalar_lea.hbm %s2288_s9, 128 }
 0x104   : > { %p1581_p12 = scmp.ne.s32.totalorder %s2288_s9, %s1580_s19  ;;  %p1582_p4 = pneg %p2292_p13 }
 0x105   : > { %s1585_s30 = scalar_lea.hbm %s2620_s24, 512  ;;  %p1586_p7 = scmp.lt.u32.totalorder %s2288_s9, %s2620_s24 }
 0x106   : > { %p1583_p0 = pnand %p1582_p4, %p1581_p12  ;;  %p1587_p3 = scmp.lt.u32.totalorder %s1585_s30, %s1580_s19 }
 0x107   : > { %p1589_p8 = scmp.lt.u32.totalorder %s1580_s19, %s2288_s9 }
 0x108   : > { %p1584_p5 = pneg %p1583_p0  ;;  %p1588_p6 = por %p1587_p3, %p1586_p7 }
 0x109   : > { %s2303_s11 = scalar_lea.hbm %s2624_s3, %s2623_s14 }
 0x10a   : > { %p1590_p11 = por %p1589_p8, %p1588_p6 }
 0x10c   : > { %p1591_p9 = pnand %p1590_p11, %p1584_p5 }
 0x10e   : > { %1594 = shalt.err (!%p1591_p9)
}
 0x10f   : > { %s1595_s26 = scalar_lea.vmem %s2296_s0, 128  ;;  %s1823_s14 = smov [#allocation11]  }
 0x110   : > { %p1596_p10 = scmp.ne.s32.totalorder %s2296_s0, %s1595_s26  ;;  %s1600_s27 = sshll.u32 %s1823_s14, 4  ;;  %s1601_s27 = int_to_ptr.vmem [resolvable:$false] %s1600_s27 }
 0x111   : > { %s1602_s28 = scalar_lea.vmem %s1601_s27, 256  ;;  %p1603_p0 = scmp.lt.s32.totalorder %s2296_s0, %s1601_s27 }
 0x112   : > { %p1598_p1 = pnand %p1596_p10, %p1582_p4  ;;  %p1604_p7 = scmp.lt.s32.totalorder %s1602_s28, %s1595_s26 }
 0x114   : > { %p1599_p12 = pneg %p1598_p1  ;;  %p1605_p3 = por %p1604_p7, %p1603_p0 }
 0x116   : > { %p1606_p6 = pnand %p1605_p3, %p1599_p12 }
 0x118   : > { %1609 = shalt.err (!%p1606_p6)
}
 0x119   : > { %1236 = dma.hbm_to_vmem [thread:$0]  (!%p2292_p13), %s2288_s9, 128, %s2296_s0, %s407_s20  }
 0x11a   : > { %s446_s19 = scalar_lea.vmem [#allocation14], %s2175_s17  ;;  %s1610_s18 = scalar_lea.hbm %s2303_s11, 128 }
 0x11b   : > { %s453_s29 = sshll.u32 %s446_s19, 4  ;;  %p1611_p4 = scmp.ne.s32.totalorder %s2303_s11, %s1610_s18  ;;  %s454_s29 = int_to_ptr.vmem [resolvable:$true] %s453_s29 }
 0x11c   : > { %p2625_p5 = scmp.ne.s32.totalorder %s2606_s15, 0  ;;  %s1615_s10 = scalar_lea.hbm %s2624_s3, 256 }
 0x11d   : > { %p1616_p10 = scmp.lt.u32.totalorder %s2303_s11, %s2624_s3  ;;  %p1617_p1 = scmp.lt.u32.totalorder %s1615_s10, %s1610_s18 }
 0x11e   : > { %p2626_p8 = pneg %p2625_p5  ;;  %p1619_p13 = scmp.lt.u32.totalorder %s1610_s18, %s2303_s11 }
 0x11f   : > { %p1618_p12 = por %p1617_p1, %p1616_p10 }
 0x120   : > { %p1613_p11 = pnand %p1611_p4, %p2626_p8 }
 0x121   : > { %p1620_p0 = por %p1619_p13, %p1618_p12 }
 0x122   : > { %p1614_p9 = pneg %p1613_p11 }
 0x124   : > { %p1621_p7 = pnand %p1620_p0, %p1614_p9 }
 0x126   : > { %1624 = shalt.err (!%p1621_p7)
}
 0x127   : > { %s1625_s20 = scalar_lea.vmem %s454_s29, 128  ;;  %p2627_p6 = pmov %p2626_p8 }
 0x128   : > { %p1626_p3 = scmp.ne.s32.totalorder %s454_s29, %s1625_s20  ;;  %s1824_s17 = smov [#allocation14]  }
 0x129   : > { %s1630_s9 = sshll.u32 %s1824_s17, 4  ;;  %s1631_s9 = int_to_ptr.vmem [resolvable:$false] %s1630_s9 }
 0x12a   : > { %p1628_p4 = pnand %p1626_p3, %p2627_p6  ;;  %s1632_s0 = scalar_lea.vmem %s1631_s9, 256 }
 0x12b   : > { %p1633_p11 = scmp.lt.s32.totalorder %s454_s29, %s1631_s9  ;;  %p1634_p2 = scmp.lt.s32.totalorder %s1632_s0, %s1625_s20 }
 0x12c   : > { %p1629_p8 = pneg %p1628_p4 }
 0x12d   : > { %p1635_p1 = por %p1634_p2, %p1633_p11 }
 0x12f   : > { %p1636_p10 = pnand %p1635_p1, %p1629_p8 }
 0x131   : > { %1639 = shalt.err (!%p1636_p10)
}
 0x132   : > { %s2628_s14 = scalar_lea.sflag [#allocation4], %s2049_s6  ;;  %s2629_s27 = sld [smem:[#allocation36_spill]] }
 0x133   : > { %1239 = dma.hbm_to_vmem [thread:$0]  (!%p2625_p5), %s2303_s11, 128, %s454_s29, %s2628_s14  }
 0x138   : > { %p2630_p9 = scmp.ne.s32.totalorder %s2629_s27, 0 }
 0x139   : > { %s2631_s28 = sld [smem:[#allocation31_spill]] (!%p2630_p9)  ;;  %s2632_s19 = sld [smem:[#allocation40_spill]] (!%p2630_p9) }
 0x13a   : > { %462 = sbr.rel (%p2630_p9) target bundleno = 1678 (0x68e), region = 56  ;;  %s464_s18 = sand.u32 (!%p2630_p9), 1, %s1950_s25  }
 0x13b   : > { %s465_s10 = scalar_lea.sflag (!%p2630_p9), [#allocation4], %s464_s18 }
 0x13f   : > { %s466_s23 = sand.u32 (!%p2630_p9), 1, %s2631_s28   ;;  %p2633_p2 = scmp.ne.s32.totalorder (!%p2630_p9), %s2632_s19, 0 }
 0x140   : > { %s2358_s30 = sshll.u32 (!%p2630_p9), %s466_s23, 3 }
 0x141   : > { %s468_s16 = scalar_lea.vmem [#allocation3], %s2358_s30 }
 0x142   : > { %1725 = dma.done.wait (%p2633_p2), %s465_s10, 128  }
 0x143   : > { %1727 = vsyncadd (%p2633_p2), %s465_s10, 4294967168  ;;  %s474_s6 = scalar_lea.sflag [#allocation7], %s464_s18  ;;  %s477_s15 = scalar_lea.vmem [#allocation6], %s2358_s30 }
 0x144   : > { %1729 = dma.done.wait (%p2633_p2), %s474_s6, 256  }
 0x145   : > { %1731 = vsyncadd (%p2633_p2), %s474_s6, 4294967040  ;;  %s493_s11 = sand.u32 1, %s1778_s13   ;;  %s486_s26 = scalar_lea.vmem [#allocation8], %s2358_s30 }
 0x146   : > { %s2373_s29 = sshll.u32 %s493_s11, 3  ;;  %s492_s20 = scalar_lea.sflag [#allocation10], %s464_s18 }
 0x147   : > { %s495_s17 = scalar_lea.vmem [#allocation9], %s2373_s29  ;;  %p2634_p5 = scmp.ne.s32.totalorder %s2600_s7, 0 }
 0x149   : > { %1733 = dma.done.wait (%p2634_p5), %s492_s20, 128  }
 0x14a   : > { %1735 = vsyncadd (%p2634_p5), %s492_s20, 4294967168  ;;  %s2635_s9 = sld [smem:[#allocation28_spill]]  ;;  %p2636_p12 = scmp.ne.s32.totalorder %s2619_s1, 0 }
 0x150   : > { %s502_s0 = sand.u32 1, %s2635_s9  }
 0x151   : > { %s2382_s14 = sshll.u32 %s502_s0, 3 }
 0x152   : > { %s504_s27 = scalar_lea.vmem [#allocation11], %s2382_s14 }
 0x153   : > { %1737 = dma.done.wait (%p2636_p12), %s492_s20, 128  }
 0x154   : > { %1739 = vsyncadd (%p2636_p12), %s492_s20, 4294967168  ;;  %p2637_p13 = scmp.eq.s32.totalorder %s1950_s25, 0 }
 0x156   : > { %1741 = dma.done.wait (%p2637_p13), [#allocation13], 16   ;;  %p2638_p0 = pmov %p2637_p13 }
 0x157   : > { %s517_s28 = scalar_lea.vmem [#allocation14], %s2373_s29 }
 0x158   : > { %1743 = vsyncadd (%p2638_p0), [#allocation13], 4294967280 }
 0x159   : > { %1745 = dma.done.wait (%p2634_p5), %s465_s10, 128  }
 0x15a   : > { %1747 = vsyncadd (%p2634_p5), %s465_s10, 4294967168  ;;  %p2639_p7 = pmov %p2638_p0 }
 0x15b   : > { %p2640_p3 = pmov %p2638_p0 }
 0x15c   : > { %1749 = dma.done.wait (%p2639_p7), [#allocation7], 16  }
 0x15d   : > { %1751 = vsyncadd (%p2640_p3), [#allocation7], 4294967280  ;;  %p2641_p6 = pmov %p2638_p0 }
 0x15e   : > { %p2642_p4 = pmov %p2638_p0 }
 0x15f   : > { %1753 = dma.done.wait (%p2641_p6), [#allocation10], 16  }
 0x160   : > { %1755 = vsyncadd (%p2642_p4), [#allocation10], 4294967280  ;;  %s584_s1 = scalar_lea.vmem [#allocation17], %s2373_s29  ;;  %s2643_s19 = sld [smem:[#allocation33_spill]] }
 0x166   : > { %p1151_p8 = scmp.ne.s32.totalorder %s2643_s19, 0 }
 0x167   : > { %vm589_vm0 = vcmask (!%p1151_p8), 261120   ;;  %v1825_v0 = vmov (!%p1151_p8), 0.0  }
 0x168   : > { %588 = sbr.rel (%p1151_p8) target bundleno = 367 (0x16f), region = 96  ;;  %590 = vst.msk [vmem:[#allocation2] sm:$0xff] (!%p1151_p8), %vm589_vm0, %v1825_v0 }
 0x16f PF: > { %v592_v1 = vld [vmem:[%s477_s15] sm:$0xff]  ;;  %vm595_vm1 = vcmask 64512   ;;  %v591_v2 = vld [vmem:[%s468_s16] sm:$0xff]  ;;  %v1826_v3 = vmov 0.0   ;;  %vm1827_vm2 = vmmov 0   ;;  %vm835_vm4 = vcmask 261120  }
 0x170   : > { %1170 = vmatprep.subr.mxu0 %v1826_v3  ;;  %1172 = vmatprep.mubr.msk.f32.mxu0 %vm1827_vm2, %v1826_v3  ;;  %v594_v4 = vmul.f32 0.35355338, %v591_v2  ;;  %v672_v5 = vld [vmem:[%s495_s17] sm:$0xff]  ;;  %v593_v15 = vld [vmem:[%s486_s26] sm:$0xff]  ;;  %s2644_s25 = sld [smem:[#allocation33_spill]] }
 0x171   : > { %1171 = vmatpush3.xpose.msk.msra.mxu0 %vm595_vm1, %v592_v1  ;;  %1175 = vmatprep.subr.mxu1 %v1826_v3  ;;  %vm673_vm3 = vcmp.eq.s32.totalorder %v672_v5, 0  ;;  %v760_v19 = vld [vmem:[%s504_s27] sm:$0xff]  ;;  %v759_v22 = vld [vmem:[#allocation2] sm:$0xff] }
 0x172   : > { %1177 = vmatprep.mubr.msk.f32.mxu1 %vm1827_vm2, %v1826_v3  ;;  %1176 = vmatpush3.msra.mxu1 %v593_v15 }
 0x173   : > { %1180 = vmatprep.subr.mxu1 %v1826_v3 }
 0x174   : > { %1173 = vmatmul.mubr.msk.f32.vlgmr.msra.gmra.mrb[0].mxu0 %vm595_vm1, %v594_v4 }
 0x176   : > { %p1156_p11 = scmp.ne.s32.totalorder %s2644_s25, 3 }
 0x177   : > { %v1157_v27 = vld [vmem:[#allocation12] ss:$0 sm:$0xff] (!%p1156_p11)  ;;  %v850_v28 = vld [vmem:[%s517_s28] sm:$0xff] (!%p1156_p11)  ;;  %v1158_v41 = vld [vmem:[#allocation15] ss:$0 sm:$0xff] (!%p1156_p11) }
 0x178   : > { %v1159_v43 = vld [vmem:[#allocation16] ss:$0 sm:$0xff] (!%p1156_p11) }
 0x247   : > { %v668_v6 = vpop.f32.mrb[0].mxu0 }
 0x248   : > { %v674_v7 = vsel %vm673_vm3, -3.4028235e+38, %v668_v6  ;;  %v1174_v8 = vpop.f32.mrb[1].mxu0 }
 0x249   : > { %v675_v9 = vsel %vm595_vm1, %v674_v7, -inf }
 0x24a   : > { %676 = vmax.xlane.f32.xlu0 %v675_v9 }
 0x2d7   : > { %v677_v10 = vpop.xlane.xlu0 %676 }
 0x2d8   : > { %v678_v11 = vsub.f32 %v674_v7, %v677_v10 }
 0x2da   : > { %v679_v12 = vmul.f32 1.442695, %v678_v11 }
 0x2dc   : > { %1370 = vpow2.f32 %v679_v12 }
 0x2e6   : > { %v1371_v13 = vpop.eup %1370 }
 0x2e7   : > { %v681_v14 = vsel %vm595_vm1, %v1371_v13, 0.0 }
 0x2e8   : > { %682 = vadd.xlane.f32.xlu0 %v681_v14 }
 0x375   : > { %v683_v16 = vpop.xlane.xlu0 %682 }
 0x376   : > { %1372 = vrcp.f32 %v683_v16 }
 0x380   : > { %v1373_v17 = vpop.eup %1372 }
 0x381   : > { %v685_v18 = vmul.f32 %v1373_v17, %v1371_v13 }
 0x383   : > { %1178 = vmatmul.mubr.msk.f32.vlgmr.msra.gmra.mrb[0].mxu1 %vm595_vm1, %v685_v18 }
 0x384   : > { %1181 = vmatpush3.msra.mxu1 %v760_v19  ;;  %1182 = vmatprep.mubr.msk.f32.mxu1 %vm1827_vm2, %v1826_v3 }
 0x456   : > { %v755_v20 = vpop.f32.mrb[0].mxu1 }
 0x457   : > { %v1179_v21 = vpop.f32.mrb[1].mxu1  ;;  %1183 = vmatmul.mubr.msk.f32.vlgmr.msra.gmra.mrb[2].mxu1 %vm595_vm1, %v755_v20 }
 0x527   : > { %840 = sbr.rel (%p1156_p11) target bundleno = 1651 (0x673), region = 100 }
 0x52a   : > { %v830_v23 = vpop.f32.mrb[2].mxu1 }
 0x52b   : > { %v834_v24 = vadd.f32 %v830_v23, %v759_v22  ;;  %v1184_v25 = vpop.f32.mrb[3].mxu1 }
 0x52d   : > { %836 = vst.msk [vmem:[#allocation2] sm:$0xff] %vm835_vm4, %v834_v24 }
 0x534   : > { %v841_v26 = vld [vmem:[#allocation2] sm:$0xff] }
 0x535   : > { %v849_v29 = vadd.f32 %v1157_v27, %v841_v26 }
 0x537   : > { %v851_v30 = vadd.f32 %v850_v28, %v849_v29 }
 0x539   : > { %v852_v31 = vsel %vm835_vm4, %v851_v30, 0.0 }
 0x53a   : > { %853 = vadd.xlane.f32.xlu0 %v852_v31 }
 0x5c7   : > { %v854_v32 = vpop.xlane.xlu0 %853 }
 0x5c8   : > { %v856_v33 = vmul.f32 0.03125, %v854_v32 }
 0x5ca   : > { %v857_v34 = vsub.f32 %v851_v30, %v856_v33 }
 0x5cc   : > { %v858_v35 = vmul.f32 %v857_v34, %v857_v34 }
 0x5ce   : > { %v859_v36 = vsel %vm835_vm4, %v858_v35, 0.0 }
 0x5cf   : > { %860 = vadd.xlane.f32.xlu0 %v859_v36 }
 0x65c   : > { %v861_v37 = vpop.xlane.xlu0 %860 }
 0x65d   : > { %v862_v38 = vmul.f32 0.03125, %v861_v37 }
 0x65f   : > { %v863_v39 = vadd.f32 1e-05, %v862_v38 }
 0x661   : > { %1374 = vrsqrt.f32 %v863_v39 }
 0x66b   : > { %v1375_v40 = vpop.eup %1374 }
 0x66c   : > { %v865_v42 = vmul.f32 %v1375_v40, %v857_v34 }
 0x66e   : > { %v873_v44 = vmul.f32 %v1158_v41, %v865_v42 }
 0x670   : > { %v881_v45 = vadd.f32 %v1159_v43, %v873_v44 }
 0x672   : > { %882 = vst.msk [vmem:[%s584_s1] sm:$0xff] %vm835_vm4, %v881_v45 }
 0x673 PF: > { %s2645_s7 = sld [smem:[#allocation34_spill]]  ;;  %s2646_s10 = sld [smem:[#allocation51_spill]] }
 0x674   : > { %s897_s15 = sshll.u32 %s584_s1, 4  ;;  %s884_s26 = scalar_lea.sflag [#allocation5], %s493_s11  ;;  %s898_s15 = int_to_ptr.vmem [resolvable:$true] %s897_s15 }
 0x675   : > { %s1640_s20 = scalar_lea.vmem %s898_s15, 128  ;;  %p2648_p10 = scmp.ne.s32.totalorder %s2601_s4, 0 }
 0x676   : > { %p1641_p1 = scmp.ne.s32.totalorder %s898_s15, %s1640_s20  ;;  %s1828_s17 = smov [#allocation17]  }
 0x677   : > { %s1644_s9 = sshll.u32 %s1828_s17, 4  ;;  %s1645_s9 = int_to_ptr.vmem [resolvable:$false] %s1644_s9 }
 0x678   : > { %p1642_p9 = pnand %p1641_p1, %p2648_p10  ;;  %s1646_s0 = scalar_lea.vmem %s1645_s9, 256 }
 0x679   : > { %s1161_s18 = sshll.u32 %s2645_s7, 7  ;;  %s2647_s6 = smov %s2646_s10 }
 0x67a   : > { %s2440_s16 = scalar_lea.hbm %s2646_s10, %s1161_s18  ;;  %p1643_p2 = pneg %p1642_p9 }
 0x67b   : > { %p1647_p5 = scmp.lt.s32.totalorder %s898_s15, %s1645_s9  ;;  %p1648_p12 = scmp.lt.s32.totalorder %s1646_s0, %s1640_s20 }
 0x67d   : > { %p1649_p13 = por %p1648_p12, %p1647_p5 }
 0x67f   : > { %p1650_p0 = pnand %p1649_p13, %p1643_p2 }
 0x681   : > { %1653 = shalt.err (!%p1650_p0)
}
 0x682   : > { %s1654_s11 = scalar_lea.hbm %s2440_s16, 128  ;;  %s1658_s27 = scalar_lea.hbm %s2647_s6, 256 }
 0x683   : > { %p1655_p7 = scmp.ne.s32.totalorder %s2440_s16, %s1654_s11  ;;  %p1659_p4 = scmp.lt.u32.totalorder %s2440_s16, %s2647_s6 }
 0x684   : > { %p1660_p8 = scmp.lt.u32.totalorder %s1658_s27, %s1654_s11  ;;  %p1662_p1 = scmp.lt.u32.totalorder %s1654_s11, %s2440_s16 }
 0x685   : > { %p1656_p3 = pnand %p1655_p7, %p2648_p10 }
 0x686   : > { %p1661_p11 = por %p1660_p8, %p1659_p4 }
 0x687   : > { %p1657_p6 = pneg %p1656_p3 }
 0x688   : > { %p1663_p9 = por %p1662_p1, %p1661_p11 }
 0x68a   : > { %p1664_p2 = pnand %p1663_p9, %p1657_p6 }
 0x68c   : > { %1667 = shalt.err (!%p1664_p2)
}
 0x68d   : > { %1209 = dma.vmem_to_hbm [thread:$0]  (%p2648_p10), %s898_s15, 128, %s2440_s16, %s884_s26  }
 0x68e PF: > { %s2649_s19 = sld [smem:[#allocation43_spill]]  ;;  %p1251_p5 = scmp.ge.s32.totalorder %s1814_s22, 2 }
 0x68f   : > { %s909_s25 = sand.u32 1, %s1774_s12  }
 0x690   : > { %s910_s7 = scalar_lea.sflag [#allocation5], %s909_s25 }
 0x694   : > { %p2650_p12 = scmp.ne.s32.totalorder %s2649_s19, 0 }
 0x696   : > { %p1241_p13 = pnand %p1251_p5, %p2650_p12 }
 0x698   : > { %1757 = dma.done.wait (!%p1241_p13), %s910_s7, 128  }
 0x699   : > { %1759 = vsyncadd (!%p1241_p13), %s910_s7, 4294967168  ;;  %s32_s22 = sadd.s32 1, %s1814_s22   ;;  %s2652_s30 = sld [smem:[#allocation28_spill]] }
 0x69a   : > { %p2468_p0 = scmp.ge.s32.totalorder %s32_s22, 10   ;;  %s2653_s10 = sld [smem:[#allocation29_spill]] }
 0x69b   : > { %s2654_s4 = sld [smem:[#allocation30_spill]]  ;;  %s2655_s14 = sld [smem:[#allocation42_spill]] }
 0x69c   : > { %s2656_s15 = sld [smem:[#allocation31_spill]]  ;;  %s2657_s16 = sld [smem:[#allocation32_spill]] }
 0x69d   : > { %s2658_s17 = sld [smem:[#allocation41_spill]]  ;;  %s2659_s23 = sld [smem:[#allocation35_spill]] }
 0x69e   : > { %s2660_s20 = sld [smem:[#allocation37_spill]]  ;;  %s2661_s26 = sld [smem:[#allocation39_spill]] }
 0x69f   : > { %s2663_s11 = smov %s2271_s8  ;;  %s2664_s12 = smov %s1778_s13 }
 0x6a0   : > { %s2667_s19 = smov %s1810_s21  ;;  %31 = sbr.rel (!%p2468_p0) target bundleno = 24 (0x18), region = 180 }
 0x6a1   : > { %s2665_s13 = smov %s2654_s4 }
 0x6a3   : > { %s2666_s18 = smov %s2659_s23 }
 0x6a4   : > { %s2668_s21 = smov %s2661_s26 }
 0x6a7   :  { %915 = vsyncpa [#allocation4], 1 }
 0x6a8   :  { %917 = vsyncpa [#allocation4 + $0x1], 1 }
 0x6a9   :  { %918 = vsyncpa [#allocation7], 1 }
 0x6aa   :  { %920 = vsyncpa [#allocation7 + $0x1], 1 }
 0x6ab   :  { %921 = vsyncpa [#allocation10], 1 }
 0x6ac   :  { %923 = vsyncpa [#allocation10 + $0x1], 1 }
 0x6ad   :  { %924 = vsyncpa [#allocation13], 1 }
 0x6ae   :  { %925 = vsyncpa [#allocation5], 1 }
 0x6af   :  { %927 = vsyncpa [#allocation5 + $0x1], 1 }

// kernel: decoder_layer.10
= control target key start
LH: loop header
LB: loop body
LE: loop exit
PB: predicated region body
PF: predicated region fallthrough
CT: control target
= control target key end

     0   :  { %s2350_s0 = inlined_call_operand.hbm [shape: f32[2,4,8,8], index: 0, kind: input, shape index: {}]   ;;  %s2351_s1 = inlined_call_operand.hbm [shape: f32[2,4,8,8], index: 1, kind: input, shape index: {}]   ;;  %s2352_s2 = inlined_call_operand.hbm [shape: f32[2,4,8,8], index: 2, kind: input, shape index: {}]   ;;  %s2353_s3 = inlined_call_operand.hbm [shape: f32[4,8,32], index: 3, kind: input, shape index: {}]   ;;  %s2354_s4 = inlined_call_operand.hbm [shape: f32[1,32], index: 4, kind: input, shape index: {}]   ;;  %s2355_s5 = inlined_call_operand.hbm [shape: f32[2,8,32], index: 5, kind: input, shape index: {}]   ;;  %s2356_s6 = inlined_call_operand.hbm [shape: f32[1,32], index: 6, kind: input, shape index: {}]   ;;  %s2357_s7 = inlined_call_operand.hbm [shape: f32[1,32], index: 7, kind: input, shape index: {}]   ;;  %s2358_s8 = inlined_call_operand.hbm [shape: f32[2,8,32], index: 8, kind: output, shape index: {}]  }
   0x1   :  { %2385 = sst [smem:[#allocation39_spill]] %s2351_s1 }
   0x2   :  { %2386 = sst [smem:[#allocation40_spill]] %s2354_s4 }
   0x3   :  { %2387 = sst [smem:[#allocation41_spill]] %s2355_s5 }
   0x4   :  { %2388 = sst [smem:[#allocation42_spill]] %s2356_s6 }
   0x5   :  { %2389 = sst [smem:[#allocation43_spill]] %s2358_s8 }
   0x6   :  { %13 = vsyncpa [#allocation4], 0 }
   0x7   :  { %15 = vsyncpa [#allocation4 + $0x1], 0 }
   0x8   :  { %16 = vsyncpa [#allocation7], 0 }
   0x9   :  { %18 = vsyncpa [#allocation7 + $0x1], 0 }
   0xa   :  { %19 = vsyncpa [#allocation10], 0 }
   0xb   :  { %21 = vsyncpa [#allocation10 + $0x1], 0 }
   0xc   :  { %22 = vsyncpa [#allocation13], 0 }
   0xd   :  { %24 = vsyncpa [#allocation13 + $0x1], 0 }
   0xe   :  { %25 = vsyncpa [#allocation16], 0 }
   0xf   :  { %26 = vsyncpa [#allocation5], 0 }
  0x10   :  { %28 = vsyncpa [#allocation5 + $0x1], 0  ;;  %s1753_s27 = smov 0   ;;  %s1755_s28 = smov 0  }
  0x11   :  { %s1757_s29 = smov 0   ;;  %s1759_s30 = smov 0  }
  0x12   :  { %s1761_s9 = smov 0   ;;  %s1763_s10 = smov 0  }
  0x13   :  { %s1765_s11 = smov 0   ;;  %s1767_s12 = smov 0  }
  0x14   :  { %s1769_s13 = smov 0   ;;  %s1771_s14 = smov 0  }
  0x15   :  { %s1773_s15 = smov 0   ;;  %s1775_s16 = smov 0  }
  0x16   :  { %s1777_s17 = smov 0   ;;  %s1779_s18 = smov 0  }
  0x17 LB: > { %2390 = sst [smem:[#allocation26_spill]] %s1642_s27  ;;  %s1824_s19 = sadd.s32 4294967295, %s1694_s18   ;;  %s1694_s18 = sphi %s1779_s18, %s34_s18   ;;  %s1690_s17 = sphi %s1777_s17, %s2467_s17   ;;  %s1686_s16 = sphi %s1775_s16, %s2477_s16   ;;  %s1682_s15 = sphi %s1773_s15, %s2476_s15   ;;  %s1678_s14 = sphi %s1771_s14, %s2475_s14   ;;  %s1674_s13 = sphi %s1769_s13, %s2474_s13   ;;  %s1670_s12 = sphi %s1767_s12, %s2473_s12   ;;  %s1666_s11 = sphi %s1765_s11, %s2463_s11   ;;  %s1662_s10 = sphi %s1763_s10, %s2472_s10   ;;  %s1658_s9 = sphi %s1761_s9, %s2471_s9   ;;  %s1654_s30 = sphi %s1759_s30, %s2470_s30   ;;  %s1650_s29 = sphi %s1757_s29, %s2469_s29   ;;  %s1646_s28 = sphi %s1755_s28, %s2462_s28   ;;  %s1642_s27 = sphi %s1753_s27, %s2461_s27  }
  0x18   : > { %2391 = sst [smem:[#allocation27_spill]] %s1646_s28  ;;  %p1042_p0 = scmp.ge.s32.totalorder %s1694_s18, 1 }
  0x19   : > { %2392 = sst [smem:[#allocation28_spill]] %s1650_s29  ;;  %p2362_p1 = scmp.eq.s32.totalorder %s1824_s19, 0 }
  0x1a   : > { %2393 = sst [smem:[#allocation29_spill]] %s1670_s12  ;;  %p276_p2 = scmp.lt.s32.totalorder %s1694_s18, 9 }
  0x1b   : > { %2394 = sst [smem:[#allocation30_spill]] %s1678_s14  ;;  %s1696_s21 = smov [#allocation11]  }
  0x1c   : > { %2395 = sst [smem:[#allocation31_spill]] %s1682_s15  ;;  %p1829_p3 = pnand %p1042_p0, %p276_p2 }
  0x1d   : > { %2396 = sst [smem:[#allocation32_spill]] %s1690_s17  ;;  %s289_s22 = sshll.u32 %s1696_s21, 4  ;;  %s290_s22 = int_to_ptr.vmem [resolvable:$true] %s289_s22 }
  0x1e   : > { %s2397_s20 = scalar_select %p1829_p3, 1, 0 }
  0x1f   : > { %p1128_p4 = pneg %p1829_p3  ;;  %s1697_s23 = smov [#allocation14]  }
  0x20   : > { %2398 = sst [smem:[#allocation33_spill]] %s2397_s20  ;;  %s300_s24 = sshll.u32 %s1697_s23, 4  ;;  %s1841_s24 = int_to_ptr.vmem [resolvable:$true] %s300_s24 }
  0x21   : > { %p1837_p5 = pnand %p1128_p4, %p2362_p1  ;;  %s2400_s4 = sld [smem:[#allocation40_spill]] }
  0x23   : > { %s2399_s25 = scalar_select %p1837_p5, 1, 0 }
  0x24   : > { %p1851_p7 = pneg %p1837_p5 }
  0x26   : > { %s2401_s21 = scalar_select %p1851_p7, 1, 0 }
  0x27   : > { %s1290_s15 = scalar_lea.hbm %s2400_s4, 16 }
  0x28   : > { %p1291_p6 = scmp.ne.s32.totalorder %s2400_s4, %s1290_s15  ;;  %p1297_p10 = scmp.lt.u32.totalorder %s1290_s15, %s2400_s4 }
  0x2a   : > { %p1293_p8 = pnand %p1851_p7, %p1291_p6 }
  0x2c   : > { %p1294_p9 = pneg %p1293_p8 }
  0x2e   : > { %p1299_p11 = pnand %p1297_p10, %p1294_p9 }
  0x30   : > { %1302 = shalt.err (!%p1299_p11)
}
  0x31   : > { %s1303_s8 = scalar_lea.vmem %s290_s22, 16  ;;  %s1310_s5 = scalar_lea.vmem %s290_s22, 32 }
  0x32   : > { %p1304_p12 = scmp.ne.s32.totalorder %s290_s22, %s1303_s8  ;;  %p1311_p2 = scmp.lt.s32.totalorder %s290_s22, %s290_s22 }
  0x33   : > { %p1312_p4 = scmp.lt.s32.totalorder %s1310_s5, %s1303_s8 }
  0x34   : > { %p1306_p13 = pnand %p1304_p12, %p1851_p7 }
  0x35   : > { %p1313_p1 = por %p1312_p4, %p1311_p2 }
  0x36   : > { %p1307_p0 = pneg %p1306_p13 }
  0x38   : > { %p1314_p3 = pnand %p1313_p1, %p1307_p0 }
  0x3a   : > { %1317 = shalt.err (!%p1314_p3)
}
  0x3b   : > { %1131 = dma.hbm_to_vmem [thread:$0]  (!%p1837_p5), %s2400_s4, 16, %s290_s22, [#allocation10]  }
  0x3c   : > { %s2402_s6 = sld [smem:[#allocation42_spill]] }
  0x42   : > { %s1318_s23 = scalar_lea.hbm %s2402_s6, 16 }
  0x43   : > { %p1319_p6 = scmp.ne.s32.totalorder %s2402_s6, %s1318_s23  ;;  %p1325_p1 = scmp.lt.u32.totalorder %s1318_s23, %s2402_s6 }
  0x45   : > { %p1321_p8 = pnand %p1319_p6, %p1851_p7 }
  0x47   : > { %p1322_p9 = pneg %p1321_p8 }
  0x49   : > { %p1327_p3 = pnand %p1325_p1, %p1322_p9 }
  0x4b   : > { %1330 = shalt.err (!%p1327_p3)
}
  0x4c   : > { %s1331_s22 = scalar_lea.vmem %s1841_s24, 16  ;;  %s1338_s27 = scalar_lea.vmem %s1841_s24, 32 }
  0x4d   : > { %p1332_p10 = scmp.ne.s32.totalorder %s1841_s24, %s1331_s22  ;;  %p1339_p13 = scmp.lt.s32.totalorder %s1841_s24, %s1841_s24 }
  0x4e   : > { %p1340_p0 = scmp.lt.s32.totalorder %s1338_s27, %s1331_s22 }
  0x4f   : > { %p1334_p11 = pnand %p1332_p10, %p1851_p7 }
  0x50   : > { %p1341_p2 = por %p1340_p0, %p1339_p13 }
  0x51   : > { %p1335_p12 = pneg %p1334_p11 }
  0x53   : > { %p1342_p4 = pnand %p1341_p2, %p1335_p12 }
  0x55   : > { %1345 = shalt.err (!%p1342_p4)
}
  0x56   : > { %1134 = dma.hbm_to_vmem [thread:$0]  (!%p1837_p5), %s2402_s6, 16, %s1841_s24, [#allocation13]  }
  0x57   : > { %s43_s26 = sadd.s32 1, %s1686_s16  ;;  %s46_s15 = sadd.s32 1, %s1690_s17 }
  0x58   : > { %p44_p6 = scmp.ge.s32.totalorder %s43_s26, 4  ;;  %s55_s20 = sadd.s32 1, %s1674_s13 }
  0x59   : > { %p62_p8 = scmp.ne.s32.totalorder %s1674_s13, %s1670_s12  ;;  %p2376_p9 = scmp.eq.s32.totalorder %s1694_s18, 0 }
  0x5a   : > { %s2479_s26 = smov (%p44_p6, %s43_s26), 0  ;;  %s2481_s15 = smov (!%p44_p6, %s46_s15), %s1690_s17 }
  0x5b   : > { %2403 = sst [smem:[#allocation34_spill]] %s2479_s26  ;;  %s1902_s23 = ssub.s32 %s1686_s16, %s2479_s26 }
  0x5c   : > { %p1906_p1 = por %p2376_p9, %p62_p8  ;;  %p48_p3 = scmp.ge.s32.totalorder %s2481_s15, 2 }
  0x5d   : > { %p68_p10 = scmp.ne.s32.totalorder %s1670_s12, %s1666_s11  ;;  %p2375_p12 = scmp.lt.s32.totalorder %s1694_s18, 8 }
  0x5e   : > { %s2483_s15 = smov (%p48_p3, %s2481_s15), 0  ;;  %p2406_p13 = scmp.eq.s32.totalorder %s1824_s19, 0 }
  0x5f   : > { %2405 = sst [smem:[#allocation35_spill]] %s2483_s15  ;;  %s2367_s5 = sand.u32 1, %s1674_s13  }
  0x60   : > { %p1918_p0 = por %p2406_p13, %p68_p10  ;;  %s1925_s22 = ssub.s32 %s1690_s17, %s2483_s15 }
  0x61   : > { %2409 = sst [smem:[#allocation37_spill]] %s1925_s22  ;;  %s1929_s27 = sshll.u32 %s2367_s5, 3 }
  0x62   : > { %s2407_s8 = scalar_select %p1918_p0, 1, 0 }
  0x63   : > { %s52_s11 = sor.u32 %s1902_s23, %s1925_s22  ;;  %s1048_s28 = sshll.u32 %s1690_s17, 2 }
  0x64   : > { %2408 = sst [smem:[#allocation36_spill]] %s2407_s8  ;;  %p53_p4 = scmp.eq.s32.totalorder %s52_s11, 0 }
  0x65   : > { %s331_s14 = sadd.s32 %s1686_s16, %s1048_s28  ;;  %p1940_p6 = pnand %p2375_p12, %p1906_p1 }
  0x66   : > { %s1945_s6 = scalar_select %p53_p4, %s1674_s13, %s55_s20  }
  0x67   : > { %s2410_s4 = scalar_select %p1940_p6, 1, 0 }
  0x68   : > { %2411 = sst [smem:[#allocation38_spill]] %s1945_s6  ;;  %s1947_s15 = sshll.u32 %s331_s14, 7 }
  0x69   : > { %s1950_s5 = sand.u32 1, %s1694_s18   ;;  %s2412_s1 = sld [smem:[#allocation39_spill]] }
  0x6a   : > { %s346_s24 = scalar_lea.vmem [#allocation6], %s1929_s27  ;;  %s1698_s20 = smov [#allocation15]  }
  0x6b   : > { %s355_s28 = sshll.u32 %s346_s24, 4  ;;  %s1961_s14 = sshll.u32 %s1698_s20, 4  ;;  %s1959_s28 = int_to_ptr.vmem [resolvable:$true] %s355_s28  ;;  %s312_s14 = int_to_ptr.vmem [resolvable:$true] %s1961_s14 }
  0x6c   : > { %s343_s6 = scalar_lea.sflag [#allocation7], %s1950_s5  ;;  %p1968_p1 = pneg %p1940_p6 }
  0x6f   : > { %s1956_s11 = scalar_lea.hbm %s2412_s1, %s1947_s15  ;;  %s1351_s24 = scalar_lea.hbm %s2412_s1, 1024 }
  0x70   : > { %s1346_s12 = scalar_lea.hbm %s1956_s11, 128  ;;  %p1352_p13 = scmp.lt.u32.totalorder %s1956_s11, %s2412_s1 }
  0x71   : > { %p1347_p8 = scmp.ne.s32.totalorder %s1956_s11, %s1346_s12  ;;  %p1353_p4 = scmp.lt.u32.totalorder %s1351_s24, %s1346_s12 }
  0x72   : > { %p1355_p12 = scmp.lt.u32.totalorder %s1346_s12, %s1956_s11 }
  0x73   : > { %p1349_p3 = pnand %p1968_p1, %p1347_p8  ;;  %p1354_p2 = por %p1353_p4, %p1352_p13 }
  0x75   : > { %p1350_p10 = pneg %p1349_p3  ;;  %p1356_p9 = por %p1355_p12, %p1354_p2 }
  0x77   : > { %p1357_p11 = pnand %p1356_p9, %p1350_p10 }
  0x79   : > { %1360 = shalt.err (!%p1357_p11)
}
  0x7a   : > { %s1361_s20 = scalar_lea.vmem %s1959_s28, 128  ;;  %s1699_s17 = smov [#allocation6]  }
  0x7b   : > { %p1362_p8 = scmp.ne.s32.totalorder %s1959_s28, %s1361_s20  ;;  %s1366_s8 = sshll.u32 %s1699_s17, 4  ;;  %s1367_s8 = int_to_ptr.vmem [resolvable:$false] %s1366_s8 }
  0x7c   : > { %s1368_s29 = scalar_lea.vmem %s1367_s8, 256  ;;  %p1369_p5 = scmp.lt.s32.totalorder %s1959_s28, %s1367_s8 }
  0x7d   : > { %p1364_p3 = pnand %p1362_p8, %p1968_p1  ;;  %p1370_p7 = scmp.lt.s32.totalorder %s1368_s29, %s1361_s20 }
  0x7f   : > { %p1365_p0 = pneg %p1364_p3  ;;  %p1371_p13 = por %p1370_p7, %p1369_p5 }
  0x81   : > { %p1372_p4 = pnand %p1371_p13, %p1365_p0 }
  0x83   : > { %1375 = shalt.err (!%p1372_p4)
}
  0x84   : > { %1144 = dma.hbm_to_vmem [thread:$0]  (!%p1940_p6), %s1956_s11, 128, %s1959_s28, %s343_s6  }
  0x85   : > { %s1376_s24 = scalar_lea.hbm %s2357_s7, 16  ;;  %p2414_p7 = scmp.ne.s32.totalorder %s2401_s21, 0 }
  0x86   : > { %p1377_p5 = scmp.ne.s32.totalorder %s2357_s7, %s1376_s24  ;;  %p1383_p12 = scmp.lt.u32.totalorder %s1376_s24, %s2357_s7 }
  0x88   : > { %p1379_p9 = pnand %p1377_p5, %p2414_p7 }
  0x8a   : > { %p1380_p11 = pneg %p1379_p9 }
  0x8c   : > { %p1385_p0 = pnand %p1383_p12, %p1380_p11 }
  0x8e   : > { %1388 = shalt.err (!%p1385_p0)
}
  0x8f   : > { %s1389_s1 = scalar_lea.vmem %s312_s14, 16  ;;  %s1396_s11 = scalar_lea.vmem %s312_s14, 32 }
  0x90   : > { %p1390_p2 = scmp.ne.s32.totalorder %s312_s14, %s1389_s1  ;;  %p1397_p3 = scmp.lt.s32.totalorder %s312_s14, %s312_s14 }
  0x91   : > { %p1398_p13 = scmp.lt.s32.totalorder %s1396_s11, %s1389_s1 }
  0x92   : > { %p1392_p10 = pnand %p1390_p2, %p2414_p7 }
  0x93   : > { %p1399_p4 = por %p1398_p13, %p1397_p3 }
  0x94   : > { %p1393_p8 = pneg %p1392_p10 }
  0x96   : > { %p1400_p6 = pnand %p1399_p4, %p1393_p8 }
  0x98   : > { %1403 = shalt.err (!%p1400_p6)
}
  0x99   : > { %p2415_p5 = scmp.ne.s32.totalorder %s2399_s25, 0  ;;  %s2016_s24 = scalar_lea.hbm %s2350_s0, %s1947_s15 }
  0x9a   : > { %s326_s1 = scalar_lea.vmem [#allocation3], %s1929_s27  ;;  %s2025_s20 = scalar_lea.hbm %s2352_s2, %s1947_s15 }
  0x9b   : > { %1137 = dma.hbm_to_vmem [thread:$0]  (!%p2415_p5), %s2357_s7, 16, %s312_s14, [#allocation16]  }
  0x9c   : > { %s335_s25 = sshll.u32 %s326_s1, 4  ;;  %s2416_s29 = sand.u32 1, %s1674_s13   ;;  %s2019_s25 = int_to_ptr.vmem [resolvable:$true] %s335_s25 }
  0x9d   : > { %s323_s14 = scalar_lea.sflag [#allocation4], %s2416_s29  ;;  %s1404_s11 = scalar_lea.hbm %s2016_s24, 128 }
  0x9e   : > { %p1405_p6 = scmp.ne.s32.totalorder %s2016_s24, %s1404_s11  ;;  %s1409_s21 = scalar_lea.hbm %s2350_s0, 1024 }
  0x9f   : > { %p1410_p11 = scmp.lt.u32.totalorder %s2016_s24, %s2350_s0  ;;  %p1411_p12 = scmp.lt.u32.totalorder %s1409_s21, %s1404_s11 }
  0xa0   : > { %p1407_p7 = pnand %p1405_p6, %p1968_p1  ;;  %p1413_p2 = scmp.lt.u32.totalorder %s1404_s11, %s2016_s24 }
  0xa1   : > { %p1412_p0 = por %p1411_p12, %p1410_p11 }
  0xa2   : > { %p1408_p9 = pneg %p1407_p7 }
  0xa3   : > { %p1414_p10 = por %p1413_p2, %p1412_p0 }
  0xa5   : > { %p1415_p8 = pnand %p1414_p10, %p1408_p9 }
  0xa7   : > { %1418 = shalt.err (!%p1415_p8)
}
  0xa8   : > { %s1419_s15 = scalar_lea.vmem %s2019_s25, 128  ;;  %s1700_s17 = smov [#allocation3]  }
  0xa9   : > { %p1420_p3 = scmp.ne.s32.totalorder %s2019_s25, %s1419_s15  ;;  %s1424_s8 = sshll.u32 %s1700_s17, 4  ;;  %s1425_s8 = int_to_ptr.vmem [resolvable:$false] %s1424_s8 }
  0xaa   : > { %s1426_s29 = scalar_lea.vmem %s1425_s8, 256  ;;  %p1427_p5 = scmp.lt.s32.totalorder %s2019_s25, %s1425_s8 }
  0xab   : > { %p1422_p13 = pnand %p1420_p3, %p1968_p1  ;;  %p1428_p6 = scmp.lt.s32.totalorder %s1426_s29, %s1419_s15 }
  0xad   : > { %p1423_p4 = pneg %p1422_p13  ;;  %p1429_p7 = por %p1428_p6, %p1427_p5 }
  0xaf   : > { %p1430_p11 = pnand %p1429_p7, %p1423_p4 }
  0xb1   : > { %1433 = shalt.err (!%p1430_p11)
}
  0xb2   : > { %p2417_p9 = scmp.ne.s32.totalorder %s2410_s4, 0  ;;  %s366_s11 = scalar_lea.vmem [#allocation8], %s1929_s27 }
  0xb3   : > { %s375_s28 = sshll.u32 %s366_s11, 4  ;;  %s1434_s12 = scalar_lea.hbm %s2025_s20, 128  ;;  %s376_s28 = int_to_ptr.vmem [resolvable:$true] %s375_s28 }
  0xb4   : > { %1141 = dma.hbm_to_vmem [thread:$0]  (!%p2417_p9), %s2016_s24, 128, %s2019_s25, %s323_s14  }
  0xb5   : > { %p1435_p12 = scmp.ne.s32.totalorder %s2025_s20, %s1434_s12  ;;  %s1439_s1 = scalar_lea.hbm %s2352_s2, 1024 }
  0xb6   : > { %p1440_p10 = scmp.lt.u32.totalorder %s2025_s20, %s2352_s2  ;;  %p1441_p8 = scmp.lt.u32.totalorder %s1439_s1, %s1434_s12 }
  0xb7   : > { %p1437_p0 = pnand %p1435_p12, %p1968_p1  ;;  %p1443_p13 = scmp.lt.u32.totalorder %s1434_s12, %s2025_s20 }
  0xb8   : > { %p1442_p3 = por %p1441_p8, %p1440_p10 }
  0xb9   : > { %p1438_p2 = pneg %p1437_p0 }
  0xba   : > { %p1444_p4 = por %p1443_p13, %p1442_p3 }
  0xbc   : > { %p1445_p5 = pnand %p1444_p4, %p1438_p2 }
  0xbe   : > { %1448 = shalt.err (!%p1445_p5)
}
  0xbf   : > { %s1449_s27 = scalar_lea.vmem %s376_s28, 128  ;;  %s1701_s24 = smov [#allocation8]  }
  0xc0   : > { %p1450_p6 = scmp.ne.s32.totalorder %s376_s28, %s1449_s27  ;;  %s1454_s25 = sshll.u32 %s1701_s24, 4  ;;  %s1455_s25 = int_to_ptr.vmem [resolvable:$false] %s1454_s25 }
  0xc1   : > { %s1456_s14 = scalar_lea.vmem %s1455_s25, 256  ;;  %p1457_p12 = scmp.lt.s32.totalorder %s376_s28, %s1455_s25 }
  0xc2   : > { %p1452_p7 = pnand %p1450_p6, %p1968_p1  ;;  %p1458_p0 = scmp.lt.s32.totalorder %s1456_s14, %s1449_s27 }
  0xc4   : > { %p1453_p11 = pneg %p1452_p7  ;;  %p1459_p9 = por %p1458_p0, %p1457_p12 }
  0xc6   : > { %p1460_p8 = pnand %p1459_p9, %p1453_p11 }
  0xc8   : > { %1463 = shalt.err (!%p1460_p8)
}
  0xc9   : > { %p2418_p10 = scmp.ne.s32.totalorder %s2410_s4, 0  ;;  %s137_s26 = sadd.s32 1, %s1662_s10 }
  0xca   : > { %p144_p1 = scmp.ne.s32.totalorder %s1662_s10, %s1658_s9  ;;  %p2419_p9 = scmp.eq.s32.totalorder %s1902_s23, 0 }
  0xcb   : > { %1147 = dma.hbm_to_vmem [thread:$0]  (!%p2418_p10), %s2025_s20, 128, %s376_s28, %s343_s6  }
  0xcc   : > { %s2076_s4 = scalar_select %p2419_p9, %s1662_s10, %s137_s26  }
  0xcd   : > { %p2420_p2 = scmp.eq.s32.totalorder %s1694_s18, 0  ;;  %p150_p13 = scmp.ne.s32.totalorder %s1658_s9, %s1654_s30 }
  0xce   : > { %s384_s8 = sand.u32 1, %s1662_s10   ;;  %p2421_p4 = scmp.eq.s32.totalorder %s1824_s19, 0 }
  0xcf   : > { %p146_p3 = por %p144_p1, %p2420_p2  ;;  %s1056_s11 = sshll.u32 %s384_s8, 3 }
  0xd0   : > { %p2085_p5 = por %p150_p13, %p2421_p4  ;;  %s1057_s12 = sshll.u32 %s1686_s16, 7 }
  0xd1   : > { %s2093_s6 = scalar_lea.hbm %s2353_s3, %s1057_s12  ;;  %s386_s23 = scalar_lea.vmem [#allocation9], %s1056_s11 }
  0xd2   : > { %s393_s20 = sshll.u32 %s386_s23, 4  ;;  %p2423_p6 = scmp.lt.s32.totalorder %s1694_s18, 8  ;;  %s2095_s20 = int_to_ptr.vmem [resolvable:$true] %s393_s20 }
  0xd3   : > { %s383_s28 = scalar_lea.sflag [#allocation10], %s1950_s5  ;;  %s1464_s1 = scalar_lea.hbm %s2093_s6, 128 }
  0xd4   : > { %p2099_p7 = pnand %p2423_p6, %p146_p3  ;;  %p1465_p11 = scmp.ne.s32.totalorder %s2093_s6, %s1464_s1 }
  0xd5   : > { %s1469_s27 = scalar_lea.hbm %s2353_s3, 512  ;;  %p1470_p10 = scmp.lt.u32.totalorder %s2093_s6, %s2353_s3 }
  0xd6   : > { %p1466_p12 = pneg %p2099_p7  ;;  %p1471_p1 = scmp.lt.u32.totalorder %s1469_s27, %s1464_s1 }
  0xd7   : > { %p1473_p2 = scmp.lt.u32.totalorder %s1464_s1, %s2093_s6 }
  0xd8   : > { %p1467_p0 = pnand %p1466_p12, %p1465_p11  ;;  %p1472_p9 = por %p1471_p1, %p1470_p10 }
  0xda   : > { %p1468_p8 = pneg %p1467_p0  ;;  %p1474_p3 = por %p1473_p2, %p1472_p9 }
  0xdc   : > { %p1475_p13 = pnand %p1474_p3, %p1468_p8 }
  0xde   : > { %1478 = shalt.err (!%p1475_p13)
}
  0xdf   : > { %s1479_s14 = scalar_lea.vmem %s2095_s20, 128  ;;  %s1702_s26 = smov [#allocation9]  }
  0xe0   : > { %p1480_p4 = scmp.ne.s32.totalorder %s2095_s20, %s1479_s14  ;;  %s1484_s8 = sshll.u32 %s1702_s26, 4  ;;  %s1485_s8 = int_to_ptr.vmem [resolvable:$false] %s1484_s8 }
  0xe1   : > { %s1486_s11 = scalar_lea.vmem %s1485_s8, 256  ;;  %p1487_p0 = scmp.lt.s32.totalorder %s2095_s20, %s1485_s8 }
  0xe2   : > { %p1482_p6 = pnand %p1480_p4, %p1466_p12  ;;  %p1488_p10 = scmp.lt.s32.totalorder %s1486_s11, %s1479_s14 }
  0xe4   : > { %p1483_p11 = pneg %p1482_p6  ;;  %p1489_p1 = por %p1488_p10, %p1487_p0 }
  0xe6   : > { %p1490_p9 = pnand %p1489_p1, %p1483_p11 }
  0xe8   : > { %1493 = shalt.err (!%p1490_p9)
}
  0xe9   : > { %s2425_s12 = sld [smem:[#allocation28_spill]]  ;;  %s2426_s21 = sld [smem:[#allocation27_spill]] }
  0xea   : > { %s2427_s22 = sld [smem:[#allocation37_spill]]  ;;  %s2428_s23 = sld [smem:[#allocation26_spill]] }
  0xeb   : > { %s2429_s1 = sld [smem:[#allocation32_spill]]  ;;  %s1041_s15 = sadd.s32 4294967294, %s1694_s18  }
  0xec   : > { %1150 = dma.hbm_to_vmem [thread:$0]  (!%p2099_p7), %s2093_s6, 128, %s2095_s20, %s383_s28  }
  0xed   : > { %p2431_p2 = scmp.eq.s32.totalorder %s1694_s18, 0  ;;  %p263_p4 = scmp.eq.s32.totalorder %s1824_s19, 7 }
  0xee   : > { %p269_p6 = scmp.eq.s32.totalorder %s1041_s15, 7  ;;  %p2432_p11 = scmp.eq.s32.totalorder %s1824_s19, 0 }
  0xef   : > { %s184_s17 = sadd.s32 1, %s2425_s12  ;;  %p191_p12 = scmp.ne.s32.totalorder %s2425_s12, %s2426_s21 }
  0xf0   : > { %p2430_p8 = scmp.eq.s32.totalorder %s2427_s22, 0  ;;  %p197_p13 = scmp.ne.s32.totalorder %s2426_s21, %s2428_s23 }
  0xf1   : > { %p193_p3 = por %p191_p12, %p2431_p2  ;;  %p2149_p10 = por %p263_p4, %p191_p12 }
  0xf2   : > { %s2136_s30 = scalar_select %p2430_p8, %s2425_s12, %s184_s17  }
  0xf3   : > { %p2145_p0 = por %p197_p13, %p2432_p11  ;;  %p2153_p7 = por %p269_p6, %p197_p13 }
  0xf4   : > { %s2434_s6 = scalar_select %p2149_p10, 1, 0 }
  0xf5   : > { %s2433_s27 = scalar_select %p2145_p0, 1, 0 }
  0xf6   : > { %s2435_s20 = scalar_select %p2153_p7, 1, 0 }
  0xf7   : > { %s402_s28 = sand.u32 1, %s2425_s12   ;;  %s1059_s24 = sshll.u32 %s2429_s1, 7 }
  0xf8   : > { %s1058_s25 = sshll.u32 %s402_s28, 3  ;;  %s2436_s8 = sld [smem:[#allocation41_spill]] }
  0xf9   : > { %p2437_p1 = scmp.lt.s32.totalorder %s1694_s18, 8  ;;  %s404_s22 = scalar_lea.vmem [#allocation12], %s1058_s25 }
  0xfa   : > { %s411_s12 = sshll.u32 %s404_s22, 4  ;;  %s401_s23 = scalar_lea.sflag [#allocation13], %s1950_s5  ;;  %s2170_s12 = int_to_ptr.vmem [resolvable:$true] %s411_s12 }
  0xfb   : > { %p2166_p9 = pnand %p2437_p1, %p193_p3 }
  0xfd   : > { %p1496_p8 = pneg %p2166_p9 }
  0xfe   : > { %s2162_s11 = scalar_lea.hbm %s2436_s8, %s1059_s24  ;;  %s1499_s28 = scalar_lea.hbm %s2436_s8, 256 }
  0xff   : > { %s1494_s1 = scalar_lea.hbm %s2162_s11, 128  ;;  %p1500_p3 = scmp.lt.u32.totalorder %s2162_s11, %s2436_s8 }
 0x100   : > { %p1495_p12 = scmp.ne.s32.totalorder %s2162_s11, %s1494_s1  ;;  %p1501_p4 = scmp.lt.u32.totalorder %s1499_s28, %s1494_s1 }
 0x101   : > { %p1503_p11 = scmp.lt.u32.totalorder %s1494_s1, %s2162_s11 }
 0x102   : > { %p1497_p2 = pnand %p1496_p8, %p1495_p12  ;;  %p1502_p6 = por %p1501_p4, %p1500_p3 }
 0x104   : > { %p1498_p13 = pneg %p1497_p2  ;;  %p1504_p1 = por %p1503_p11, %p1502_p6 }
 0x106   : > { %p1505_p7 = pnand %p1504_p1, %p1498_p13 }
 0x108   : > { %1508 = shalt.err (!%p1505_p7)
}
 0x109   : > { %s1509_s5 = scalar_lea.vmem %s2170_s12, 128  ;;  %s1703_s25 = smov [#allocation12]  }
 0x10a   : > { %p1510_p12 = scmp.ne.s32.totalorder %s2170_s12, %s1509_s5  ;;  %s1514_s26 = sshll.u32 %s1703_s25, 4  ;;  %s1515_s26 = int_to_ptr.vmem [resolvable:$false] %s1514_s26 }
 0x10b   : > { %s1516_s22 = scalar_lea.vmem %s1515_s26, 256  ;;  %p1517_p0 = scmp.lt.s32.totalorder %s2170_s12, %s1515_s26 }
 0x10c   : > { %p1512_p2 = pnand %p1510_p12, %p1496_p8  ;;  %p1518_p3 = scmp.lt.s32.totalorder %s1516_s22, %s1509_s5 }
 0x10e   : > { %p1513_p10 = pneg %p1512_p2  ;;  %p1519_p4 = por %p1518_p3, %p1517_p0 }
 0x110   : > { %p1520_p6 = pnand %p1519_p4, %p1513_p10 }
 0x112   : > { %1523 = shalt.err (!%p1520_p6)
}
 0x113   : > { %1153 = dma.hbm_to_vmem [thread:$0]  (!%p2166_p9), %s2162_s11, 128, %s2170_s12, %s401_s23  }
 0x114   : > { %s2439_s1 = sld [smem:[#allocation33_spill]] }
 0x11a   : > { %p2440_p7 = scmp.ne.s32.totalorder %s2439_s1, 0 }
 0x11b   : > { %s2441_s15 = sld [smem:[#allocation29_spill]] (!%p2440_p7)  ;;  %s2442_s17 = sld [smem:[#allocation36_spill]] (!%p2440_p7) }
 0x11c   : > { %420 = sbr.rel (%p2440_p7) target bundleno = 1644 (0x66c), region = 52 }
 0x121   : > { %s422_s28 = sand.u32 (!%p2440_p7), 1, %s2441_s15   ;;  %p2443_p8 = scmp.ne.s32.totalorder (!%p2440_p7), %s2442_s17, 0 }
 0x122   : > { %s2201_s24 = sshll.u32 (!%p2440_p7), %s422_s28, 3  ;;  %s423_s14 = scalar_lea.sflag (!%p2440_p7), [#allocation4], %s422_s28 }
 0x123   : > { %s426_s25 = scalar_lea.vmem [#allocation3], %s2201_s24 }
 0x124   : > { %1609 = dma.done.wait (%p2443_p8), %s423_s14, 128  }
 0x125   : > { %1611 = vsyncadd (%p2443_p8), %s423_s14, 4294967168  ;;  %s431_s11 = sand.u32 1, %s1824_s19   ;;  %s435_s12 = scalar_lea.vmem [#allocation6], %s2201_s24 }
 0x126   : > { %s432_s21 = scalar_lea.sflag [#allocation7], %s431_s11 }
 0x127   : > { %1613 = dma.done.wait (%p2443_p8), %s432_s21, 256  }
 0x128   : > { %1615 = vsyncadd (%p2443_p8), %s432_s21, 4294967040  ;;  %s451_s23 = sand.u32 1, %s1658_s9   ;;  %s444_s26 = scalar_lea.vmem [#allocation8], %s2201_s24 }
 0x129   : > { %s2215_s5 = sshll.u32 %s451_s23, 3  ;;  %s450_s22 = scalar_lea.sflag [#allocation10], %s431_s11 }
 0x12a   : > { %s453_s1 = scalar_lea.vmem [#allocation9], %s2215_s5 }
 0x12b   : > { %1617 = dma.done.wait (%p2085_p5), %s450_s22, 128  }
 0x12c   : > { %1619 = vsyncadd (%p2085_p5), %s450_s22, 4294967168  ;;  %p2444_p0 = scmp.eq.s32.totalorder %s1824_s19, 0 }
 0x12e   : > { %1621 = dma.done.wait (%p2444_p0), [#allocation10], 16   ;;  %p2445_p10 = pmov %p2444_p0 }
 0x12f   : > { %s2446_s15 = sld [smem:[#allocation27_spill]]  ;;  %s463_s14 = scalar_lea.sflag [#allocation13], %s431_s11 }
 0x130   : > { %1623 = vsyncadd (%p2445_p10), [#allocation10], 4294967280  ;;  %p2447_p9 = scmp.ne.s32.totalorder %s2433_s27, 0 }
 0x135   : > { %s464_s17 = sand.u32 1, %s2446_s15  }
 0x136   : > { %s2230_s28 = sshll.u32 %s464_s17, 3 }
 0x137   : > { %s466_s21 = scalar_lea.vmem [#allocation12], %s2230_s28 }
 0x138   : > { %1625 = dma.done.wait (%p2447_p9), %s463_s14, 128  }
 0x139   : > { %1627 = vsyncadd (%p2447_p9), %s463_s14, 4294967168  ;;  %p2448_p5 = pmov %p2444_p0 }
 0x13a   : > { %p2449_p13 = pmov %p2444_p0 }
 0x13b   : > { %1629 = dma.done.wait (%p2448_p5), [#allocation13], 16  }
 0x13c   : > { %1631 = vsyncadd (%p2449_p13), [#allocation13], 4294967280  ;;  %p2450_p11 = pmov %p2444_p0 }
 0x13d   : > { %p2451_p1 = pmov %p2444_p0 }
 0x13e   : > { %1633 = dma.done.wait (%p2450_p11), [#allocation16], 16  }
 0x13f   : > { %1635 = vsyncadd (%p2451_p1), [#allocation16], 4294967280  ;;  %s526_s29 = scalar_lea.vmem [#allocation17], %s2230_s28  ;;  %s2452_s11 = sld [smem:[#allocation30_spill]] }
 0x145   : > { %p1070_p12 = scmp.ne.s32.totalorder %s2452_s11, 0 }
 0x146   : > { %vm531_vm0 = vcmask (!%p1070_p12), 261120   ;;  %v1704_v0 = vmov (!%p1070_p12), 0.0  }
 0x147   : > { %530 = sbr.rel (%p1070_p12) target bundleno = 334 (0x14e), region = 88  ;;  %532 = vst.msk [vmem:[#allocation2] sm:$0xff] (!%p1070_p12), %vm531_vm0, %v1704_v0 }
 0x14e PF: > { %v534_v1 = vld [vmem:[%s435_s12] sm:$0xff]  ;;  %vm537_vm1 = vcmask 64512   ;;  %v533_v2 = vld [vmem:[%s426_s25] sm:$0xff]  ;;  %v1705_v3 = vmov 0.0   ;;  %vm1706_vm2 = vmmov 0   ;;  %vm774_vm3 = vcmask 261120  }
 0x14f   : > { %1089 = vmatprep.subr.mxu0 %v1705_v3  ;;  %1091 = vmatprep.mubr.msk.f32.mxu0 %vm1706_vm2, %v1705_v3  ;;  %v536_v4 = vmul.f32 0.35355338, %v533_v2  ;;  %v535_v13 = vld [vmem:[%s444_s26] sm:$0xff]  ;;  %v699_v17 = vld [vmem:[%s453_s1] sm:$0xff]  ;;  %s2453_s19 = sld [smem:[#allocation30_spill]] }
 0x150   : > { %1090 = vmatpush3.xpose.msk.msra.mxu0 %vm537_vm1, %v534_v1  ;;  %1094 = vmatprep.subr.mxu1 %v1705_v3  ;;  %v698_v20 = vld [vmem:[#allocation2] sm:$0xff] }
 0x151   : > { %1096 = vmatprep.mubr.msk.f32.mxu1 %vm1706_vm2, %v1705_v3  ;;  %1095 = vmatpush3.msra.mxu1 %v535_v13 }
 0x152   : > { %1099 = vmatprep.subr.mxu1 %v1705_v3 }
 0x153   : > { %1092 = vmatmul.mubr.msk.f32.vlgmr.msra.gmra.mrb[0].mxu0 %vm537_vm1, %v536_v4 }
 0x155   : > { %p1075_p2 = scmp.ne.s32.totalorder %s2453_s19, 3 }
 0x156   : > { %v1076_v25 = vld [vmem:[#allocation11] ss:$0 sm:$0xff] (!%p1075_p2)  ;;  %v789_v26 = vld [vmem:[%s466_s21] sm:$0xff] (!%p1075_p2)  ;;  %v1077_v39 = vld [vmem:[#allocation14] ss:$0 sm:$0xff] (!%p1075_p2) }
 0x157   : > { %v1078_v41 = vld [vmem:[#allocation15] ss:$0 sm:$0xff] (!%p1075_p2) }
 0x226   : > { %v610_v5 = vpop.f32.mrb[0].mxu0 }
 0x227   : > { %v1093_v6 = vpop.f32.mrb[1].mxu0  ;;  %v614_v7 = vsel %vm537_vm1, %v610_v5, -inf }
 0x228   : > { %615 = vmax.xlane.f32.xlu0 %v614_v7 }
 0x2b5   : > { %v616_v8 = vpop.xlane.xlu0 %615 }
 0x2b6   : > { %v617_v9 = vsub.f32 %v610_v5, %v616_v8 }
 0x2b8   : > { %v618_v10 = vmul.f32 1.442695, %v617_v9 }
 0x2ba   : > { %1284 = vpow2.f32 %v618_v10 }
 0x2c4   : > { %v1285_v11 = vpop.eup %1284 }
 0x2c5   : > { %v620_v12 = vsel %vm537_vm1, %v1285_v11, 0.0 }
 0x2c6   : > { %621 = vadd.xlane.f32.xlu0 %v620_v12 }
 0x353   : > { %v622_v14 = vpop.xlane.xlu0 %621 }
 0x354   : > { %1286 = vrcp.f32 %v622_v14 }
 0x35e   : > { %v1287_v15 = vpop.eup %1286 }
 0x35f   : > { %v624_v16 = vmul.f32 %v1287_v15, %v1285_v11 }
 0x361   : > { %1097 = vmatmul.mubr.msk.f32.vlgmr.msra.gmra.mrb[0].mxu1 %vm537_vm1, %v624_v16 }
 0x362   : > { %1100 = vmatpush3.msra.mxu1 %v699_v17  ;;  %1101 = vmatprep.mubr.msk.f32.mxu1 %vm1706_vm2, %v1705_v3 }
 0x434   : > { %v694_v18 = vpop.f32.mrb[0].mxu1 }
 0x435   : > { %v1098_v19 = vpop.f32.mrb[1].mxu1  ;;  %1102 = vmatmul.mubr.msk.f32.vlgmr.msra.gmra.mrb[2].mxu1 %vm537_vm1, %v694_v18 }
 0x505   : > { %779 = sbr.rel (%p1075_p2) target bundleno = 1617 (0x651), region = 92 }
 0x508   : > { %v769_v21 = vpop.f32.mrb[2].mxu1 }
 0x509   : > { %v773_v22 = vadd.f32 %v769_v21, %v698_v20  ;;  %v1103_v23 = vpop.f32.mrb[3].mxu1 }
 0x50b   : > { %775 = vst.msk [vmem:[#allocation2] sm:$0xff] %vm774_vm3, %v773_v22 }
 0x512   : > { %v780_v24 = vld [vmem:[#allocation2] sm:$0xff] }
 0x513   : > { %v788_v27 = vadd.f32 %v1076_v25, %v780_v24 }
 0x515   : > { %v790_v28 = vadd.f32 %v789_v26, %v788_v27 }
 0x517   : > { %v791_v29 = vsel %vm774_vm3, %v790_v28, 0.0 }
 0x518   : > { %792 = vadd.xlane.f32.xlu0 %v791_v29 }
 0x5a5   : > { %v793_v30 = vpop.xlane.xlu0 %792 }
 0x5a6   : > { %v795_v31 = vmul.f32 0.03125, %v793_v30 }
 0x5a8   : > { %v796_v32 = vsub.f32 %v790_v28, %v795_v31 }
 0x5aa   : > { %v797_v33 = vmul.f32 %v796_v32, %v796_v32 }
 0x5ac   : > { %v798_v34 = vsel %vm774_vm3, %v797_v33, 0.0 }
 0x5ad   : > { %799 = vadd.xlane.f32.xlu0 %v798_v34 }
 0x63a   : > { %v800_v35 = vpop.xlane.xlu0 %799 }
 0x63b   : > { %v801_v36 = vmul.f32 0.03125, %v800_v35 }
 0x63d   : > { %v802_v37 = vadd.f32 1e-05, %v801_v36 }
 0x63f   : > { %1288 = vrsqrt.f32 %v802_v37 }
 0x649   : > { %v1289_v38 = vpop.eup %1288 }
 0x64a   : > { %v804_v40 = vmul.f32 %v1289_v38, %v796_v32 }
 0x64c   : > { %v812_v42 = vmul.f32 %v1077_v39, %v804_v40 }
 0x64e   : > { %v820_v43 = vadd.f32 %v1078_v41, %v812_v42 }
 0x650   : > { %821 = vst.msk [vmem:[%s526_s29] sm:$0xff] %vm774_vm3, %v820_v43 }
 0x651 PF: > { %s2454_s27 = sld [smem:[#allocation31_spill]]  ;;  %s2456_s5 = sld [smem:[#allocation43_spill]] }
 0x652   : > { %s836_s22 = sshll.u32 %s526_s29, 4  ;;  %s823_s1 = scalar_lea.sflag [#allocation5], %s464_s17  ;;  %s837_s22 = int_to_ptr.vmem [resolvable:$true] %s836_s22 }
 0x653   : > { %s1524_s15 = scalar_lea.vmem %s837_s22, 128  ;;  %p2457_p4 = scmp.ne.s32.totalorder %s2434_s6, 0 }
 0x654   : > { %p1525_p3 = scmp.ne.s32.totalorder %s837_s22, %s1524_s15  ;;  %s1707_s14 = smov [#allocation17]  }
 0x655   : > { %s1528_s21 = sshll.u32 %s1707_s14, 4  ;;  %s1529_s21 = int_to_ptr.vmem [resolvable:$false] %s1528_s21 }
 0x656   : > { %p1526_p6 = pnand %p1525_p3, %p2457_p4  ;;  %s1530_s11 = scalar_lea.vmem %s1529_s21, 256 }
 0x657   : > { %s1080_s25 = sshll.u32 %s2454_s27, 7  ;;  %p1531_p8 = scmp.lt.s32.totalorder %s837_s22, %s1529_s21 }
 0x658   : > { %s2275_s26 = scalar_lea.hbm %s2456_s5, %s1080_s25  ;;  %p1527_p7 = pneg %p1526_p6 }
 0x659   : > { %p1532_p0 = scmp.lt.s32.totalorder %s1530_s11, %s1524_s15 }
 0x65b   : > { %p1533_p10 = por %p1532_p0, %p1531_p8 }
 0x65d   : > { %p1534_p9 = pnand %p1533_p10, %p1527_p7 }
 0x65f   : > { %1537 = shalt.err (!%p1534_p9)
}
 0x660   : > { %s1538_s17 = scalar_lea.hbm %s2275_s26, 128  ;;  %s1542_s19 = scalar_lea.hbm %s2456_s5, 256 }
 0x661   : > { %p1539_p5 = scmp.ne.s32.totalorder %s2275_s26, %s1538_s17  ;;  %p1543_p1 = scmp.lt.u32.totalorder %s2275_s26, %s2456_s5 }
 0x662   : > { %p1544_p12 = scmp.lt.u32.totalorder %s1542_s19, %s1538_s17  ;;  %p1546_p3 = scmp.lt.u32.totalorder %s1538_s17, %s2275_s26 }
 0x663   : > { %p1540_p13 = pnand %p1539_p5, %p2457_p4 }
 0x664   : > { %p1545_p2 = por %p1544_p12, %p1543_p1 }
 0x665   : > { %p1541_p11 = pneg %p1540_p13 }
 0x666   : > { %p1547_p6 = por %p1546_p3, %p1545_p2 }
 0x668   : > { %p1548_p7 = pnand %p1547_p6, %p1541_p11 }
 0x66a   : > { %1551 = shalt.err (!%p1548_p7)
}
 0x66b   : > { %1126 = dma.vmem_to_hbm [thread:$0]  (%p2457_p4), %s837_s22, 128, %s2275_s26, %s823_s1  }
 0x66c PF: > { %s2458_s25 = sld [smem:[#allocation26_spill]]  ;;  %p1165_p8 = scmp.ge.s32.totalorder %s1694_s18, 2 }
 0x66d   : > { %p2459_p0 = scmp.ne.s32.totalorder %s2435_s20, 0 }
 0x66f   : > { %p1155_p10 = pnand %p1165_p8, %p2459_p0 }
 0x672   : > { %s848_s12 = sand.u32 1, %s2458_s25  }
 0x673   : > { %s849_s23 = scalar_lea.sflag [#allocation5], %s848_s12 }
 0x674   : > { %1637 = dma.done.wait (!%p1155_p10), %s849_s23, 128  }
 0x675   : > { %1639 = vsyncadd (!%p1155_p10), %s849_s23, 4294967168  ;;  %s34_s18 = sadd.s32 1, %s1694_s18   ;;  %s2461_s27 = sld [smem:[#allocation27_spill]] }
 0x676   : > { %p2303_p9 = scmp.ge.s32.totalorder %s34_s18, 10   ;;  %s2462_s28 = sld [smem:[#allocation28_spill]] }
 0x677   : > { %s2463_s11 = sld [smem:[#allocation29_spill]]  ;;  %s2464_s6 = sld [smem:[#allocation38_spill]] }
 0x678   : > { %s2465_s20 = sld [smem:[#allocation32_spill]]  ;;  %s2466_s26 = sld [smem:[#allocation34_spill]] }
 0x679   : > { %s2467_s17 = sld [smem:[#allocation35_spill]]  ;;  %s2469_s29 = smov %s2136_s30 }
 0x67a   : > { %s2470_s30 = smov %s1658_s9  ;;  %s2471_s9 = smov %s1662_s10 }
 0x67b   : > { %s2472_s10 = smov %s2076_s4  ;;  %s2473_s12 = smov %s1674_s13 }
 0x67c   : > { %s2475_s14 = smov %s1686_s16  ;;  %33 = sbr.rel (!%p2303_p9) target bundleno = 23 (0x17), region = 167 }
 0x67d   : > { %s2474_s13 = smov %s2464_s6 }
 0x67e   : > { %s2476_s15 = smov %s2465_s20  ;;  %s2477_s16 = smov %s2466_s26 }
 0x683   :  { %854 = vsyncpa [#allocation4], 1 }
 0x684   :  { %856 = vsyncpa [#allocation4 + $0x1], 1 }
 0x685   :  { %857 = vsyncpa [#allocation7], 1 }
 0x686   :  { %859 = vsyncpa [#allocation7 + $0x1], 1 }
 0x687   :  { %860 = vsyncpa [#allocation10], 1 }
 0x688   :  { %862 = vsyncpa [#allocation10 + $0x1], 1 }
 0x689   :  { %863 = vsyncpa [#allocation13], 1 }
 0x68a   :  { %865 = vsyncpa [#allocation13 + $0x1], 1 }
 0x68b   :  { %866 = vsyncpa [#allocation16], 1 }
 0x68c   :  { %867 = vsyncpa [#allocation5], 1 }
 0x68d   :  { %869 = vsyncpa [#allocation5 + $0x1], 1 }

// kernel: decoder_layer.11
= control target key start
LH: loop header
LB: loop body
LE: loop exit
PB: predicated region body
PF: predicated region fallthrough
CT: control target
= control target key end

     0   :  { %s2346_s0 = inlined_call_operand.hbm [shape: f32[16,32], index: 0, kind: input, shape index: {}, may-alias: {0,5}]   ;;  %s2347_s1 = inlined_call_operand.hbm [shape: f32[32,2048], index: 1, kind: input, shape index: {}]   ;;  %s2348_s2 = inlined_call_operand.hbm [shape: f32[1,2048], index: 2, kind: input, shape index: {}]   ;;  %s2349_s3 = inlined_call_operand.hbm [shape: f32[2048,32], index: 3, kind: input, shape index: {}]   ;;  %s2350_s4 = inlined_call_operand.hbm [shape: f32[1,32], index: 4, kind: input, shape index: {}]   ;;  %s2351_s5 = inlined_call_operand.hbm [shape: f32[16,32], index: 5, kind: input, shape index: {}, may-alias: {0,5}]   ;;  %s2352_s6 = inlined_call_operand.hbm [shape: f32[1,32], index: 6, kind: input, shape index: {}]   ;;  %s2353_s7 = inlined_call_operand.hbm [shape: f32[1,32], index: 7, kind: input, shape index: {}]   ;;  %s2354_s8 = inlined_call_operand.hbm [shape: f32[16,32], index: 8, kind: output, shape index: {}]  }
   0x1   :  { %2376 = sst [smem:[#allocation31_spill]] %s2347_s1 }
   0x2   :  { %2377 = sst [smem:[#allocation32_spill]] %s2350_s4 }
   0x3   :  { %2378 = sst [smem:[#allocation33_spill]] %s2351_s5 }
   0x4   :  { %2379 = sst [smem:[#allocation34_spill]] %s2354_s8 }
   0x5   :  { %13 = vsyncpa [#allocation4], 0 }
   0x6   :  { %14 = vsyncpa [#allocation7], 0 }
   0x7   :  { %16 = vsyncpa [#allocation7 + $0x1], 0 }
   0x8   :  { %17 = vsyncpa [#allocation10], 0 }
   0x9   :  { %19 = vsyncpa [#allocation10 + $0x1], 0 }
   0xa   :  { %20 = vsyncpa [#allocation13], 0 }
   0xb   :  { %21 = vsyncpa [#allocation16], 0 }
   0xc   :  { %22 = vsyncpa [#allocation5], 0  ;;  %s1894_s27 = smov 0   ;;  %s1896_s28 = smov 0  }
   0xd   :  { %s1898_s29 = smov 0   ;;  %s1900_s30 = smov 0  }
   0xe   :  { %s1902_s9 = smov 0   ;;  %s1904_s10 = smov 0  }
   0xf LB: > { %2380 = sst [smem:[#allocation25_spill]] %s1813_s28  ;;  %s1923_s11 = sadd.s32 4294967295, %s1829_s10   ;;  %s1829_s10 = sphi %s1904_s10, %s28_s10   ;;  %s1825_s9 = sphi %s1902_s9, %s2423_s9   ;;  %s1821_s30 = sphi %s1900_s30, %s2422_s30   ;;  %s1817_s29 = sphi %s1898_s29, %s2420_s29   ;;  %s1813_s28 = sphi %s1896_s28, %s2419_s28   ;;  %s1809_s27 = sphi %s1894_s27, %s2418_s27  }
  0x10   : > { %2381 = sst [smem:[#allocation26_spill]] %s1817_s29  ;;  %p86_p0 = scmp.ne.s32.totalorder %s1813_s28, %s1809_s27 }
  0x11   : > { %2382 = sst [smem:[#allocation27_spill]] %s1821_s30  ;;  %p2355_p1 = scmp.eq.s32.totalorder %s1923_s11, 0 }
  0x12   : > { %p1166_p2 = scmp.ge.s32.totalorder %s1829_s10, 1  ;;  %p264_p3 = scmp.lt.s32.totalorder %s1829_s10, 5 }
  0x13   : > { %p1931_p4 = por %p2355_p1, %p86_p0  ;;  %s1831_s14 = smov [#allocation11]  }
  0x14   : > { %p1935_p5 = pnand %p1166_p2, %p264_p3  ;;  %s293_s15 = sshll.u32 %s1831_s14, 4  ;;  %s294_s15 = int_to_ptr.vmem [resolvable:$true] %s293_s15 }
  0x15   : > { %s2383_s12 = scalar_select %p1931_p4, 1, 0 }
  0x16   : > { %s2385_s13 = scalar_select %p1935_p5, 1, 0 }
  0x17   : > { %2384 = sst [smem:[#allocation28_spill]] %s2383_s12  ;;  %p1393_p6 = pneg %p1935_p5 }
  0x18   : > { %s1832_s17 = smov [#allocation12]   ;;  %s2387_s4 = sld [smem:[#allocation32_spill]] }
  0x19   : > { %p1943_p7 = pnand %p1393_p6, %p2355_p1  ;;  %s306_s18 = sshll.u32 %s1832_s17, 4  ;;  %s1947_s18 = int_to_ptr.vmem [resolvable:$true] %s306_s18 }
  0x1b   : > { %s2386_s16 = scalar_select %p1943_p7, 1, 0 }
  0x1c   : > { %p1957_p9 = pneg %p1943_p7 }
  0x1e   : > { %s1499_s21 = scalar_lea.hbm %s2387_s4, 16 }
  0x1f   : > { %p1500_p8 = scmp.ne.s32.totalorder %s2387_s4, %s1499_s21  ;;  %p1506_p12 = scmp.lt.u32.totalorder %s1499_s21, %s2387_s4 }
  0x20   : > { %s2388_s24 = scalar_select %p1957_p9, 1, 0 }
  0x21   : > { %p1502_p10 = pnand %p1957_p9, %p1500_p8 }
  0x23   : > { %p1503_p11 = pneg %p1502_p10 }
  0x25   : > { %p1508_p13 = pnand %p1506_p12, %p1503_p11 }
  0x27   : > { %1511 = shalt.err (!%p1508_p13)
}
  0x28   : > { %s1512_s27 = scalar_lea.vmem %s294_s15, 16  ;;  %s1519_s14 = scalar_lea.vmem %s294_s15, 32 }
  0x29   : > { %p1513_p0 = scmp.ne.s32.totalorder %s294_s15, %s1512_s27  ;;  %p1520_p6 = scmp.lt.s32.totalorder %s294_s15, %s294_s15 }
  0x2a   : > { %p1521_p1 = scmp.lt.s32.totalorder %s1519_s14, %s1512_s27 }
  0x2b   : > { %p1515_p2 = pnand %p1513_p0, %p1957_p9 }
  0x2c   : > { %p1522_p4 = por %p1521_p1, %p1520_p6 }
  0x2d   : > { %p1516_p3 = pneg %p1515_p2 }
  0x2f   : > { %p1523_p5 = pnand %p1522_p4, %p1516_p3 }
  0x31   : > { %1526 = shalt.err (!%p1523_p5)
}
  0x32   : > { %1399 = dma.hbm_to_vmem [thread:$0]  (!%p1943_p7), %s2387_s4, 16, %s294_s15, [#allocation10]  }
  0x33   : > { %s2389_s5 = sld [smem:[#allocation33_spill]] }
  0x39   : > { %s1527_s22 = scalar_lea.hbm %s2389_s5, 256 }
  0x3a   : > { %p1528_p8 = scmp.ne.s32.totalorder %s2389_s5, %s1527_s22  ;;  %p1534_p4 = scmp.lt.u32.totalorder %s1527_s22, %s2389_s5 }
  0x3c   : > { %p1530_p10 = pnand %p1528_p8, %p1957_p9 }
  0x3e   : > { %p1531_p1 = pneg %p1530_p10 }
  0x40   : > { %p1536_p5 = pnand %p1534_p4, %p1531_p1 }
  0x42   : > { %1539 = shalt.err (!%p1536_p5)
}
  0x43   : > { %s1540_s15 = scalar_lea.vmem %s1947_s18, 256  ;;  %p1548_p0 = scmp.lt.s32.totalorder %s1947_s18, %s1947_s18 }
  0x44   : > { %p1541_p11 = scmp.ne.s32.totalorder %s1947_s18, %s1540_s15  ;;  %p1549_p2 = scmp.lt.s32.totalorder %s1540_s15, %s1540_s15 }
  0x46   : > { %p1543_p12 = pnand %p1541_p11, %p1957_p9  ;;  %p1550_p3 = por %p1549_p2, %p1548_p0 }
  0x48   : > { %p1544_p13 = pneg %p1543_p12 }
  0x4a   : > { %p1551_p6 = pnand %p1550_p3, %p1544_p13 }
  0x4c   : > { %1554 = shalt.err (!%p1551_p6)
}
  0x4d   : > { %s2358_s14 = smov 128   ;;  %s2360_s17 = smov 8  }
  0x4e   : > { %1402 = dma.hbm_to_vmem [thread:$0]  (!%p1943_p7), %s2389_s5, 256, %s1947_s18, [#allocation13], %s2358_s14, %s2358_s14, %s2360_s17  }
  0x4f   : > { %s37_s21 = sadd.s32 1, %s1825_s9  ;;  %s73_s22 = sadd.s32 1, %s1817_s29 }
  0x50   : > { %p38_p8 = scmp.ge.s32.totalorder %s37_s21, 4  ;;  %p80_p10 = scmp.ne.s32.totalorder %s1817_s29, %s1813_s28 }
  0x51   : > { %p81_p1 = scmp.eq.s32.totalorder %s1829_s10, 0  ;;  %p1424_p4 = scmp.lt.s32.totalorder %s1829_s10, 4 }
  0x52   : > { %s2425_s21 = smov (%p38_p8, %s37_s21), 0  ;;  %s2011_s26 = sand.u32 1, %s1817_s29  }
  0x53   : > { %2390 = sst [smem:[#allocation29_spill]] %s2425_s21  ;;  %p82_p5 = por %p81_p1, %p80_p10 }
  0x54   : > { %s70_s25 = ssub.s32 %s1825_s9, %s2425_s21  ;;  %s1173_s27 = sshll.u32 %s2011_s26, 7 }
  0x55   : > { %p71_p11 = scmp.eq.s32.totalorder %s70_s25, 0  ;;  %s1204_s18 = sshll.u32 %s1825_s9, 9 }
  0x56   : > { %s2392_s1 = sld [smem:[#allocation31_spill]]  ;;  %s346_s17 = scalar_lea.vmem [#allocation6], %s1173_s27 }
  0x57   : > { %s2016_s15 = scalar_select %p71_p11, %s1817_s29, %s73_s22  }
  0x58   : > { %s353_s23 = sshll.u32 %s346_s17, 4  ;;  %p2025_p12 = pnand %p1424_p4, %p82_p5  ;;  %s2029_s23 = int_to_ptr.vmem [resolvable:$true] %s353_s23 }
  0x59   : > { %2391 = sst [smem:[#allocation30_spill]] %s2016_s15  ;;  %s2394_s22 = sand.u32 1, %s1829_s10  }
  0x5a   : > { %s2393_s25 = scalar_select %p2025_p12, 1, 0 }
  0x5b   : > { %s2033_s4 = scalar_lea.sflag [#allocation7], %s2394_s22  ;;  %p2039_p0 = pneg %p2025_p12 }
  0x5c   : > { %s2021_s14 = scalar_lea.hbm %s2392_s1, %s1204_s18  ;;  %s1560_s20 = scalar_lea.hbm %s2392_s1, 8192 }
  0x5d   : > { %s1555_s19 = scalar_lea.hbm %s2021_s14, 2048  ;;  %p1561_p6 = scmp.lt.u32.totalorder %s2021_s14, %s2392_s1 }
  0x5e   : > { %p1556_p13 = scmp.ne.s32.totalorder %s2021_s14, %s1555_s19  ;;  %p1562_p8 = scmp.lt.u32.totalorder %s1560_s20, %s1555_s19 }
  0x5f   : > { %s2395_s18 = scalar_select %p2039_p0, 1, 0 }
  0x60   : > { %p1558_p2 = pnand %p2039_p0, %p1556_p13  ;;  %p1563_p10 = por %p1562_p8, %p1561_p6 }
  0x61   : > { %p1564_p1 = scmp.lt.u32.totalorder %s1555_s19, %s2021_s14 }
  0x62   : > { %p1559_p3 = pneg %p1558_p2 }
  0x63   : > { %p1565_p4 = por %p1564_p1, %p1563_p10 }
  0x65   : > { %p1566_p5 = pnand %p1565_p4, %p1559_p3 }
  0x67   : > { %1569 = shalt.err (!%p1566_p5)
}
  0x68   : > { %s1570_s22 = scalar_lea.vmem %s2029_s23, 2048  ;;  %s1835_s17 = smov [#allocation6]  }
  0x69   : > { %p1571_p11 = scmp.ne.s32.totalorder %s2029_s23, %s1570_s22  ;;  %s1575_s27 = sshll.u32 %s1835_s17, 4  ;;  %s1576_s27 = int_to_ptr.vmem [resolvable:$false] %s1575_s27 }
  0x6a   : > { %s1577_s5 = scalar_lea.vmem %s1576_s27, 4096  ;;  %p1578_p7 = scmp.lt.s32.totalorder %s2029_s23, %s1576_s27 }
  0x6b   : > { %p1573_p13 = pnand %p1571_p11, %p2039_p0  ;;  %p1579_p9 = scmp.lt.s32.totalorder %s1577_s5, %s1570_s22 }
  0x6d   : > { %p1574_p2 = pneg %p1573_p13  ;;  %p1580_p6 = por %p1579_p9, %p1578_p7 }
  0x6f   : > { %p1581_p8 = pnand %p1580_p6, %p1574_p2 }
  0x71   : > { %1584 = shalt.err (!%p1581_p8)
}
  0x72   : > { %s1836_s21 = smov 2048   ;;  %s1837_s19 = smov 512  }
  0x73   : > { %s1838_s20 = smov 32   ;;  %s1839_s1 = smov [#allocation3]  }
  0x74   : > { %1412 = dma.hbm_to_vmem [thread:$0]  (!%p2025_p12), %s2021_s14, 2048, %s2029_s23, %s2033_s4, %s1836_s21, %s1837_s19, %s1838_s20  }
  0x75   : > { %s279_s15 = sshll.u32 %s1839_s1, 4  ;;  %s1840_s17 = smov [#allocation14]   ;;  %s280_s15 = int_to_ptr.vmem [resolvable:$true] %s279_s15 }
  0x76   : > { %s320_s29 = sshll.u32 %s1840_s17, 4  ;;  %s1585_s5 = scalar_lea.hbm %s2346_s0, 256  ;;  %s321_s29 = int_to_ptr.vmem [resolvable:$true] %s320_s29 }
  0x77   : > { %p1586_p7 = scmp.ne.s32.totalorder %s2346_s0, %s1585_s5  ;;  %p2396_p9 = scmp.ne.s32.totalorder %s2388_s24, 0 }
  0x78   : > { %p1592_p1 = scmp.lt.u32.totalorder %s1585_s5, %s2346_s0 }
  0x79   : > { %p1588_p3 = pnand %p1586_p7, %p2396_p9 }
  0x7b   : > { %p1589_p10 = pneg %p1588_p3 }
  0x7d   : > { %p1594_p4 = pnand %p1592_p1, %p1589_p10 }
  0x7f   : > { %1597 = shalt.err (!%p1594_p4)
}
  0x80   : > { %s1598_s1 = scalar_lea.vmem %s280_s15, 256  ;;  %p1606_p2 = scmp.lt.s32.totalorder %s280_s15, %s280_s15 }
  0x81   : > { %p1599_p5 = scmp.ne.s32.totalorder %s280_s15, %s1598_s1  ;;  %p1607_p6 = scmp.lt.s32.totalorder %s1598_s1, %s1598_s1 }
  0x83   : > { %p1601_p11 = pnand %p1599_p5, %p2396_p9  ;;  %p1608_p8 = por %p1607_p6, %p1606_p2 }
  0x85   : > { %p1602_p13 = pneg %p1601_p11 }
  0x87   : > { %p1609_p12 = pnand %p1608_p8, %p1602_p13 }
  0x89   : > { %1612 = shalt.err (!%p1609_p12)
}
  0x8a   : > { %p2397_p7 = scmp.ne.s32.totalorder %s2386_s16, 0  ;;  %s2398_s8 = smov 8  }
  0x8b   : > { %s2399_s30 = smov 128   ;;  %s1613_s21 = scalar_lea.hbm %s2352_s6, 16 }
  0x8c   : > { %1396 = dma.hbm_to_vmem [thread:$0]  (!%p2397_p7), %s2346_s0, 256, %s280_s15, [#allocation4], %s2399_s30, %s2399_s30, %s2398_s8  }
  0x8d   : > { %p1614_p3 = scmp.ne.s32.totalorder %s2352_s6, %s1613_s21  ;;  %p1620_p1 = scmp.lt.u32.totalorder %s1613_s21, %s2352_s6 }
  0x8f   : > { %p1616_p12 = pnand %p1614_p3, %p2396_p9 }
  0x91   : > { %p1617_p10 = pneg %p1616_p12 }
  0x93   : > { %p1622_p4 = pnand %p1620_p1, %p1617_p10 }
  0x95   : > { %1625 = shalt.err (!%p1622_p4)
}
  0x96   : > { %s1626_s22 = scalar_lea.vmem %s321_s29, 16  ;;  %s1633_s15 = scalar_lea.vmem %s321_s29, 32 }
  0x97   : > { %p1627_p5 = scmp.ne.s32.totalorder %s321_s29, %s1626_s22  ;;  %p1634_p2 = scmp.lt.s32.totalorder %s321_s29, %s321_s29 }
  0x98   : > { %p1635_p6 = scmp.lt.s32.totalorder %s1633_s15, %s1626_s22 }
  0x99   : > { %p1629_p11 = pnand %p1627_p5, %p2396_p9 }
  0x9a   : > { %p1636_p8 = por %p1635_p6, %p1634_p2 }
  0x9b   : > { %p1630_p13 = pneg %p1629_p11 }
  0x9d   : > { %p1637_p0 = pnand %p1636_p8, %p1630_p13 }
  0x9f   : > { %1640 = shalt.err (!%p1637_p0)
}
  0xa0   : > { %1405 = dma.hbm_to_vmem [thread:$0]  (!%p2397_p7), %s2352_s6, 16, %s321_s29, [#allocation13]  }
  0xa1   : > { %s1841_s28 = smov [#allocation15]   ;;  %s1176_s14 = sshll.u32 %s2011_s26, 2 }
  0xa2   : > { %s331_s12 = sshll.u32 %s1841_s28, 4  ;;  %s1641_s19 = scalar_lea.hbm %s2353_s7, 16  ;;  %s332_s12 = int_to_ptr.vmem [resolvable:$true] %s331_s12 }
  0xa3   : > { %p1642_p0 = scmp.ne.s32.totalorder %s2353_s7, %s1641_s19  ;;  %p1648_p10 = scmp.lt.u32.totalorder %s1641_s19, %s2353_s7 }
  0xa5   : > { %p1644_p3 = pnand %p1642_p0, %p2396_p9 }
  0xa7   : > { %p1645_p12 = pneg %p1644_p3 }
  0xa9   : > { %p1650_p1 = pnand %p1648_p10, %p1645_p12 }
  0xab   : > { %1653 = shalt.err (!%p1650_p1)
}
  0xac   : > { %s1654_s29 = scalar_lea.vmem %s332_s12, 16  ;;  %s1661_s15 = scalar_lea.vmem %s332_s12, 32 }
  0xad   : > { %p1655_p4 = scmp.ne.s32.totalorder %s332_s12, %s1654_s29  ;;  %p1662_p13 = scmp.lt.s32.totalorder %s332_s12, %s332_s12 }
  0xae   : > { %p1663_p2 = scmp.lt.s32.totalorder %s1661_s15, %s1654_s29 }
  0xaf   : > { %p1657_p5 = pnand %p1655_p4, %p2396_p9 }
  0xb0   : > { %p1664_p6 = por %p1663_p2, %p1662_p13 }
  0xb1   : > { %p1658_p11 = pneg %p1657_p5 }
  0xb3   : > { %p1665_p8 = pnand %p1664_p6, %p1658_p11 }
  0xb5   : > { %1668 = shalt.err (!%p1665_p8)
}
  0xb6   : > { %1408 = dma.hbm_to_vmem [thread:$0]  (!%p2397_p7), %s2353_s7, 16, %s332_s12, [#allocation16]  }
  0xb7   : > { %s1205_s28 = sshll.u32 %s1825_s9, 6  ;;  %s367_s23 = scalar_lea.vmem [#allocation8], %s1176_s14 }
  0xb8   : > { %s375_s21 = sshll.u32 %s367_s23, 4  ;;  %s373_s20 = scalar_lea.hbm %s2348_s2, %s1205_s28  ;;  %s376_s21 = int_to_ptr.vmem [resolvable:$true] %s375_s21 }
  0xb9   : > { %s1669_s17 = scalar_lea.hbm %s373_s20, 64  ;;  %p2400_p0 = scmp.ne.s32.totalorder %s2395_s18, 0 }
  0xba   : > { %p1670_p9 = scmp.ne.s32.totalorder %s373_s20, %s1669_s17  ;;  %s1674_s22 = scalar_lea.hbm %s2348_s2, 256 }
  0xbb   : > { %p1675_p7 = scmp.lt.u32.totalorder %s373_s20, %s2348_s2  ;;  %p1676_p10 = scmp.lt.u32.totalorder %s1674_s22, %s1669_s17 }
  0xbc   : > { %p1672_p3 = pnand %p1670_p9, %p2400_p0  ;;  %p1678_p4 = scmp.lt.u32.totalorder %s1669_s17, %s373_s20 }
  0xbd   : > { %p1677_p1 = por %p1676_p10, %p1675_p7 }
  0xbe   : > { %p1673_p12 = pneg %p1672_p3 }
  0xbf   : > { %p1679_p5 = por %p1678_p4, %p1677_p1 }
  0xc1   : > { %p1680_p11 = pnand %p1679_p5, %p1673_p12 }
  0xc3   : > { %1683 = shalt.err (!%p1680_p11)
}
  0xc4   : > { %s1684_s12 = scalar_lea.vmem %s376_s21, 64  ;;  %s1842_s14 = smov [#allocation8]  }
  0xc5   : > { %p1685_p13 = scmp.ne.s32.totalorder %s376_s21, %s1684_s12  ;;  %s1689_s5 = sshll.u32 %s1842_s14, 4  ;;  %s1690_s5 = int_to_ptr.vmem [resolvable:$false] %s1689_s5 }
  0xc6   : > { %s1691_s1 = scalar_lea.vmem %s1690_s5, 128  ;;  %p1692_p8 = scmp.lt.s32.totalorder %s376_s21, %s1690_s5 }
  0xc7   : > { %p1687_p2 = pnand %p1685_p13, %p2400_p0  ;;  %p1693_p9 = scmp.lt.s32.totalorder %s1691_s1, %s1684_s12 }
  0xc9   : > { %p1688_p6 = pneg %p1687_p2  ;;  %p1694_p3 = por %p1693_p9, %p1692_p8 }
  0xcb   : > { %p1695_p7 = pnand %p1694_p3, %p1688_p6 }
  0xcd   : > { %1698 = shalt.err (!%p1695_p7)
}
  0xce   : > { %p2401_p10 = scmp.ne.s32.totalorder %s2393_s25, 0  ;;  %s1179_s28 = sshll.u32 %s2011_s26, 9 }
  0xcf   : > { %s1206_s23 = sshll.u32 %s1825_s9, 13  ;;  %s386_s16 = scalar_lea.vmem [#allocation9], %s1179_s28 }
  0xd0   : > { %1415 = dma.hbm_to_vmem [thread:$0]  (!%p2401_p10), %s373_s20, 64, %s376_s21, %s2033_s4  }
  0xd1   : > { %s2143_s17 = scalar_lea.hbm %s2349_s3, %s1206_s23  ;;  %s393_s27 = sshll.u32 %s386_s16, 4  ;;  %s2145_s27 = int_to_ptr.vmem [resolvable:$true] %s393_s27 }
  0xd2   : > { %s2402_s22 = sand.u32 1, %s1829_s10   ;;  %s1699_s15 = scalar_lea.hbm %s2143_s17, 8192 }
  0xd3   : > { %s2149_s29 = scalar_lea.sflag [#allocation10], %s2402_s22  ;;  %p1700_p12 = scmp.ne.s32.totalorder %s2143_s17, %s1699_s15 }
  0xd4   : > { %s1704_s21 = scalar_lea.hbm %s2349_s3, 32768  ;;  %p1705_p5 = scmp.lt.u32.totalorder %s2143_s17, %s2349_s3 }
  0xd5   : > { %p1702_p1 = pnand %p1700_p12, %p2400_p0  ;;  %p1706_p11 = scmp.lt.u32.totalorder %s1704_s21, %s1699_s15 }
  0xd6   : > { %p1708_p2 = scmp.lt.u32.totalorder %s1699_s15, %s2143_s17 }
  0xd7   : > { %p1703_p4 = pneg %p1702_p1  ;;  %p1707_p13 = por %p1706_p11, %p1705_p5 }
  0xd9   : > { %p1709_p6 = por %p1708_p2, %p1707_p13 }
  0xdb   : > { %p1710_p8 = pnand %p1709_p6, %p1703_p4 }
  0xdd   : > { %1713 = shalt.err (!%p1710_p8)
}
  0xde   : > { %s1714_s14 = scalar_lea.vmem %s2145_s27, 8192  ;;  %s1843_s5 = smov [#allocation9]  }
  0xdf   : > { %p1715_p9 = scmp.ne.s32.totalorder %s2145_s27, %s1714_s14  ;;  %s1719_s1 = sshll.u32 %s1843_s5, 4  ;;  %s1720_s1 = int_to_ptr.vmem [resolvable:$false] %s1719_s1 }
  0xe0   : > { %s1721_s28 = scalar_lea.vmem %s1720_s1, 16384  ;;  %p1722_p12 = scmp.lt.s32.totalorder %s2145_s27, %s1720_s1 }
  0xe1   : > { %p1717_p3 = pnand %p1715_p9, %p2400_p0  ;;  %p1723_p1 = scmp.lt.s32.totalorder %s1721_s28, %s1714_s14 }
  0xe3   : > { %p1718_p7 = pneg %p1717_p3  ;;  %p1724_p5 = por %p1723_p1, %p1722_p12 }
  0xe5   : > { %p1725_p11 = pnand %p1724_p5, %p1718_p7 }
  0xe7   : > { %1728 = shalt.err (!%p1725_p11)
}
  0xe8   : > { %1418 = dma.hbm_to_vmem [thread:$0]  (!%p2401_p10), %s2143_s17, 8192, %s2145_s27, %s2149_s29, %s2399_s30, %s2399_s30, %s2398_s8  }
  0xe9   : > { %p2403_p0 = scmp.ne.s32.totalorder %s2385_s13, 0 }
  0xea   : > { %p2404_p4 = scmp.eq.s32.totalorder (!%p2403_p0), %s1923_s11, 0 }
  0xeb   : > { %405 = sbr.rel (%p2403_p0) target bundleno = 1093 (0x445), region = 52 }
  0xf2   : > { %1780 = dma.done.wait (%p2404_p4), [#allocation4], 256   ;;  %p2405_p13 = pmov %p2404_p4 }
  0xf3   : > { %s2406_s18 = sld [smem:[#allocation25_spill]]  ;;  %s2407_s23 = sld [smem:[#allocation28_spill]] }
  0xf4   : > { %1782 = vsyncadd (%p2405_p13), [#allocation4], 4294967040  ;;  %s411_s25 = sand.u32 1, %s1923_s11  }
  0xf5   : > { %s412_s16 = scalar_lea.sflag [#allocation7], %s411_s25 }
  0xf9   : > { %s413_s24 = sand.u32 1, %s2406_s18   ;;  %p2408_p2 = scmp.ne.s32.totalorder %s2407_s23, 0 }
  0xfa   : > { %s1184_s19 = sshll.u32 %s413_s24, 7 }
  0xfb   : > { %s2184_s22 = scalar_lea.vmem [#allocation6], %s1184_s19 }
  0xfc   : > { %1784 = dma.done.wait (%p2408_p2), %s412_s16, 2112  }
  0xfd   : > { %1786 = vsyncadd (%p2408_p2), %s412_s16, 4294965184  ;;  %s1185_s13 = sshll.u32 %s413_s24, 2  ;;  %s1186_s8 = sshll.u32 %s413_s24, 9 }
  0xfe   : > { %s2190_s30 = scalar_lea.vmem [#allocation8], %s1185_s13  ;;  %s430_s17 = scalar_lea.sflag [#allocation10], %s411_s25 }
  0xff   : > { %s2192_s27 = scalar_lea.vmem [#allocation9], %s1186_s8 }
 0x100   : > { %1788 = dma.done.wait (%p2408_p2), %s430_s17, 8192  }
 0x101   : > { %1790 = vsyncadd (%p2408_p2), %s430_s17, 4294959104  ;;  %p2409_p10 = pmov %p2404_p4 }
 0x102   : > { %p2410_p6 = pmov %p2404_p4 }
 0x103   : > { %1792 = dma.done.wait (%p2409_p10), [#allocation10], 16  }
 0x104   : > { %1794 = vsyncadd (%p2410_p6), [#allocation10], 4294967280  ;;  %p2411_p8 = pmov %p2404_p4 }
 0x105   : > { %p2412_p9 = pmov %p2404_p4 }
 0x106   : > { %1796 = dma.done.wait (%p2411_p8), [#allocation13], 272  }
 0x107   : > { %1798 = vsyncadd (%p2412_p9), [#allocation13], 4294967024  ;;  %p2413_p3 = pmov %p2404_p4 }
 0x109   : > { %1800 = dma.done.wait (%p2413_p3), [#allocation16], 16   ;;  %p2414_p7 = pmov %p2413_p3 }
 0x10a   : > { %s2415_s29 = sld [smem:[#allocation27_spill]] }
 0x10b   : > { %1802 = vsyncadd (%p2414_p7), [#allocation16], 4294967280 }
 0x110   : > { %p1191_p12 = scmp.ne.s32.totalorder %s2415_s29, 0 }
 0x111   : > { %vm497_vm0 = vcmask (!%p1191_p12), 261120   ;;  %v1844_v0 = vmov (!%p1191_p12), 0.0  }
 0x112   : > { %496 = sbr.rel (%p1191_p12) target bundleno = 281 (0x119), region = 88  ;;  %498 = vst.msk [vmem:[#allocation2] sm:$0xff] (!%p1191_p12), %vm497_vm0, %v1844_v0  ;;  %499 = vst.msk [vmem:[#allocation2 + $0x8] sm:$0xff] (!%p1191_p12), %vm497_vm0, %v1844_v0 }
 0x119 PF: > { %v503_v1 = vld [vmem:[%s2184_s22 + $0x8] sm:$0xff]  ;;  %v505_v3 = vld [vmem:[%s2184_s22 + $0x18] sm:$0xff]  ;;  %v502_v6 = vld [vmem:[%s2184_s22] sm:$0xff]  ;;  %v1845_v8 = vmov 0.0   ;;  %vm540_vm1 = vcmask 261120   ;;  %s2416_s15 = sld [smem:[#allocation27_spill]] }
 0x11a   : > { %v507_v2 = vld [vmem:[%s2184_s22 + $0x28] sm:$0xff]  ;;  %v509_v5 = vld [vmem:[%s2184_s22 + $0x38] sm:$0xff]  ;;  %v506_v7 = vld [vmem:[%s2184_s22 + $0x20] sm:$0xff]  ;;  %611 = vmatprep.mubr.f32.mxu0 %v1845_v8  ;;  %688 = vmatprep.mubr.f32.mxu1 %v1845_v8 }
 0x11b   : > { %v1283_v4 = vpack.c.bf16 %v507_v2, %v503_v1  ;;  %v1291_v9 = vpack.c.bf16 %v509_v5, %v505_v3  ;;  %v1285_v10 = vpack.c.bf16 %v506_v7, %v502_v6  ;;  %v504_v11 = vld [vmem:[%s2184_s22 + $0x10] sm:$0xff]  ;;  %v511_v13 = vld [vmem:[%s2184_s22 + $0x48] sm:$0xff]  ;;  %v513_v16 = vld [vmem:[%s2184_s22 + $0x58] sm:$0xff] }
 0x11c   : > { %v508_v12 = vld [vmem:[%s2184_s22 + $0x30] sm:$0xff]  ;;  %v515_v15 = vld [vmem:[%s2184_s22 + $0x68] sm:$0xff]  ;;  %v517_v17 = vld [vmem:[%s2184_s22 + $0x78] sm:$0xff] }
 0x11d   : > { %1284 = vmatprep.subr.bf16.mxu0 %v1283_v4  ;;  %v1293_v14 = vpack.c.bf16 %v508_v12, %v504_v11  ;;  %1292 = vmatprep.subr.bf16.mxu1 %v1291_v9  ;;  %v1287_v18 = vpack.c.bf16 %v515_v15, %v511_v13  ;;  %v1295_v19 = vpack.c.bf16 %v517_v17, %v513_v16  ;;  %v510_v20 = vld [vmem:[%s2184_s22 + $0x40] sm:$0xff]  ;;  %v512_v22 = vld [vmem:[%s2184_s22 + $0x50] sm:$0xff]  ;;  %v727_v27 = vld [vmem:[%s2192_s27 + $0x80] sm:$0xff] }
 0x11e   : > { %1286 = vmatpush1.bf16.msra.mxu0 %v1285_v10  ;;  %v514_v21 = vld [vmem:[%s2184_s22 + $0x60] sm:$0xff]  ;;  %v516_v24 = vld [vmem:[%s2184_s22 + $0x70] sm:$0xff]  ;;  %v759_v29 = vld [vmem:[%s2192_s27 + $0x180] sm:$0xff] }
 0x11f   : > { %1294 = vmatpush1.bf16.msra.mxu1 %v1293_v14  ;;  %v1289_v23 = vpack.c.bf16 %v514_v21, %v510_v20  ;;  %1288 = vmatprep.subr.bf16.mxu0 %v1287_v18  ;;  %v1297_v25 = vpack.c.bf16 %v516_v24, %v512_v22  ;;  %v500_v26 = vld [vmem:[#allocation3] sm:$0xff]  ;;  %v711_v32 = vld [vmem:[%s2192_s27] sm:$0xff]  ;;  %v729_v37 = vld [vmem:[%s2192_s27 + $0x90] sm:$0xff]  ;;  %p1196_p1 = scmp.ne.s32.totalorder %s2416_s15, 3 }
 0x120   : > { %1296 = vmatprep.subr.bf16.mxu1 %v1295_v19  ;;  %v728_v28 = vld [vmem:[%s2192_s27 + $0x88] sm:$0xff]  ;;  %v743_v35 = vld [vmem:[%s2192_s27 + $0x100] sm:$0xff]  ;;  %v730_v39 = vld [vmem:[%s2192_s27 + $0x98] sm:$0xff] }
 0x121   : > { %v1299_v30 = vpack.c.bf16 %v728_v28, %v727_v27  ;;  %v760_v31 = vld [vmem:[%s2192_s27 + $0x188] sm:$0xff]  ;;  %v761_v40 = vld [vmem:[%s2192_s27 + $0x190] sm:$0xff]  ;;  %v762_v41 = vld [vmem:[%s2192_s27 + $0x198] sm:$0xff]  ;;  %v1303_v43 = vpack.c.bf16 %v730_v39, %v729_v37 }
 0x122   : > { %v712_v33 = vld [vmem:[%s2192_s27 + $0x8] sm:$0xff]  ;;  %1290 = vmatpush1.bf16.msra.mxu0 %v1289_v23  ;;  %v1331_v34 = vpack.c.bf16 %v760_v31, %v759_v29  ;;  %v713_v44 = vld [vmem:[%s2192_s27 + $0x10] sm:$0xff]  ;;  %v714_v45 = vld [vmem:[%s2192_s27 + $0x18] sm:$0xff]  ;;  %v1335_v47 = vpack.c.bf16 %v762_v41, %v761_v40 }
 0x123   : > { %v744_v36 = vld [vmem:[%s2192_s27 + $0x108] sm:$0xff]  ;;  %1298 = vmatpush1.bf16.msra.mxu1 %v1297_v25  ;;  %1300 = vmatprep.subr.bf16.mxu0 %v1299_v30  ;;  %v1301_v38 = vpack.c.bf16 %v712_v33, %v711_v32  ;;  %v745_v46 = vld [vmem:[%s2192_s27 + $0x110] sm:$0xff]  ;;  %v746_v48 = vld [vmem:[%s2192_s27 + $0x118] sm:$0xff]  ;;  %v1305_v54 = vpack.c.bf16 %v714_v45, %v713_v44 }
 0x124   : > { %1332 = vmatprep.subr.bf16.mxu1 %v1331_v34  ;;  %v1333_v42 = vpack.c.bf16 %v744_v36, %v743_v35  ;;  %v731_v49 = vld [vmem:[%s2192_s27 + $0xa0] sm:$0xff]  ;;  %v732_v50 = vld [vmem:[%s2192_s27 + $0xa8] sm:$0xff]  ;;  %v501_v51 = vld [vmem:[#allocation3 + $0x8] sm:$0xff]  ;;  %v1337_v55 = vpack.c.bf16 %v746_v48, %v745_v46 }
 0x125   : > { %1192 = vmatmul.mubr.msk.f32.vlgmr.msra.gmra.mrb[0].mxu0 %vm540_vm1, %v500_v26  ;;  %v763_v52 = vld [vmem:[%s2192_s27 + $0x1a0] sm:$0xff]  ;;  %v764_v53 = vld [vmem:[%s2192_s27 + $0x1a8] sm:$0xff]  ;;  %v1307_v56 = vpack.c.bf16 %v732_v50, %v731_v49  ;;  %v733_v62 = vld [vmem:[%s2192_s27 + $0xb0] sm:$0xff] }
 0x126   : > { %1194 = vmatmul.mubr.msk.f32.vlgmr.msra.gmra.mrb[0].mxu1 %vm540_vm1, %v500_v26  ;;  %617 = vmatprep.mubr.f32.mxu0 %v1845_v8  ;;  %v715_v57 = vld [vmem:[%s2192_s27 + $0x20] sm:$0xff]  ;;  %v716_v58 = vld [vmem:[%s2192_s27 + $0x28] sm:$0xff]  ;;  %v1339_v60 = vpack.c.bf16 %v764_v53, %v763_v52  ;;  %v734_v63 = vld [vmem:[%s2192_s27 + $0xb8] sm:$0xff] }
 0x127   : > { %694 = vmatprep.mubr.f32.mxu1 %v1845_v8  ;;  %1302 = vmatpush3.bf16.msra.mxu0 %v1301_v38  ;;  %v747_v59 = vld [vmem:[%s2192_s27 + $0x120] sm:$0xff]  ;;  %v748_v61 = vld [vmem:[%s2192_s27 + $0x128] sm:$0xff]  ;;  %v765_v0 = vld [vmem:[%s2192_s27 + $0x1b0] sm:$0xff]  ;;  %v1309_v2 = vpack.c.bf16 %v716_v58, %v715_v57  ;;  %v1311_v4 = vpack.c.bf16 %v734_v63, %v733_v62 }
 0x128   : > { %1334 = vmatpush3.bf16.msra.mxu1 %v1333_v42  ;;  %1304 = vmatprep.subr.bf16.mxu0 %v1303_v43  ;;  %v766_v1 = vld [vmem:[%s2192_s27 + $0x1b8] sm:$0xff]  ;;  %v1341_v3 = vpack.c.bf16 %v748_v61, %v747_v59  ;;  %v717_v5 = vld [vmem:[%s2192_s27 + $0x30] sm:$0xff]  ;;  %v735_v10 = vld [vmem:[%s2192_s27 + $0xc0] sm:$0xff] }
 0x129   : > { %1193 = vmatmul.mubr.msk.f32.gmra.mrb[2].mxu0 %vm540_vm1, %v501_v51  ;;  %1336 = vmatprep.subr.bf16.mxu1 %v1335_v47  ;;  %v718_v6 = vld [vmem:[%s2192_s27 + $0x38] sm:$0xff]  ;;  %v749_v7 = vld [vmem:[%s2192_s27 + $0x130] sm:$0xff]  ;;  %v1343_v8 = vpack.c.bf16 %v766_v1, %v765_v0  ;;  %v736_v11 = vld [vmem:[%s2192_s27 + $0xc8] sm:$0xff] }
 0x12a   : > { %1195 = vmatmul.mubr.msk.f32.gmra.mrb[2].mxu1 %vm540_vm1, %v501_v51  ;;  %v750_v9 = vld [vmem:[%s2192_s27 + $0x138] sm:$0xff]  ;;  %v767_v12 = vld [vmem:[%s2192_s27 + $0x1c0] sm:$0xff]  ;;  %v768_v13 = vld [vmem:[%s2192_s27 + $0x1c8] sm:$0xff]  ;;  %v1313_v14 = vpack.c.bf16 %v718_v6, %v717_v5  ;;  %v1315_v16 = vpack.c.bf16 %v736_v11, %v735_v10 }
 0x12b   : > { %1306 = vmatpush3.bf16.msra.mxu0 %v1305_v54  ;;  %v1345_v15 = vpack.c.bf16 %v750_v9, %v749_v7  ;;  %v719_v17 = vld [vmem:[%s2192_s27 + $0x40] sm:$0xff]  ;;  %v720_v18 = vld [vmem:[%s2192_s27 + $0x48] sm:$0xff]  ;;  %v1347_v20 = vpack.c.bf16 %v768_v13, %v767_v12  ;;  %v737_v22 = vld [vmem:[%s2192_s27 + $0xd0] sm:$0xff] }
 0x12c   : > { %1338 = vmatpush3.bf16.msra.mxu1 %v1337_v55  ;;  %1308 = vmatprep.subr.bf16.mxu0 %v1307_v56  ;;  %v751_v19 = vld [vmem:[%s2192_s27 + $0x140] sm:$0xff]  ;;  %v752_v21 = vld [vmem:[%s2192_s27 + $0x148] sm:$0xff]  ;;  %v738_v23 = vld [vmem:[%s2192_s27 + $0xd8] sm:$0xff]  ;;  %v1317_v26 = vpack.c.bf16 %v720_v18, %v719_v17 }
 0x12d   : > { %1340 = vmatprep.subr.bf16.mxu1 %v1339_v60  ;;  %v769_v24 = vld [vmem:[%s2192_s27 + $0x1d0] sm:$0xff]  ;;  %v770_v25 = vld [vmem:[%s2192_s27 + $0x1d8] sm:$0xff]  ;;  %v1349_v27 = vpack.c.bf16 %v752_v21, %v751_v19  ;;  %v1319_v28 = vpack.c.bf16 %v738_v23, %v737_v22  ;;  %v739_v34 = vld [vmem:[%s2192_s27 + $0xe0] sm:$0xff]  ;;  %v520_v60 = vlaneseq }
 0x12e   : > { %v721_v29 = vld [vmem:[%s2192_s27 + $0x50] sm:$0xff]  ;;  %v722_v30 = vld [vmem:[%s2192_s27 + $0x58] sm:$0xff]  ;;  %v1351_v32 = vpack.c.bf16 %v770_v25, %v769_v24  ;;  %v740_v35 = vld [vmem:[%s2192_s27 + $0xe8] sm:$0xff] }
 0x12f   : > { %1310 = vmatpush3.bf16.msra.mxu0 %v1309_v2  ;;  %v753_v31 = vld [vmem:[%s2192_s27 + $0x150] sm:$0xff]  ;;  %v754_v33 = vld [vmem:[%s2192_s27 + $0x158] sm:$0xff]  ;;  %v771_v36 = vld [vmem:[%s2192_s27 + $0x1e0] sm:$0xff]  ;;  %v1321_v38 = vpack.c.bf16 %v722_v30, %v721_v29  ;;  %v1323_v40 = vpack.c.bf16 %v740_v35, %v739_v34  ;;  %v521_v61 = vshrl.u32 %v520_v60, 7 }
 0x130   : > { %1342 = vmatpush3.bf16.msra.mxu1 %v1341_v3  ;;  %1312 = vmatprep.subr.bf16.mxu0 %v1311_v4  ;;  %v772_v37 = vld [vmem:[%s2192_s27 + $0x1e8] sm:$0xff]  ;;  %v1353_v39 = vpack.c.bf16 %v754_v33, %v753_v31  ;;  %v723_v42 = vld [vmem:[%s2192_s27 + $0x60] sm:$0xff]  ;;  %v741_v48 = vld [vmem:[%s2192_s27 + $0xf0] sm:$0xff] }
 0x131   : > { %1344 = vmatprep.subr.bf16.mxu1 %v1343_v8  ;;  %v1355_v41 = vpack.c.bf16 %v772_v37, %v771_v36  ;;  %v724_v43 = vld [vmem:[%s2192_s27 + $0x68] sm:$0xff]  ;;  %v755_v44 = vld [vmem:[%s2192_s27 + $0x160] sm:$0xff]  ;;  %v742_v49 = vld [vmem:[%s2192_s27 + $0xf8] sm:$0xff]  ;;  %v522_v62 = vsub.s32 0, %v521_v61  ;;  %v530_v0 = vsub.s32 2, %v521_v61  ;;  %v526_v1 = vsub.s32 1, %v521_v61 }
 0x132   : > { %v1325_v45 = vpack.c.bf16 %v724_v43, %v723_v42  ;;  %v756_v46 = vld [vmem:[%s2192_s27 + $0x168] sm:$0xff]  ;;  %v773_v50 = vld [vmem:[%s2192_s27 + $0x1f0] sm:$0xff]  ;;  %v1327_v51 = vpack.c.bf16 %v742_v49, %v741_v48  ;;  %v774_v52 = vld [vmem:[%s2192_s27 + $0x1f8] sm:$0xff]  ;;  %v534_v2 = vsub.s32 3, %v521_v61 }
 0x133   : > { %1314 = vmatpush3.bf16.msra.mxu0 %v1313_v14  ;;  %v1357_v47 = vpack.c.bf16 %v756_v46, %v755_v44  ;;  %v725_v53 = vld [vmem:[%s2192_s27 + $0x70] sm:$0xff]  ;;  %v726_v54 = vld [vmem:[%s2192_s27 + $0x78] sm:$0xff]  ;;  %v1359_v55 = vpack.c.bf16 %v774_v52, %v773_v50  ;;  %v710_v46 = vld [vmem:[#allocation2 + $0x8] sm:$0xff] }
 0x134   : > { %1346 = vmatpush3.bf16.msra.mxu1 %v1345_v15  ;;  %1316 = vmatprep.subr.bf16.mxu0 %v1315_v16  ;;  %v1329_v56 = vpack.c.bf16 %v726_v54, %v725_v53  ;;  %v757_v57 = vld [vmem:[%s2192_s27 + $0x170] sm:$0xff]  ;;  %v758_v58 = vld [vmem:[%s2192_s27 + $0x178] sm:$0xff]  ;;  %v1197_v50 = vld [vmem:[#allocation11] ss:$0 sm:$0xff] (!%p1196_p1) }
 0x135   : > { %1348 = vmatprep.subr.bf16.mxu1 %v1347_v20  ;;  %v1361_v59 = vpack.c.bf16 %v758_v58, %v757_v57  ;;  %v518_v63 = vld [vmem:[%s2190_s30] sm:$0xf]  ;;  %v945_v54 = vld [vmem:[#allocation12 + $0x8] sm:$0xff] (!%p1196_p1) }
 0x136   : > { %v523_v3 = vrot.slane %v518_v63, %v522_v62  ;;  %v531_v4 = vrot.slane %v518_v63, %v530_v0  ;;  %v527_v5 = vrot.slane %v518_v63, %v526_v1  ;;  %v535_v6 = vrot.slane %v518_v63, %v534_v2  ;;  %v709_v37 = vld [vmem:[#allocation2] sm:$0xff] }
 0x137   : > { %1318 = vmatpush3.bf16.msra.mxu0 %v1317_v26 }
 0x138   : > { %1350 = vmatpush3.bf16.msra.mxu1 %v1349_v27  ;;  %1320 = vmatprep.subr.bf16.mxu0 %v1319_v28 }
 0x139   : > { %1352 = vmatprep.subr.bf16.mxu1 %v1351_v32 }
 0x13b   : > { %1322 = vmatpush3.bf16.msra.mxu0 %v1321_v38 }
 0x13c   : > { %1354 = vmatpush3.bf16.msra.mxu1 %v1353_v39  ;;  %1324 = vmatprep.subr.bf16.mxu0 %v1323_v40 }
 0x13d   : > { %1356 = vmatprep.subr.bf16.mxu1 %v1355_v41 }
 0x13f   : > { %1326 = vmatpush3.bf16.msra.mxu0 %v1325_v45 }
 0x140   : > { %1358 = vmatpush3.bf16.msra.mxu1 %v1357_v47  ;;  %1328 = vmatprep.subr.bf16.mxu0 %v1327_v51  ;;  %v944_v51 = vld [vmem:[#allocation12] sm:$0xff] (!%p1196_p1) }
 0x141   : > { %1360 = vmatprep.subr.bf16.mxu1 %v1359_v55 }
 0x143   : > { %1330 = vmatpush3.bf16.msra.mxu0 %v1329_v56 }
 0x144   : > { %1362 = vmatpush3.bf16.msra.mxu1 %v1361_v59 }
 0x1f8   : > { %v613_v7 = vpop.f32.mrb[0].mxu0 }
 0x1f9   : > { %v614_v8 = vadd.f32 %v613_v7, %v523_v3  ;;  %v690_v9 = vpop.f32.mrb[0].mxu1  ;;  %v615_v10 = vpop.f32.mrb[1].mxu0 }
 0x1fa   : > { %v691_v11 = vadd.f32 %v690_v9, %v531_v4  ;;  %v616_v12 = vadd.f32 %v615_v10, %v527_v5  ;;  %v692_v13 = vpop.f32.mrb[1].mxu1 }
 0x1fb   : > { %v693_v14 = vadd.f32 %v692_v13, %v535_v6  ;;  %v701_v17 = vmax.f32 %v614_v8, 0.0  ;;  %v1198_v13 = vld [vmem:[#allocation14] ss:$0 sm:$0xff] (!%p1196_p1) }
 0x1fc   : > { %v702_v15 = vmax.f32 %v616_v12, 0.0  ;;  %v619_v16 = vpop.f32.mrb[2].mxu0  ;;  %v703_v22 = vmax.f32 %v691_v11, 0.0 }
 0x1fd   : > { %v704_v18 = vmax.f32 %v693_v14, 0.0  ;;  %v620_v19 = vadd.f32 %v619_v16, %v523_v3  ;;  %v696_v20 = vpop.f32.mrb[2].mxu1  ;;  %v621_v21 = vpop.f32.mrb[3].mxu0 }
 0x1fe   : > { %v697_v23 = vadd.f32 %v696_v20, %v531_v4  ;;  %v622_v24 = vadd.f32 %v621_v21, %v527_v5  ;;  %v698_v25 = vpop.f32.mrb[3].mxu1  ;;  %839 = vmatprep.mubr.f32.mxu0 %v702_v15  ;;  %v1199_v15 = vld [vmem:[#allocation15] ss:$0 sm:$0xff] (!%p1196_p1) }
 0x1ff   : > { %v699_v26 = vadd.f32 %v698_v25, %v535_v6  ;;  %914 = vmatprep.mubr.f32.mxu1 %v704_v18  ;;  %840 = vmatmul.mubr.f32.vlgmr.msra.gmra.mrb[4].mxu0 %v701_v17  ;;  %v705_v28 = vmax.f32 %v620_v19, 0.0 }
 0x200   : > { %v706_v27 = vmax.f32 %v622_v24, 0.0  ;;  %915 = vmatmul.mubr.f32.vlgmr.msra.gmra.mrb[4].mxu1 %v703_v22  ;;  %v707_v30 = vmax.f32 %v697_v23, 0.0 }
 0x201   : > { %v708_v29 = vmax.f32 %v699_v26, 0.0 }
 0x202   : > { %844 = vmatprep.mubr.f32.mxu0 %v706_v27 }
 0x203   : > { %919 = vmatprep.mubr.f32.mxu1 %v708_v29  ;;  %845 = vmatmul.mubr.f32.gmra.mrb[6].mxu0 %v705_v28 }
 0x204   : > { %920 = vmatmul.mubr.f32.gmra.mrb[6].mxu1 %v707_v30 }
 0x2d2   : > { %v1239_v31 = vpop.f32.mrb[4].mxu0 }
 0x2d3   : > { %v1277_v32 = vpop.f32.mrb[4].mxu1  ;;  %v1240_v33 = vpop.f32.mrb[5].mxu0 }
 0x2d4   : > { %v1241_v34 = vadd.f32 %v1240_v33, %v1239_v31  ;;  %v1278_v35 = vpop.f32.mrb[5].mxu1 }
 0x2d5   : > { %v1279_v36 = vadd.f32 %v1278_v35, %v1277_v32 }
 0x2d6   : > { %v1242_v38 = vpop.f32.mrb[6].mxu0 }
 0x2d7   : > { %v917_v39 = vadd.f32 %v1279_v36, %v1241_v34  ;;  %v1280_v40 = vpop.f32.mrb[6].mxu1  ;;  %v1243_v41 = vpop.f32.mrb[7].mxu0 }
 0x2d8   : > { %v1244_v42 = vadd.f32 %v1243_v41, %v1242_v38  ;;  %v1281_v43 = vpop.f32.mrb[7].mxu1 }
 0x2d9   : > { %v925_v44 = vadd.f32 %v917_v39, %v709_v37  ;;  %v1282_v45 = vadd.f32 %v1281_v43, %v1280_v40  ;;  %932 = sbr.rel (%p1196_p1) target bundleno = 1061 (0x425), region = 92 }
 0x2db   : > { %927 = vst.msk [vmem:[#allocation2] sm:$0xff] %vm540_vm1, %v925_v44  ;;  %v922_v47 = vadd.f32 %v1282_v45, %v1244_v42 }
 0x2dd   : > { %v926_v48 = vadd.f32 %v922_v47, %v710_v46 }
 0x2df   : > { %928 = vst.msk [vmem:[#allocation2 + $0x8] sm:$0xff] %vm540_vm1, %v926_v48 }
 0x2e2   : > { %v933_v49 = vld [vmem:[#allocation2] sm:$0xff] }
 0x2e3   : > { %v942_v52 = vadd.f32 %v1197_v50, %v933_v49 }
 0x2e5   : > { %v946_v56 = vadd.f32 %v944_v51, %v942_v52 }
 0x2e6   : > { %v934_v53 = vld [vmem:[#allocation2 + $0x8] sm:$0xff] }
 0x2e7   : > { %v943_v55 = vadd.f32 %v1197_v50, %v934_v53  ;;  %v948_v58 = vsel %vm540_vm1, %v946_v56, 0.0 }
 0x2e8   : > { %949 = vadd.xlane.f32.xlu0 %v948_v58 }
 0x2e9   : > { %v947_v57 = vadd.f32 %v945_v54, %v943_v55 }
 0x2eb   : > { %v951_v59 = vsel %vm540_vm1, %v947_v57, 0.0 }
 0x2ec   : > { %952 = vadd.xlane.f32.xlu0 %v951_v59 }
 0x375   : > { %v950_v60 = vpop.xlane.xlu0 %949 }
 0x376   : > { %v955_v61 = vmul.f32 0.03125, %v950_v60 }
 0x378   : > { %v957_v62 = vsub.f32 %v946_v56, %v955_v61 }
 0x379   : > { %v953_v63 = vpop.xlane.xlu0 %952 }
 0x37a   : > { %v956_v0 = vmul.f32 0.03125, %v953_v63  ;;  %v959_v1 = vmul.f32 %v957_v62, %v957_v62 }
 0x37c   : > { %v958_v2 = vsub.f32 %v947_v57, %v956_v0  ;;  %v961_v3 = vsel %vm540_vm1, %v959_v1, 0.0 }
 0x37d   : > { %962 = vadd.xlane.f32.xlu1 %v961_v3 }
 0x37e   : > { %v960_v4 = vmul.f32 %v958_v2, %v958_v2 }
 0x380   : > { %v964_v5 = vsel %vm540_vm1, %v960_v4, 0.0 }
 0x381   : > { %965 = vadd.xlane.f32.xlu1 %v964_v5 }
 0x40a   : > { %v963_v6 = vpop.xlane.xlu1 %962 }
 0x40b   : > { %v967_v7 = vmul.f32 0.03125, %v963_v6 }
 0x40d   : > { %v969_v8 = vadd.f32 1e-05, %v967_v7 }
 0x40e   : > { %v966_v9 = vpop.xlane.xlu1 %965 }
 0x40f   : > { %1495 = vrsqrt.f32 %v969_v8  ;;  %v968_v10 = vmul.f32 0.03125, %v966_v9 }
 0x411   : > { %v970_v11 = vadd.f32 1e-05, %v968_v10 }
 0x413   : > { %1497 = vrsqrt.f32 %v970_v11 }
 0x419   : > { %v1496_v12 = vpop.eup %1495 }
 0x41a   : > { %v973_v14 = vmul.f32 %v1496_v12, %v957_v62 }
 0x41c   : > { %v982_v16 = vmul.f32 %v1198_v13, %v973_v14 }
 0x41d   : > { %v1498_v17 = vpop.eup %1497 }
 0x41e   : > { %v991_v18 = vadd.f32 %v1199_v15, %v982_v16  ;;  %v974_v19 = vmul.f32 %v1498_v17, %v958_v2 }
 0x420   : > { %993 = vst.msk [vmem:[#allocation17] sm:$0xff] %vm540_vm1, %v991_v18  ;;  %v983_v20 = vmul.f32 %v1198_v13, %v974_v19 }
 0x422   : > { %v992_v21 = vadd.f32 %v1199_v15, %v983_v20 }
 0x424   : > { %994 = vst.msk [vmem:[#allocation17 + $0x8] sm:$0xff] %vm540_vm1, %v992_v21 }
 0x425 PF: > { %p1430_p5 = scmp.eq.s32.totalorder %s1923_s11, 3  ;;  %s1846_s4 = smov [#allocation17]  }
 0x426   : > { %s1004_s26 = sshll.u32 %s1846_s4, 4  ;;  %s1005_s26 = int_to_ptr.vmem [resolvable:$true] %s1004_s26 }
 0x427   : > { %s1729_s21 = scalar_lea.vmem %s1005_s26, 256  ;;  %p1736_p13 = scmp.lt.s32.totalorder %s1005_s26, %s1005_s26 }
 0x428   : > { %p1730_p11 = scmp.ne.s32.totalorder %s1005_s26, %s1729_s21  ;;  %p1737_p2 = scmp.lt.s32.totalorder %s1729_s21, %s1729_s21 }
 0x42a   : > { %p1731_p0 = pnand %p1730_p11, %p1430_p5  ;;  %p1738_p10 = por %p1737_p2, %p1736_p13 }
 0x42c   : > { %p1732_p4 = pneg %p1731_p0 }
 0x42e   : > { %p1739_p6 = pnand %p1738_p10, %p1732_p4 }
 0x430   : > { %1742 = shalt.err (!%p1739_p6)
}
 0x431   : > { %s2417_s14 = sld [smem:[#allocation34_spill]] }
 0x437   : > { %s1743_s5 = scalar_lea.hbm %s2417_s14, 256 }
 0x438   : > { %p1744_p8 = scmp.ne.s32.totalorder %s2417_s14, %s1743_s5  ;;  %p1749_p7 = scmp.lt.u32.totalorder %s1743_s5, %s2417_s14 }
 0x43a   : > { %p1745_p9 = pnand %p1744_p8, %p1430_p5 }
 0x43c   : > { %p1746_p3 = pneg %p1745_p9 }
 0x43e   : > { %p1751_p12 = pnand %p1749_p7, %p1746_p3 }
 0x440   : > { %1754 = shalt.err (!%p1751_p12)
}
 0x441   : > { %s1847_s25 = smov 128   ;;  %s1848_s24 = smov 8  }
 0x442   : > { %1390 = dma.vmem_to_hbm [thread:$0]  (%p1430_p5), %s1005_s26, 256, %s2417_s14, [#allocation5], %s1847_s25, %s1847_s25, %s1848_s24  }
 0x443   : > { %1804 = dma.done.wait (%p1430_p5), [#allocation5], 256  }
 0x444   : > { %1806 = vsyncadd (%p1430_p5), [#allocation5], 4294967040 }
 0x445 PF: > { %s28_s10 = sadd.s32 1, %s1829_s10   ;;  %s2418_s27 = sld [smem:[#allocation25_spill]] }
 0x446   : > { %p25_p1 = scmp.ge.s32.totalorder %s28_s10, 6   ;;  %s2419_s28 = sld [smem:[#allocation26_spill]] }
 0x447   : > { %s2420_s29 = sld [smem:[#allocation30_spill]]  ;;  %s2421_s22 = sld [smem:[#allocation29_spill]] }
 0x448   : > { %s2422_s30 = smov %s1825_s9  ;;  %27 = sbr.rel (!%p25_p1) target bundleno = 15 (0xf), region = 145 }
 0x44d   : > { %s2423_s9 = smov %s2421_s22 }
 0x44f   :  { %1020 = vsyncpa [#allocation4], 1 }
 0x450   :  { %1022 = vsyncpa [#allocation4 + $0x1], 1 }
 0x451   :  { %1023 = vsyncpa [#allocation7], 1 }
 0x452   :  { %1025 = vsyncpa [#allocation7 + $0x1], 1 }
 0x453   :  { %1026 = vsyncpa [#allocation10], 1 }
 0x454   :  { %1028 = vsyncpa [#allocation10 + $0x1], 1 }
 0x455   :  { %1029 = vsyncpa [#allocation13], 1 }
 0x456   :  { %1030 = vsyncpa [#allocation16], 1 }
 0x457   :  { %1031 = vsyncpa [#allocation5], 1 }
 0x458   :  { %1033 = vsyncpa [#allocation5 + $0x1], 1 }

</bundles_post_ra>
